<compile_context>
chip_gen: v6e
topology: v6e:2x2x1
jax: 0.10.0
libtpu: 0.0.40
codegen_flags: <defaults>
</compile_context>

<pallas_src>
import functools

import jax
import jax.numpy as jnp
from jax import lax
from jax.experimental import pallas as pl
from jax.experimental.pallas import tpu as pltpu


LANE = 128


def _round_up(x, m):
    return (x + m - 1) // m * m


# -----------------------------------------------------------------------------
# Fused kernel: conv1(3x3)+bias+ReLU -> conv2(3x3)+bias -> +1x1 shortcut
#               [-> 2x2 avg pool], one batch element per grid step.
# -----------------------------------------------------------------------------
def _optimized_block_kernel(*refs, hh, ww, cin, cout_p, downsample):
    if downsample:
        (xpad_ref, w1_ref, b1_ref, w2_ref, b2_ref, wsc_ref, bsc_ref,
         pool_ref, out_ref, h1_ref) = refs
    else:
        (xpad_ref, w1_ref, b1_ref, w2_ref, b2_ref, wsc_ref, bsc_ref,
         out_ref, h1_ref) = refs
        pool_ref = None

    f32 = jnp.float32
    cdt = w1_ref.dtype          # matmul compute dtype (f32 or bf16)
    m = hh * ww

    xpad = xpad_ref[0]          # (hh+2, ww+2, cin) float32, padded input
    xc = xpad.astype(cdt)

    # ---- conv1: 3x3, pad=1, im2col fused as 9 shifted-view MXU matmuls ----
    acc = jnp.zeros((m, cout_p), f32)
    for dh in range(3):
        for dw in range(3):
            patch = xc[dh:dh + hh, dw:dw + ww, :].reshape(m, cin)
            acc = acc + jnp.dot(patch, w1_ref[dh * 3 + dw],
                                preferred_element_type=f32)
    h1 = jnp.maximum(acc + b1_ref[...], 0.0)            # bias + ReLU in f32

    # conv1 result stays in a zero-padded VMEM scratch: conv2 slides over it
    # directly — no HBM round trip, no host-side re-padding.
    h1_ref[...] = jnp.zeros_like(h1_ref)
    h1_ref[pl.ds(1, hh), pl.ds(1, ww), :] = h1.reshape(hh, ww, cout_p)

    # ---- conv2: 3x3, pad=1 over the padded scratch ----
    acc = jnp.zeros((m, cout_p), f32)
    for dh in range(3):
        for dw in range(3):
            patch = h1_ref[pl.ds(dh, hh), pl.ds(dw, ww), :].reshape(m, cout_p)
            acc = acc + jnp.dot(patch.astype(cdt), w2_ref[dh * 3 + dw],
                                preferred_element_type=f32)
    y = acc + b2_ref[...]

    # ---- 1x1 shortcut conv + residual add fused into the epilogue ----
    sx = xc[1:hh + 1, 1:ww + 1, :].reshape(m, cin)
    sc = jnp.dot(sx, wsc_ref[...], preferred_element_type=f32) + bsc_ref[...]
    z = y + sc                                           # (m, cout_p) f32

    if downsample:
        # Fused 2x2 average pool.  avg-pool commutes with the pointwise-linear
        # shortcut, so pool(y) + c_sc(pool(x)) == pool(y + c_sc(x)); applied
        # as a single f32 MXU matmul with a constant pooling operator
        # (guaranteed lowering, avoids relayout-heavy in-kernel reshapes).
        z = jnp.dot(pool_ref[...], z, preferred_element_type=f32)

    out_ref[0] = z.astype(out_ref.dtype)                 # lane-dense store


def _fused_block(x_pad, w1, b1, w2, b2, wsc, bsc, pool_mat, *,
                 hh, ww, downsample, out_dtype):
    n = x_pad.shape[0]
    cin = x_pad.shape[-1]
    cout_p = w1.shape[-1]
    m_out = (hh // 2) * (ww // 2) if downsample else hh * ww

    kernel = functools.partial(
        _optimized_block_kernel,
        hh=hh, ww=ww, cin=cin, cout_p=cout_p, downsample=downsample)

    def full(a):  # whole-array block, loaded once and kept VMEM-resident
        return pl.BlockSpec(a.shape, lambda i, _nd=a.ndim: (0,) * _nd)

    in_specs = [
        pl.BlockSpec((1, hh + 2, ww + 2, cin), lambda i: (i, 0, 0, 0)),
        full(w1), full(b1), full(w2), full(b2), full(wsc), full(bsc),
    ]
    args = [x_pad, w1, b1, w2, b2, wsc, bsc]
    if downsample:
        in_specs.append(full(pool_mat))
        args.append(pool_mat)

    return pl.pallas_call(
        kernel,
        out_shape=jax.ShapeDtypeStruct((n, m_out, cout_p), out_dtype),
        grid=(n,),
        in_specs=in_specs,
        out_specs=pl.BlockSpec((1, m_out, cout_p), lambda i: (i, 0, 0)),
        scratch_shapes=[pltpu.VMEM((hh + 2, ww + 2, cout_p), jnp.float32)],
        compiler_params=pltpu.CompilerParams(
            dimension_semantics=("parallel",)),
    )(*args)


# -----------------------------------------------------------------------------
# Glue: parameter init, spectral norm stand-in, pooling operator, reference
# -----------------------------------------------------------------------------
def _spectral_normalize(w, key, eps=1e-4, n_iter=1):
    # TODO(synk): torch spectral_norm keeps persistent u/v power-iteration
    # buffers updated every forward; this is a deterministic single-iteration
    # stand-in from a fixed random u (the torch buffer init is random anyway).
    cout = w.shape[0]
    w_mat = w.reshape(cout, -1)
    u = jax.random.normal(key, (cout,), dtype=w.dtype)
    u = u / jnp.maximum(jnp.linalg.norm(u), eps)
    v = u
    for _ in range(n_iter):
        v = w_mat.T @ u
        v = v / jnp.maximum(jnp.linalg.norm(v), eps)
        u = w_mat @ v
        u = u / jnp.maximum(jnp.linalg.norm(u), eps)
    sigma = u @ (w_mat @ v)
    return w / sigma


def _init_conv_params(key, out_ch, in_ch, k):
    """PyTorch Conv2d default init: U(-1/sqrt(fan_in), 1/sqrt(fan_in))."""
    kw_key, kb_key = jax.random.split(key)
    fan_in = in_ch * k * k
    bound = 1.0 / jnp.sqrt(fan_in)
    w = jax.random.uniform(kw_key, (out_ch, in_ch, k, k), jnp.float32, -bound, bound)
    b = jax.random.uniform(kb_key, (out_ch,), jnp.float32, -bound, bound)
    return w, b


def _avg_pool_matrix(h, w):
    """(h//2*w//2, h*w) operator: 2x2 average pool over a row-major (h, w) grid
    flattened into the matmul M dimension."""
    ho, wo = h // 2, w // 2
    oi = jnp.arange(ho * wo)
    oh, ow = oi // wo, oi % wo
    p = jnp.zeros((ho * wo, h * w), jnp.float32)
    for dh in range(2):
        for dw in range(2):
            src = (2 * oh + dh) * w + (2 * ow + dw)
            p = p + 0.25 * jax.nn.one_hot(src, h * w, dtype=jnp.float32)
    return p


def _avg_pool2x2_nhwc(x):
    n, h, w, c = x.shape
    return x.reshape(n, h // 2, 2, w // 2, 2, c).mean(axis=(2, 4))


class OptimizedBlockPallas:
    """Pallas implementation of OptimizedBlock (ksize=3, pad=1 only)."""

    def __init__(self, in_ch, out_ch, ksize=3, pad=1, downsample=False,
                 compute_dtype=jnp.float32, key=None):
        assert ksize == 3 and pad == 1, "only ksize=3 / pad=1 is implemented"
        if key is None:
            key = jax.random.PRNGKey(0)
        self.in_ch, self.out_ch, self.downsample = in_ch, out_ch, downsample
        self.compute_dtype = compute_dtype
        self.cout_p = _round_up(out_ch, LANE)
        pc = self.cout_p - out_ch

        k1, k2, k3, s1, s2, s3 = jax.random.split(key, 6)
        w1, b1 = _init_conv_params(k1, out_ch, in_ch, 3)
        w2, b2 = _init_conv_params(k2, out_ch, out_ch, 3)
        wsc, bsc = _init_conv_params(k3, out_ch, in_ch, 1)
        w1 = _spectral_normalize(w1, s1)
        w2 = _spectral_normalize(w2, s2)
        wsc = _spectral_normalize(wsc, s3)

        # Kernel-side forms: (9, Cin, Cout_p) / (Cin, Cout_p), Cout zero-padded
        # to 128 lanes for lane-dense stores, pre-cast once to compute dtype
        # (bf16 halves weight bytes & doubles MXU rate; accumulation stays f32).
        w1k = jnp.transpose(w1, (2, 3, 1, 0)).reshape(9, in_ch, out_ch)
        self.w1k = jnp.pad(w1k, ((0, 0), (0, 0), (0, pc))).astype(compute_dtype)
        w2k = jnp.transpose(w2, (2, 3, 1, 0)).reshape(9, out_ch, out_ch)
        self.w2k = jnp.pad(w2k, ((0, 0), (0, pc), (0, pc))).astype(compute_dtype)
        wsck = jnp.transpose(wsc[:, :, 0, 0], (1, 0))            # (Cin, Cout)
        self.wsck = jnp.pad(wsck, ((0, 0), (0, pc))).astype(compute_dtype)
        self.b1k = jnp.pad(b1, (0, pc)).reshape(1, self.cout_p)  # biases in f32
        self.b2k = jnp.pad(b2, (0, pc)).reshape(1, self.cout_p)
        self.bsck = jnp.pad(bsc, (0, pc)).reshape(1, self.cout_p)

        # HWIO forms for the pure-JAX reference
        self.w1_hwio = jnp.transpose(w1, (2, 3, 1, 0))
        self.w2_hwio = jnp.transpose(w2, (2, 3, 1, 0))
        self.wsc_hwio = jnp.transpose(wsc, (2, 3, 1, 0))
        self.b1v, self.b2v, self.bscv = b1, b2, bsc

        self._forward = jax.jit(self._forward_nchw)

    # -- forward --------------------------------------------------------------
    def _forward_nchw(self, x_nchw):
        n, c, h, w = x_nchw.shape
        assert c == self.in_ch
        # TODO(synk): the NCHW<->NHWC transposes exist only because the public
        # API follows the PyTorch layout; call forward_nhwc() from an NHWC
        # pipeline to drop both extra HBM passes.
        x = jnp.transpose(x_nchw, (0, 2, 3, 1))
        out = self.forward_nhwc(x)
        return jnp.transpose(out, (0, 3, 1, 2))

    def forward_nhwc(self, x_nhwc):
        n, h, w, c = x_nhwc.shape
        if self.downsample:
            assert h % 2 == 0 and w % 2 == 0
        x_pad = jnp.pad(x_nhwc, ((0, 0), (1, 1), (1, 1), (0, 0)))
        pool_mat = _avg_pool_matrix(h, w) if self.downsample else None
        out = _fused_block(
            x_pad, self.w1k, self.b1k, self.w2k, self.b2k, self.wsck,
            self.bsck, pool_mat, hh=h, ww=w, downsample=self.downsample,
            out_dtype=x_nhwc.dtype)
        ho, wo = (h // 2, w // 2) if self.downsample else (h, w)
        return out.reshape(n, ho, wo, self.cout_p)[..., :self.out_ch]

    def __call__(self, x_nchw):
        return self._forward(x_nchw)

    # -- pure-JAX reference (correctness check only) ---------------------------
    def reference(self, x_nchw):
        dn = ("NHWC", "HWIO", "NHWC")
        x = jnp.transpose(x_nchw, (0, 2, 3, 1))
        h = lax.conv_general_dilated(x, self.w1_hwio, (1, 1), ((1, 1), (1, 1)),
                                     dimension_numbers=dn) + self.b1v
        h = jnp.maximum(h, 0.0)
        h = lax.conv_general_dilated(h, self.w2_hwio, (1, 1), ((1, 1), (1, 1)),
                                     dimension_numbers=dn) + self.b2v
        sx = x
        if self.downsample:
            h = _avg_pool2x2_nhwc(h)
            sx = _avg_pool2x2_nhwc(sx)
        sc = lax.conv_general_dilated(sx, self.wsc_hwio, (1, 1), ((0, 0), (0, 0)),
                                      dimension_numbers=dn) + self.bscv
        return jnp.transpose(h + sc, (0, 3, 1, 2))


if __name__ == "__main__":
    key = jax.random.PRNGKey(0)
    kx, kp = jax.random.split(key)

    N, C_IN, C_OUT, H, W = 2, 4, 8, 16, 16
    x = jax.random.normal(kx, (N, C_IN, H, W), jnp.float32)

    for downsample in (False, True):
        for cdt, tol in ((jnp.float32, 1e-4), (jnp.bfloat16, 5e-2)):
            block = OptimizedBlockPallas(C_IN, C_OUT, downsample=downsample,
                                         compute_dtype=cdt, key=kp)
            out = jax.block_until_ready(block(x))
            ref = block.reference(x)
            exp_hw = (H // 2, W // 2) if downsample else (H, W)
            assert out.shape == (N, C_OUT) + exp_hw, out.shape
            max_err = float(jnp.max(jnp.abs(out - ref)))
            assert jnp.allclose(out, ref, atol=tol, rtol=tol), (
                downsample, str(cdt), max_err)

    print("KERNEL_OK")
</pallas_src>

<mosaic_0001>
module attributes {stable_mosaic.version = 11 : i64} {
  func.func @_optimized_block_kernel(%arg0: i32, %arg1: memref<1x18x18x4xf32, #tpu.memory_space<vmem>>, %arg2: memref<9x4x128xf32, #tpu.memory_space<vmem>>, %arg3: memref<1x128xf32, #tpu.memory_space<vmem>>, %arg4: memref<9x128x128xf32, #tpu.memory_space<vmem>>, %arg5: memref<1x128xf32, #tpu.memory_space<vmem>>, %arg6: memref<4x128xf32, #tpu.memory_space<vmem>>, %arg7: memref<1x128xf32, #tpu.memory_space<vmem>>, %arg8: memref<1x256x128xf32, #tpu.memory_space<vmem>>, %arg9: memref<18x18x128xf32, #tpu.memory_space<vmem>>) attributes {dimension_semantics = [#tpu.dimension_semantics<parallel>], iteration_bounds = array<i64: 2>, scalar_prefetch = 0 : i64, scratch_operands = 1 : i64, tpu.core_type = #tpu.core_type<tc>, window_params = [{transform_indices = @transform_0, window_bounds = array<i64: 1, 18, 18, 4>}, {pipeline_mode = #tpu.pipeline_mode<synchronous>, transform_indices = @transform_1, window_bounds = array<i64: 9, 4, 128>}, {pipeline_mode = #tpu.pipeline_mode<synchronous>, transform_indices = @transform_2, window_bounds = array<i64: 1, 128>}, {pipeline_mode = #tpu.pipeline_mode<synchronous>, transform_indices = @transform_3, window_bounds = array<i64: 9, 128, 128>}, {pipeline_mode = #tpu.pipeline_mode<synchronous>, transform_indices = @transform_4, window_bounds = array<i64: 1, 128>}, {pipeline_mode = #tpu.pipeline_mode<synchronous>, transform_indices = @transform_5, window_bounds = array<i64: 4, 128>}, {pipeline_mode = #tpu.pipeline_mode<synchronous>, transform_indices = @transform_6, window_bounds = array<i64: 1, 128>}, {transform_indices = @transform_7, window_bounds = array<i64: 1, 256, 128>}]} {
    %c0 = arith.constant 0 : index
    %c0_0 = arith.constant 0 : index
    %c0_1 = arith.constant 0 : index
    %c0_2 = arith.constant 0 : index
    %0 = vector.load %arg1[%c0, %c0_0, %c0_1, %c0_2] : memref<1x18x18x4xf32, #tpu.memory_space<vmem>>, vector<1x18x18x4xf32>
    %1 = vector.shape_cast %0 : vector<1x18x18x4xf32> to vector<18x18x4xf32>
    %cst = arith.constant 0.000000e+00 : f32
    %2 = vector.broadcast %cst : f32 to vector<256x128xf32>
    %3 = vector.extract_strided_slice %1 {offsets = [0, 0, 0], sizes = [16, 16, 4], strides = [1, 1, 1]} : vector<18x18x4xf32> to vector<16x16x4xf32>
    %4 = vector.shape_cast %3 : vector<16x16x4xf32> to vector<256x4xf32>
    %c0_3 = arith.constant 0 : index
    %c0_4 = arith.constant 0 : index
    %c0_5 = arith.constant 0 : index
    %5 = vector.load %arg2[%c0_3, %c0_4, %c0_5] : memref<9x4x128xf32, #tpu.memory_space<vmem>>, vector<1x4x128xf32>
    %6 = vector.shape_cast %5 : vector<1x4x128xf32> to vector<4x128xf32>
    %cst_6 = arith.constant dense<0.000000e+00> : vector<256x128xf32>
    %7 = tpu.matmul %4, %6, %cst_6 {dimension_numbers = #tpu.dot_dimension_numbers<[1], [0], [0], [1], [0, 0, 1, 1], [], []>} : vector<256x4xf32>, vector<4x128xf32>, vector<256x128xf32> -> vector<256x128xf32>
    %8 = arith.addf %2, %7 : vector<256x128xf32>
    %9 = vector.extract_strided_slice %1 {offsets = [0, 1, 0], sizes = [16, 16, 4], strides = [1, 1, 1]} : vector<18x18x4xf32> to vector<16x16x4xf32>
    %10 = vector.shape_cast %9 : vector<16x16x4xf32> to vector<256x4xf32>
    %c1 = arith.constant 1 : index
    %c0_7 = arith.constant 0 : index
    %c0_8 = arith.constant 0 : index
    %11 = vector.load %arg2[%c1, %c0_7, %c0_8] : memref<9x4x128xf32, #tpu.memory_space<vmem>>, vector<1x4x128xf32>
    %12 = vector.shape_cast %11 : vector<1x4x128xf32> to vector<4x128xf32>
    %cst_9 = arith.constant dense<0.000000e+00> : vector<256x128xf32>
    %13 = tpu.matmul %10, %12, %cst_9 {dimension_numbers = #tpu.dot_dimension_numbers<[1], [0], [0], [1], [0, 0, 1, 1], [], []>} : vector<256x4xf32>, vector<4x128xf32>, vector<256x128xf32> -> vector<256x128xf32>
    %14 = arith.addf %8, %13 : vector<256x128xf32>
    %15 = vector.extract_strided_slice %1 {offsets = [0, 2, 0], sizes = [16, 16, 4], strides = [1, 1, 1]} : vector<18x18x4xf32> to vector<16x16x4xf32>
    %16 = vector.shape_cast %15 : vector<16x16x4xf32> to vector<256x4xf32>
    %c2 = arith.constant 2 : index
    %c0_10 = arith.constant 0 : index
    %c0_11 = arith.constant 0 : index
    %17 = vector.load %arg2[%c2, %c0_10, %c0_11] : memref<9x4x128xf32, #tpu.memory_space<vmem>>, vector<1x4x128xf32>
    %18 = vector.shape_cast %17 : vector<1x4x128xf32> to vector<4x128xf32>
    %cst_12 = arith.constant dense<0.000000e+00> : vector<256x128xf32>
    %19 = tpu.matmul %16, %18, %cst_12 {dimension_numbers = #tpu.dot_dimension_numbers<[1], [0], [0], [1], [0, 0, 1, 1], [], []>} : vector<256x4xf32>, vector<4x128xf32>, vector<256x128xf32> -> vector<256x128xf32>
    %20 = arith.addf %14, %19 : vector<256x128xf32>
    %21 = vector.extract_strided_slice %1 {offsets = [1, 0, 0], sizes = [16, 16, 4], strides = [1, 1, 1]} : vector<18x18x4xf32> to vector<16x16x4xf32>
    %22 = vector.shape_cast %21 : vector<16x16x4xf32> to vector<256x4xf32>
    %c3 = arith.constant 3 : index
    %c0_13 = arith.constant 0 : index
    %c0_14 = arith.constant 0 : index
    %23 = vector.load %arg2[%c3, %c0_13, %c0_14] : memref<9x4x128xf32, #tpu.memory_space<vmem>>, vector<1x4x128xf32>
    %24 = vector.shape_cast %23 : vector<1x4x128xf32> to vector<4x128xf32>
    %cst_15 = arith.constant dense<0.000000e+00> : vector<256x128xf32>
    %25 = tpu.matmul %22, %24, %cst_15 {dimension_numbers = #tpu.dot_dimension_numbers<[1], [0], [0], [1], [0, 0, 1, 1], [], []>} : vector<256x4xf32>, vector<4x128xf32>, vector<256x128xf32> -> vector<256x128xf32>
    %26 = arith.addf %20, %25 : vector<256x128xf32>
    %27 = vector.extract_strided_slice %1 {offsets = [1, 1, 0], sizes = [16, 16, 4], strides = [1, 1, 1]} : vector<18x18x4xf32> to vector<16x16x4xf32>
    %28 = vector.shape_cast %27 : vector<16x16x4xf32> to vector<256x4xf32>
    %c4 = arith.constant 4 : index
    %c0_16 = arith.constant 0 : index
    %c0_17 = arith.constant 0 : index
    %29 = vector.load %arg2[%c4, %c0_16, %c0_17] : memref<9x4x128xf32, #tpu.memory_space<vmem>>, vector<1x4x128xf32>
    %30 = vector.shape_cast %29 : vector<1x4x128xf32> to vector<4x128xf32>
    %cst_18 = arith.constant dense<0.000000e+00> : vector<256x128xf32>
    %31 = tpu.matmul %28, %30, %cst_18 {dimension_numbers = #tpu.dot_dimension_numbers<[1], [0], [0], [1], [0, 0, 1, 1], [], []>} : vector<256x4xf32>, vector<4x128xf32>, vector<256x128xf32> -> vector<256x128xf32>
    %32 = arith.addf %26, %31 : vector<256x128xf32>
    %33 = vector.extract_strided_slice %1 {offsets = [1, 2, 0], sizes = [16, 16, 4], strides = [1, 1, 1]} : vector<18x18x4xf32> to vector<16x16x4xf32>
    %34 = vector.shape_cast %33 : vector<16x16x4xf32> to vector<256x4xf32>
    %c5 = arith.constant 5 : index
    %c0_19 = arith.constant 0 : index
    %c0_20 = arith.constant 0 : index
    %35 = vector.load %arg2[%c5, %c0_19, %c0_20] : memref<9x4x128xf32, #tpu.memory_space<vmem>>, vector<1x4x128xf32>
    %36 = vector.shape_cast %35 : vector<1x4x128xf32> to vector<4x128xf32>
    %cst_21 = arith.constant dense<0.000000e+00> : vector<256x128xf32>
    %37 = tpu.matmul %34, %36, %cst_21 {dimension_numbers = #tpu.dot_dimension_numbers<[1], [0], [0], [1], [0, 0, 1, 1], [], []>} : vector<256x4xf32>, vector<4x128xf32>, vector<256x128xf32> -> vector<256x128xf32>
    %38 = arith.addf %32, %37 : vector<256x128xf32>
    %39 = vector.extract_strided_slice %1 {offsets = [2, 0, 0], sizes = [16, 16, 4], strides = [1, 1, 1]} : vector<18x18x4xf32> to vector<16x16x4xf32>
    %40 = vector.shape_cast %39 : vector<16x16x4xf32> to vector<256x4xf32>
    %c6 = arith.constant 6 : index
    %c0_22 = arith.constant 0 : index
    %c0_23 = arith.constant 0 : index
    %41 = vector.load %arg2[%c6, %c0_22, %c0_23] : memref<9x4x128xf32, #tpu.memory_space<vmem>>, vector<1x4x128xf32>
    %42 = vector.shape_cast %41 : vector<1x4x128xf32> to vector<4x128xf32>
    %cst_24 = arith.constant dense<0.000000e+00> : vector<256x128xf32>
    %43 = tpu.matmul %40, %42, %cst_24 {dimension_numbers = #tpu.dot_dimension_numbers<[1], [0], [0], [1], [0, 0, 1, 1], [], []>} : vector<256x4xf32>, vector<4x128xf32>, vector<256x128xf32> -> vector<256x128xf32>
    %44 = arith.addf %38, %43 : vector<256x128xf32>
    %45 = vector.extract_strided_slice %1 {offsets = [2, 1, 0], sizes = [16, 16, 4], strides = [1, 1, 1]} : vector<18x18x4xf32> to vector<16x16x4xf32>
    %46 = vector.shape_cast %45 : vector<16x16x4xf32> to vector<256x4xf32>
    %c7 = arith.constant 7 : index
    %c0_25 = arith.constant 0 : index
    %c0_26 = arith.constant 0 : index
    %47 = vector.load %arg2[%c7, %c0_25, %c0_26] : memref<9x4x128xf32, #tpu.memory_space<vmem>>, vector<1x4x128xf32>
    %48 = vector.shape_cast %47 : vector<1x4x128xf32> to vector<4x128xf32>
    %cst_27 = arith.constant dense<0.000000e+00> : vector<256x128xf32>
    %49 = tpu.matmul %46, %48, %cst_27 {dimension_numbers = #tpu.dot_dimension_numbers<[1], [0], [0], [1], [0, 0, 1, 1], [], []>} : vector<256x4xf32>, vector<4x128xf32>, vector<256x128xf32> -> vector<256x128xf32>
    %50 = arith.addf %44, %49 : vector<256x128xf32>
    %51 = vector.extract_strided_slice %1 {offsets = [2, 2, 0], sizes = [16, 16, 4], strides = [1, 1, 1]} : vector<18x18x4xf32> to vector<16x16x4xf32>
    %52 = vector.shape_cast %51 : vector<16x16x4xf32> to vector<256x4xf32>
    %c8 = arith.constant 8 : index
    %c0_28 = arith.constant 0 : index
    %c0_29 = arith.constant 0 : index
    %53 = vector.load %arg2[%c8, %c0_28, %c0_29] : memref<9x4x128xf32, #tpu.memory_space<vmem>>, vector<1x4x128xf32>
    %54 = vector.shape_cast %53 : vector<1x4x128xf32> to vector<4x128xf32>
    %cst_30 = arith.constant dense<0.000000e+00> : vector<256x128xf32>
    %55 = tpu.matmul %52, %54, %cst_30 {dimension_numbers = #tpu.dot_dimension_numbers<[1], [0], [0], [1], [0, 0, 1, 1], [], []>} : vector<256x4xf32>, vector<4x128xf32>, vector<256x128xf32> -> vector<256x128xf32>
    %56 = arith.addf %50, %55 : vector<256x128xf32>
    %c0_31 = arith.constant 0 : index
    %c0_32 = arith.constant 0 : index
    %57 = vector.load %arg3[%c0_31, %c0_32] : memref<1x128xf32, #tpu.memory_space<vmem>>, vector<1x128xf32>
    %58 = vector.broadcast %57 : vector<1x128xf32> to vector<256x128xf32>
    %59 = arith.addf %56, %58 : vector<256x128xf32>
    %cst_33 = arith.constant 0.000000e+00 : f32
    %60 = vector.broadcast %cst_33 : f32 to vector<256x128xf32>
    %61 = arith.maximumf %59, %60 : vector<256x128xf32>
    %cst_34 = arith.constant 0.000000e+00 : f32
    %62 = vector.broadcast %cst_34 : f32 to vector<18x18x128xf32>
    %c0_35 = arith.constant 0 : index
    %c0_36 = arith.constant 0 : index
    %c0_37 = arith.constant 0 : index
    %63 = vector.load %arg9[%c0_35, %c0_36, %c0_37] : memref<18x18x128xf32, #tpu.memory_space<vmem>>, vector<18x18x128xf32>
    tpu.vector_store %arg9[%c0_35, %c0_36, %c0_37], %62 {strides = array<i32>} : memref<18x18x128xf32, #tpu.memory_space<vmem>>, vector<18x18x128xf32>,
    %64 = vector.shape_cast %61 : vector<256x128xf32> to vector<16x16x128xf32>
    %c1_38 = arith.constant 1 : index
    %c1_39 = arith.constant 1 : index
    %c0_40 = arith.constant 0 : index
    %65 = vector.load %arg9[%c1_38, %c1_39, %c0_40] : memref<18x18x128xf32, #tpu.memory_space<vmem>>, vector<16x16x128xf32>
    tpu.vector_store %arg9[%c1_38, %c1_39, %c0_40], %64 {strides = array<i32>} : memref<18x18x128xf32, #tpu.memory_space<vmem>>, vector<16x16x128xf32>,
    %cst_41 = arith.constant 0.000000e+00 : f32
    %66 = vector.broadcast %cst_41 : f32 to vector<256x128xf32>
    %c0_42 = arith.constant 0 : index
    %c0_43 = arith.constant 0 : index
    %c0_44 = arith.constant 0 : index
    %67 = vector.load %arg9[%c0_42, %c0_43, %c0_44] : memref<18x18x128xf32, #tpu.memory_space<vmem>>, vector<16x16x128xf32>
    %68 = vector.shape_cast %67 : vector<16x16x128xf32> to vector<256x128xf32>
    %c0_45 = arith.constant 0 : index
    %c0_46 = arith.constant 0 : index
    %c0_47 = arith.constant 0 : index
    %69 = vector.load %arg4[%c0_45, %c0_46, %c0_47] : memref<9x128x128xf32, #tpu.memory_space<vmem>>, vector<1x128x128xf32>
    %70 = vector.shape_cast %69 : vector<1x128x128xf32> to vector<128x128xf32>
    %cst_48 = arith.constant dense<0.000000e+00> : vector<256x128xf32>
    %71 = tpu.matmul %68, %70, %cst_48 {dimension_numbers = #tpu.dot_dimension_numbers<[1], [0], [0], [1], [0, 0, 1, 1], [], []>} : vector<256x128xf32>, vector<128x128xf32>, vector<256x128xf32> -> vector<256x128xf32>
    %72 = arith.addf %66, %71 : vector<256x128xf32>
    %c0_49 = arith.constant 0 : index
    %c1_50 = arith.constant 1 : index
    %c0_51 = arith.constant 0 : index
    %73 = vector.load %arg9[%c0_49, %c1_50, %c0_51] : memref<18x18x128xf32, #tpu.memory_space<vmem>>, vector<16x16x128xf32>
    %74 = vector.shape_cast %73 : vector<16x16x128xf32> to vector<256x128xf32>
    %c1_52 = arith.constant 1 : index
    %c0_53 = arith.constant 0 : index
    %c0_54 = arith.constant 0 : index
    %75 = vector.load %arg4[%c1_52, %c0_53, %c0_54] : memref<9x128x128xf32, #tpu.memory_space<vmem>>, vector<1x128x128xf32>
    %76 = vector.shape_cast %75 : vector<1x128x128xf32> to vector<128x128xf32>
    %cst_55 = arith.constant dense<0.000000e+00> : vector<256x128xf32>
    %77 = tpu.matmul %74, %76, %cst_55 {dimension_numbers = #tpu.dot_dimension_numbers<[1], [0], [0], [1], [0, 0, 1, 1], [], []>} : vector<256x128xf32>, vector<128x128xf32>, vector<256x128xf32> -> vector<256x128xf32>
    %78 = arith.addf %72, %77 : vector<256x128xf32>
    %c0_56 = arith.constant 0 : index
    %c2_57 = arith.constant 2 : index
    %c0_58 = arith.constant 0 : index
    %79 = vector.load %arg9[%c0_56, %c2_57, %c0_58] : memref<18x18x128xf32, #tpu.memory_space<vmem>>, vector<16x16x128xf32>
    %80 = vector.shape_cast %79 : vector<16x16x128xf32> to vector<256x128xf32>
    %c2_59 = arith.constant 2 : index
    %c0_60 = arith.constant 0 : index
    %c0_61 = arith.constant 0 : index
    %81 = vector.load %arg4[%c2_59, %c0_60, %c0_61] : memref<9x128x128xf32, #tpu.memory_space<vmem>>, vector<1x128x128xf32>
    %82 = vector.shape_cast %81 : vector<1x128x128xf32> to vector<128x128xf32>
    %cst_62 = arith.constant dense<0.000000e+00> : vector<256x128xf32>
    %83 = tpu.matmul %80, %82, %cst_62 {dimension_numbers = #tpu.dot_dimension_numbers<[1], [0], [0], [1], [0, 0, 1, 1], [], []>} : vector<256x128xf32>, vector<128x128xf32>, vector<256x128xf32> -> vector<256x128xf32>
    %84 = arith.addf %78, %83 : vector<256x128xf32>
    %c1_63 = arith.constant 1 : index
    %c0_64 = arith.constant 0 : index
    %c0_65 = arith.constant 0 : index
    %85 = vector.load %arg9[%c1_63, %c0_64, %c0_65] : memref<18x18x128xf32, #tpu.memory_space<vmem>>, vector<16x16x128xf32>
    %86 = vector.shape_cast %85 : vector<16x16x128xf32> to vector<256x128xf32>
    %c3_66 = arith.constant 3 : index
    %c0_67 = arith.constant 0 : index
    %c0_68 = arith.constant 0 : index
    %87 = vector.load %arg4[%c3_66, %c0_67, %c0_68] : memref<9x128x128xf32, #tpu.memory_space<vmem>>, vector<1x128x128xf32>
    %88 = vector.shape_cast %87 : vector<1x128x128xf32> to vector<128x128xf32>
    %cst_69 = arith.constant dense<0.000000e+00> : vector<256x128xf32>
    %89 = tpu.matmul %86, %88, %cst_69 {dimension_numbers = #tpu.dot_dimension_numbers<[1], [0], [0], [1], [0, 0, 1, 1], [], []>} : vector<256x128xf32>, vector<128x128xf32>, vector<256x128xf32> -> vector<256x128xf32>
    %90 = arith.addf %84, %89 : vector<256x128xf32>
    %c1_70 = arith.constant 1 : index
    %c1_71 = arith.constant 1 : index
    %c0_72 = arith.constant 0 : index
    %91 = vector.load %arg9[%c1_70, %c1_71, %c0_72] : memref<18x18x128xf32, #tpu.memory_space<vmem>>, vector<16x16x128xf32>
    %92 = vector.shape_cast %91 : vector<16x16x128xf32> to vector<256x128xf32>
    %c4_73 = arith.constant 4 : index
    %c0_74 = arith.constant 0 : index
    %c0_75 = arith.constant 0 : index
    %93 = vector.load %arg4[%c4_73, %c0_74, %c0_75] : memref<9x128x128xf32, #tpu.memory_space<vmem>>, vector<1x128x128xf32>
    %94 = vector.shape_cast %93 : vector<1x128x128xf32> to vector<128x128xf32>
    %cst_76 = arith.constant dense<0.000000e+00> : vector<256x128xf32>
    %95 = tpu.matmul %92, %94, %cst_76 {dimension_numbers = #tpu.dot_dimension_numbers<[1], [0], [0], [1], [0, 0, 1, 1], [], []>} : vector<256x128xf32>, vector<128x128xf32>, vector<256x128xf32> -> vector<256x128xf32>
    %96 = arith.addf %90, %95 : vector<256x128xf32>
    %c1_77 = arith.constant 1 : index
    %c2_78 = arith.constant 2 : index
    %c0_79 = arith.constant 0 : index
    %97 = vector.load %arg9[%c1_77, %c2_78, %c0_79] : memref<18x18x128xf32, #tpu.memory_space<vmem>>, vector<16x16x128xf32>
    %98 = vector.shape_cast %97 : vector<16x16x128xf32> to vector<256x128xf32>
    %c5_80 = arith.constant 5 : index
    %c0_81 = arith.constant 0 : index
    %c0_82 = arith.constant 0 : index
    %99 = vector.load %arg4[%c5_80, %c0_81, %c0_82] : memref<9x128x128xf32, #tpu.memory_space<vmem>>, vector<1x128x128xf32>
    %100 = vector.shape_cast %99 : vector<1x128x128xf32> to vector<128x128xf32>
    %cst_83 = arith.constant dense<0.000000e+00> : vector<256x128xf32>
    %101 = tpu.matmul %98, %100, %cst_83 {dimension_numbers = #tpu.dot_dimension_numbers<[1], [0], [0], [1], [0, 0, 1, 1], [], []>} : vector<256x128xf32>, vector<128x128xf32>, vector<256x128xf32> -> vector<256x128xf32>
    %102 = arith.addf %96, %101 : vector<256x128xf32>
    %c2_84 = arith.constant 2 : index
    %c0_85 = arith.constant 0 : index
    %c0_86 = arith.constant 0 : index
    %103 = vector.load %arg9[%c2_84, %c0_85, %c0_86] : memref<18x18x128xf32, #tpu.memory_space<vmem>>, vector<16x16x128xf32>
    %104 = vector.shape_cast %103 : vector<16x16x128xf32> to vector<256x128xf32>
    %c6_87 = arith.constant 6 : index
    %c0_88 = arith.constant 0 : index
    %c0_89 = arith.constant 0 : index
    %105 = vector.load %arg4[%c6_87, %c0_88, %c0_89] : memref<9x128x128xf32, #tpu.memory_space<vmem>>, vector<1x128x128xf32>
    %106 = vector.shape_cast %105 : vector<1x128x128xf32> to vector<128x128xf32>
    %cst_90 = arith.constant dense<0.000000e+00> : vector<256x128xf32>
    %107 = tpu.matmul %104, %106, %cst_90 {dimension_numbers = #tpu.dot_dimension_numbers<[1], [0], [0], [1], [0, 0, 1, 1], [], []>} : vector<256x128xf32>, vector<128x128xf32>, vector<256x128xf32> -> vector<256x128xf32>
    %108 = arith.addf %102, %107 : vector<256x128xf32>
    %c2_91 = arith.constant 2 : index
    %c1_92 = arith.constant 1 : index
    %c0_93 = arith.constant 0 : index
    %109 = vector.load %arg9[%c2_91, %c1_92, %c0_93] : memref<18x18x128xf32, #tpu.memory_space<vmem>>, vector<16x16x128xf32>
    %110 = vector.shape_cast %109 : vector<16x16x128xf32> to vector<256x128xf32>
    %c7_94 = arith.constant 7 : index
    %c0_95 = arith.constant 0 : index
    %c0_96 = arith.constant 0 : index
    %111 = vector.load %arg4[%c7_94, %c0_95, %c0_96] : memref<9x128x128xf32, #tpu.memory_space<vmem>>, vector<1x128x128xf32>
    %112 = vector.shape_cast %111 : vector<1x128x128xf32> to vector<128x128xf32>
    %cst_97 = arith.constant dense<0.000000e+00> : vector<256x128xf32>
    %113 = tpu.matmul %110, %112, %cst_97 {dimension_numbers = #tpu.dot_dimension_numbers<[1], [0], [0], [1], [0, 0, 1, 1], [], []>} : vector<256x128xf32>, vector<128x128xf32>, vector<256x128xf32> -> vector<256x128xf32>
    %114 = arith.addf %108, %113 : vector<256x128xf32>
    %c2_98 = arith.constant 2 : index
    %c2_99 = arith.constant 2 : index
    %c0_100 = arith.constant 0 : index
    %115 = vector.load %arg9[%c2_98, %c2_99, %c0_100] : memref<18x18x128xf32, #tpu.memory_space<vmem>>, vector<16x16x128xf32>
    %116 = vector.shape_cast %115 : vector<16x16x128xf32> to vector<256x128xf32>
    %c8_101 = arith.constant 8 : index
    %c0_102 = arith.constant 0 : index
    %c0_103 = arith.constant 0 : index
    %117 = vector.load %arg4[%c8_101, %c0_102, %c0_103] : memref<9x128x128xf32, #tpu.memory_space<vmem>>, vector<1x128x128xf32>
    %118 = vector.shape_cast %117 : vector<1x128x128xf32> to vector<128x128xf32>
    %cst_104 = arith.constant dense<0.000000e+00> : vector<256x128xf32>
    %119 = tpu.matmul %116, %118, %cst_104 {dimension_numbers = #tpu.dot_dimension_numbers<[1], [0], [0], [1], [0, 0, 1, 1], [], []>} : vector<256x128xf32>, vector<128x128xf32>, vector<256x128xf32> -> vector<256x128xf32>
    %120 = arith.addf %114, %119 : vector<256x128xf32>
    %c0_105 = arith.constant 0 : index
    %c0_106 = arith.constant 0 : index
    %121 = vector.load %arg5[%c0_105, %c0_106] : memref<1x128xf32, #tpu.memory_space<vmem>>, vector<1x128xf32>
    %122 = vector.broadcast %121 : vector<1x128xf32> to vector<256x128xf32>
    %123 = arith.addf %120, %122 : vector<256x128xf32>
    %124 = vector.extract_strided_slice %1 {offsets = [1, 1, 0], sizes = [16, 16, 4], strides = [1, 1, 1]} : vector<18x18x4xf32> to vector<16x16x4xf32>
    %125 = vector.shape_cast %124 : vector<16x16x4xf32> to vector<256x4xf32>
    %c0_107 = arith.constant 0 : index
    %c0_108 = arith.constant 0 : index
    %126 = vector.load %arg6[%c0_107, %c0_108] : memref<4x128xf32, #tpu.memory_space<vmem>>, vector<4x128xf32>
    %cst_109 = arith.constant dense<0.000000e+00> : vector<256x128xf32>
    %127 = tpu.matmul %125, %126, %cst_109 {dimension_numbers = #tpu.dot_dimension_numbers<[1], [0], [0], [1], [0, 0, 1, 1], [], []>} : vector<256x4xf32>, vector<4x128xf32>, vector<256x128xf32> -> vector<256x128xf32>
    %c0_110 = arith.constant 0 : index
    %c0_111 = arith.constant 0 : index
    %128 = vector.load %arg7[%c0_110, %c0_111] : memref<1x128xf32, #tpu.memory_space<vmem>>, vector<1x128xf32>
    %129 = vector.broadcast %128 : vector<1x128xf32> to vector<256x128xf32>
    %130 = arith.addf %127, %129 : vector<256x128xf32>
    %131 = arith.addf %123, %130 : vector<256x128xf32>
    %c0_112 = arith.constant 0 : index
    %c0_113 = arith.constant 0 : index
    %c0_114 = arith.constant 0 : index
    %132 = vector.load %arg8[%c0_112, %c0_113, %c0_114] : memref<1x256x128xf32, #tpu.memory_space<vmem>>, vector<1x256x128xf32>
    %133 = vector.shape_cast %132 : vector<1x256x128xf32> to vector<256x128xf32>
    %134 = vector.shape_cast %131 : vector<256x128xf32> to vector<1x256x128xf32>
    tpu.vector_store %arg8[%c0_112, %c0_113, %c0_114], %134 {strides = array<i32>} : memref<1x256x128xf32, #tpu.memory_space<vmem>>, vector<1x256x128xf32>,
    return
  }
  func.func @transform_0(%arg0: i32) -> (i32, i32, i32, i32) {
    %c0_i32 = arith.constant 0 : i32
    %c0_i32_0 = arith.constant 0 : i32
    %c0_i32_1 = arith.constant 0 : i32
    %c0_i32_2 = arith.constant 0 : i32
    return %arg0, %c0_i32, %c0_i32_0, %c0_i32_1 : i32, i32, i32, i32
  }
  func.func @transform_1(%arg0: i32) -> (i32, i32, i32) {
    %c0_i32 = arith.constant 0 : i32
    %c0_i32_0 = arith.constant 0 : i32
    %c0_i32_1 = arith.constant 0 : i32
    %c0_i32_2 = arith.constant 0 : i32
    return %c0_i32, %c0_i32_0, %c0_i32_1 : i32, i32, i32
  }
  func.func @transform_2(%arg0: i32) -> (i32, i32) {
    %c0_i32 = arith.constant 0 : i32
    %c0_i32_0 = arith.constant 0 : i32
    %c0_i32_1 = arith.constant 0 : i32
    return %c0_i32, %c0_i32_0 : i32, i32
  }
  func.func @transform_3(%arg0: i32) -> (i32, i32, i32) {
    %c0_i32 = arith.constant 0 : i32
    %c0_i32_0 = arith.constant 0 : i32
    %c0_i32_1 = arith.constant 0 : i32
    %c0_i32_2 = arith.constant 0 : i32
    return %c0_i32, %c0_i32_0, %c0_i32_1 : i32, i32, i32
  }
  func.func @transform_4(%arg0: i32) -> (i32, i32) {
    %c0_i32 = arith.constant 0 : i32
    %c0_i32_0 = arith.constant 0 : i32
    %c0_i32_1 = arith.constant 0 : i32
    return %c0_i32, %c0_i32_0 : i32, i32
  }
  func.func @transform_5(%arg0: i32) -> (i32, i32) {
    %c0_i32 = arith.constant 0 : i32
    %c0_i32_0 = arith.constant 0 : i32
    %c0_i32_1 = arith.constant 0 : i32
    return %c0_i32, %c0_i32_0 : i32, i32
  }
  func.func @transform_6(%arg0: i32) -> (i32, i32) {
    %c0_i32 = arith.constant 0 : i32
    %c0_i32_0 = arith.constant 0 : i32
    %c0_i32_1 = arith.constant 0 : i32
    return %c0_i32, %c0_i32_0 : i32, i32
  }
  func.func @transform_7(%arg0: i32) -> (i32, i32, i32) {
    %c0_i32 = arith.constant 0 : i32
    %c0_i32_0 = arith.constant 0 : i32
    %c0_i32_1 = arith.constant 0 : i32
    return %arg0, %c0_i32, %c0_i32_0 : i32, i32, i32
  }
}

</mosaic_0001>

<bundles_post_ra>
// kernel: _forward_nchw.1
= control target key start
LH: loop header
LB: loop body
LE: loop exit
PB: predicated region body
PF: predicated region fallthrough
CT: control target
= control target key end

     0   :  { %s8846_s24 = smov 0   ;;  %s12114_s0 = inlined_call_operand.vmem [shape: f32[2,18,18,4], index: 0, kind: input, shape index: {}]   ;;  %s12115_s1 = inlined_call_operand.vmem [shape: f32[9,4,128], index: 1, kind: input, shape index: {}]   ;;  %s12116_s2 = inlined_call_operand.vmem [shape: f32[1,128], index: 2, kind: input, shape index: {}]   ;;  %s12117_s3 = inlined_call_operand.vmem [shape: f32[9,128,128], index: 3, kind: input, shape index: {}]   ;;  %s12118_s4 = inlined_call_operand.vmem [shape: f32[1,128], index: 4, kind: input, shape index: {}]   ;;  %s12119_s5 = inlined_call_operand.vmem [shape: f32[4,128], index: 5, kind: input, shape index: {}]   ;;  %s12120_s6 = inlined_call_operand.vmem [shape: f32[1,128], index: 6, kind: input, shape index: {}]   ;;  %s12121_s7 = inlined_call_operand.vmem [shape: f32[2,256,128], index: 7, kind: output, shape index: {}]  }
   0x1 LB: > { %s6322_s25 = sadd.s32 4294967295, %s8803_s24   ;;  %p6326_p0 = scmp.ge.s32.totalorder %s8803_s24, 1  ;;  %s8803_s24 = sphi %s8846_s24, %s17_s24  }
   0x2   : > { %p237_p1 = scmp.lt.s32.totalorder %s8803_s24, 3 }
   0x4   : > { %p238_p2 = pnand %p6326_p0, %p237_p1 }
   0x6   : > { %241 = sbr.rel (%p238_p2) target bundleno = 988 (0x3dc), region = 48 }
   0xb   : > { %v6330_v0 = vld [vmem:[%s12115_s1 + $0x4] sm:$0xf]  ;;  %vm530_vm0 = vcmask 1043456   ;;  %p269_p3 = scmp.lt.s32.totalorder %s6322_s25, 1  ;;  %v333_v1 = vld [vmem:[%s12115_s1] sm:$0xf] }
   0xc   : > { %8784 = vmatprep.subr.msk.mxu1 %vm530_vm0, %v6330_v0  ;;  %7564 = vmatprep.subr.msk.mxu0 %vm530_vm0, %v6330_v0  ;;  %v6397_v2 = vld [vmem:[%s12115_s1 + $0x8] sm:$0xf]  ;;  %vm382_vm1 = vcmask 1046528   ;;  %vm465_vm2 = vcmask 31744   ;;  %v8918_v21 = vld [vmem:[%s12115_s1 + $0xc] sm:$0xf] }
   0xd   : > { %8785 = vmatpush3.msk.msra.mxu1 %vm530_vm0, %v6330_v0  ;;  %7565 = vmatpush3.msk.msra.mxu0 %vm530_vm0, %v6330_v0  ;;  %s12626_s25 = smov (!%p269_p3, %s6322_s25), 1  ;;  %v8936_v28 = vld [vmem:[%s12115_s1 + $0x10] sm:$0xf]  ;;  %vm1051_vm3 = vcmask 1045504  }
   0xe   : > { %7614 = vmatprep.subr.msk.mxu1 %vm530_vm0, %v333_v1  ;;  %7664 = vmatprep.subr.msk.mxu0 %vm530_vm0, %v6397_v2  ;;  %s8786_s9 = smul.u32 432, %s12626_s25  ;;  %s6801_s30 = sshll.u32 %s12626_s25, 8 }
  0x10   : > { %s8875_s12 = scalar_lea.vmem %s12114_s0, %s8786_s9  ;;  %s11936_s9 = scalar_lea.vmem %s12121_s7, %s6801_s30 }
  0x11   : > { %v8878_v3 = vld [vmem:[%s8875_s12] sm:$0xff]  ;;  %v8881_v4 = vld [vmem:[%s8875_s12 + $0x8] sm:$0xff]  ;;  %v8893_v10 = vld [vmem:[%s8875_s12 + $0x10] sm:$0x3] }
  0x12   : > { %v8884_v5 = vld [vmem:[%s8875_s12 + $0xc0] sm:$0xff]  ;;  %v383_v6 = vrot.slane %v8878_v3, 1  ;;  %v384_v7 = vrot.slane %v8881_v4, 1  ;;  %v8889_v8 = vld [vmem:[%s8875_s12 + $0xc8] sm:$0xff]  ;;  %v386_v12 = vrot.slane %v8893_v10, 1  ;;  %v8901_v14 = vld [vmem:[%s8875_s12 + $0x18] sm:$0xff] }
  0x13   : > { %v423_v9 = vrot.slane %v8884_v5, 1  ;;  %v424_v11 = vrot.slane %v8889_v8, 1  ;;  %v8898_v13 = vld [vmem:[%s8875_s12 + $0xd0] sm:$0x3]  ;;  %v8906_v17 = vld [vmem:[%s8875_s12 + $0x20] sm:$0xff]  ;;  %v388_v18 = vrot.slane %v8901_v14, 1 }
  0x14   : > { %v385_v15 = vsel %vm382_vm1, %v383_v6, %v384_v7  ;;  %v426_v16 = vrot.slane %v8898_v13, 1  ;;  %v8910_v19 = vld [vmem:[%s8875_s12 + $0xd8] sm:$0xff]  ;;  %v8913_v20 = vld [vmem:[%s8875_s12 + $0xe0] sm:$0xff]  ;;  %v387_v23 = vsel %vm382_vm1, %v384_v7, %v386_v12  ;;  %v389_v24 = vrot.slane %v8906_v17, 1  ;;  %v8928_v26 = vld [vmem:[%s8875_s12 + $0x28] sm:$0x3] }
  0x15   : > { %7566 = vmatprep.mubr.msk.f32.mxu0 %vm465_vm2, %v385_v15  ;;  %v8922_v22 = vsel %vm382_vm1, %v423_v9, %v424_v11  ;;  %v428_v25 = vrot.slane %v8910_v19, 1  ;;  %v8931_v27 = vld [vmem:[%s8875_s12 + $0xe8] sm:$0x3]  ;;  %v429_v30 = vrot.slane %v8913_v20, 1  ;;  %v391_v31 = vrot.slane %v8928_v26, 1  ;;  %v8948_v33 = vld [vmem:[%s8875_s12 + $0x30] sm:$0xff] }
  0x16   : > { %12221 = vst [vmem:[#allocation3_spill] sm:$0xff] %v8922_v22  ;;  %7590 = vmatprep.mubr.msk.f32.mxu1 %vm465_vm2, %v8922_v22  ;;  %7567 = vmatmul.mubr.msk.f32.vlgmr.msra.gmra.mxu0 %vm465_vm2, %v387_v23  ;;  %v8942_v29 = vsel %vm382_vm1, %v424_v11, %v426_v16  ;;  %v431_v32 = vrot.slane %v8931_v27, 1  ;;  %v8951_v34 = vld [vmem:[%s8875_s12 + $0x38] sm:$0xff]  ;;  %v8954_v35 = vld [vmem:[%s8875_s12 + $0xf0] sm:$0xff]  ;;  %v8960_v36 = vsel %vm382_vm1, %v388_v18, %v389_v24  ;;  %v393_v37 = vrot.slane %v8948_v33, 1  ;;  %v8988_v47 = vld [vmem:[%s8875_s12 + $0x48] sm:$0xff] }
  0x17   : > { %12222 = vst [vmem:[#allocation4_spill] sm:$0xff] %v8942_v29  ;;  %7591 = vmatmul.mubr.msk.f32.vlgmr.msra.gmra.mxu1 %vm465_vm2, %v8942_v29  ;;  %7665 = vmatpush3.msk.msra.mxu0 %vm530_vm0, %v6397_v2  ;;  %12223 = vst [vmem:[#allocation5_spill] sm:$0xff] %v8960_v36  ;;  %v394_v38 = vrot.slane %v8951_v34, 1  ;;  %v8965_v39 = vld [vmem:[%s8875_s12 + $0xf8] sm:$0xff]  ;;  %v433_v40 = vrot.slane %v8954_v35, 1  ;;  %v8975_v42 = vsel %vm382_vm1, %v428_v25, %v429_v30  ;;  %v8991_v48 = vld [vmem:[%s8875_s12 + $0x50] sm:$0xff] }
  0x18   : > { %v8969_v41 = vld [vmem:[%s8875_s12 + $0x40] sm:$0x3]  ;;  %7615 = vmatpush3.msk.msra.mxu1 %vm530_vm0, %v333_v1  ;;  %7569 = vmatprep.mubr.msk.f32.mxu0 %vm465_vm2, %v8960_v36  ;;  %12224 = vst [vmem:[#allocation6_spill] sm:$0xff] %v8975_v42  ;;  %v8978_v43 = vsel %vm382_vm1, %v389_v24, %v391_v31  ;;  %v8981_v44 = vsel %vm382_vm1, %v429_v30, %v431_v32  ;;  %v434_v45 = vrot.slane %v8965_v39, 1  ;;  %v398_v52 = vrot.slane %v8988_v47, 1  ;;  %v9002_v53 = vld [vmem:[%s8875_s12 + $0x108] sm:$0xff] }
  0x19   : > { %12225 = vst [vmem:[#allocation7_spill] sm:$0xff] %v8978_v43  ;;  %12226 = vst [vmem:[#allocation8_spill] sm:$0xff] %v8981_v44  ;;  %v8985_v46 = vld [vmem:[%s8875_s12 + $0x100] sm:$0x3]  ;;  %7593 = vmatprep.mubr.msk.f32.mxu1 %vm465_vm2, %v8975_v42  ;;  %v8996_v49 = vsel %vm382_vm1, %v393_v37, %v394_v38  ;;  %v396_v50 = vrot.slane %v8969_v41, 1  ;;  %v9005_v54 = vld [vmem:[%s8875_s12 + $0x110] sm:$0xff]  ;;  %7714 = vmatprep.subr.msk.mxu1 %vm530_vm0, %v8918_v21 }
  0x1a   : > { %12227 = vst [vmem:[#allocation9_spill] sm:$0xff] %v8996_v49  ;;  %v436_v51 = vrot.slane %v8985_v46, 1  ;;  %v9008_v55 = vld [vmem:[%s8875_s12 + $0x60] sm:$0xff]  ;;  %7570 = vmatmul.mubr.msk.f32.gmra.mxu0 %vm465_vm2, %v8978_v43  ;;  %v9015_v56 = vsel %vm382_vm1, %v433_v40, %v434_v45  ;;  %v399_v57 = vrot.slane %v8991_v48, 1  ;;  %v438_v58 = vrot.slane %v9002_v53, 1  ;;  %v9024_v61 = vld [vmem:[%s8875_s12 + $0x68] sm:$0xff]  ;;  %7764 = vmatprep.subr.msk.mxu0 %vm530_vm0, %v8936_v28 }
  0x1b   : > { %12228 = vst [vmem:[#allocation10_spill] sm:$0xff] %v9015_v56  ;;  %v439_v59 = vrot.slane %v9005_v54, 1  ;;  %v9021_v60 = vld [vmem:[%s8875_s12 + $0x58] sm:$0x3]  ;;  %7594 = vmatmul.mubr.msk.f32.gmra.mxu1 %vm465_vm2, %v8981_v44  ;;  %7572 = vmatprep.mubr.msk.f32.mxu0 %vm465_vm2, %v8996_v49  ;;  %v9033_v62 = vsel %vm382_vm1, %v394_v38, %v396_v50  ;;  %v403_v1 = vrot.slane %v9008_v55, 1  ;;  %v9041_v2 = vld [vmem:[%s8875_s12 + $0x120] sm:$0xff] }
  0x1c   : > { %12229 = vst [vmem:[#allocation11_spill] sm:$0xff] %v9033_v62  ;;  %v401_v63 = vrot.slane %v9021_v60, 1  ;;  %v9037_v0 = vld [vmem:[%s8875_s12 + $0x118] sm:$0x3]  ;;  %v9044_v6 = vld [vmem:[%s8875_s12 + $0x128] sm:$0xff]  ;;  %7596 = vmatprep.mubr.msk.f32.mxu1 %vm465_vm2, %v9015_v56  ;;  %v9049_v7 = vsel %vm382_vm1, %v434_v45, %v436_v51  ;;  %v9052_v9 = vsel %vm382_vm1, %v398_v52, %v399_v57  ;;  %v404_v12 = vrot.slane %v9024_v61, 1 }
  0x1d   : > { %12230 = vst [vmem:[#allocation12_spill] sm:$0xff] %v9049_v7  ;;  %12231 = vst [vmem:[#allocation13_spill] sm:$0xff] %v9052_v9  ;;  %v441_v11 = vrot.slane %v9037_v0, 1  ;;  %v9057_v15 = vld [vmem:[%s8875_s12 + $0x70] sm:$0x3]  ;;  %v9063_v18 = vsel %vm382_vm1, %v438_v58, %v439_v59  ;;  %v443_v23 = vrot.slane %v9041_v2, 1 }
  0x1e   : > { %v9060_v16 = vld [vmem:[%s8875_s12 + $0x130] sm:$0x3]  ;;  %12232 = vst [vmem:[#allocation14_spill] sm:$0xff] %v9063_v18  ;;  %v444_v24 = vrot.slane %v9044_v6, 1  ;;  %v9068_v25 = vld [vmem:[%s8875_s12 + $0x78] sm:$0xff]  ;;  %v9071_v30 = vld [vmem:[%s8875_s12 + $0x80] sm:$0xff]  ;;  %7573 = vmatmul.mubr.msk.f32.gmra.mxu0 %vm465_vm2, %v9033_v62  ;;  %v9086_v37 = vsel %vm382_vm1, %v399_v57, %v401_v63  ;;  %v9096_v50 = vsel %vm382_vm1, %v403_v1, %v404_v12 }
  0x1f   : > { %v9076_v31 = vld [vmem:[%s8875_s12 + $0x138] sm:$0xff]  ;;  %v9079_v32 = vld [vmem:[%s8875_s12 + $0x140] sm:$0xff]  ;;  %7597 = vmatmul.mubr.msk.f32.gmra.mxu1 %vm465_vm2, %v9049_v7  ;;  %7575 = vmatprep.mubr.msk.f32.mxu0 %vm465_vm2, %v9052_v9  ;;  %12233 = vst [vmem:[#allocation15_spill] sm:$0xff] %v9086_v37  ;;  %v406_v38 = vrot.slane %v9057_v15, 1  ;;  %v446_v40 = vrot.slane %v9060_v16, 1  ;;  %v9093_v45 = vsel %vm382_vm1, %v439_v59, %v441_v11  ;;  %12235 = vst [vmem:[#allocation17_spill] sm:$0xff] %v9096_v50 }
  0x20   : > { %7599 = vmatprep.mubr.msk.f32.mxu1 %vm465_vm2, %v9063_v18  ;;  %12234 = vst [vmem:[#allocation16_spill] sm:$0xff] %v9093_v45  ;;  %v408_v51 = vrot.slane %v9068_v25, 1  ;;  %v409_v52 = vrot.slane %v9071_v30, 1  ;;  %v9101_v57 = vld [vmem:[%s8875_s12 + $0x88] sm:$0x3]  ;;  %v9107_v63 = vsel %vm382_vm1, %v443_v23, %v444_v24  ;;  %v448_v7 = vrot.slane %v9076_v31, 1 }
  0x21   : > { %v9104_v58 = vld [vmem:[%s8875_s12 + $0x148] sm:$0x3]  ;;  %12236 = vst [vmem:[#allocation18_spill] sm:$0xff] %v9107_v63  ;;  %v449_v18 = vrot.slane %v9079_v32, 1  ;;  %v9112_v59 = vld [vmem:[%s8875_s12 + $0x90] sm:$0xff]  ;;  %v9115_v1 = vld [vmem:[%s8875_s12 + $0x98] sm:$0xff]  ;;  %v9130_v23 = vsel %vm382_vm1, %v404_v12, %v406_v38  ;;  %v9137_v29 = vsel %vm382_vm1, %v444_v24, %v446_v40 }
  0x22   : > { %7576 = vmatmul.mubr.msk.f32.gmra.mxu0 %vm465_vm2, %v9086_v37  ;;  %v9120_v11 = vld [vmem:[%s8875_s12 + $0x150] sm:$0xff]  ;;  %v9123_v56 = vld [vmem:[%s8875_s12 + $0x158] sm:$0xff]  ;;  %12238 = vst [vmem:[#allocation20_spill] sm:$0xff] %v9130_v23  ;;  %v411_v44 = vrot.slane %v9101_v57, 1  ;;  %v451_v42 = vrot.slane %v9104_v58, 1  ;;  %12239 = vst [vmem:[#allocation21_spill] sm:$0xff] %v9137_v29 }
  0x23   : > { %12237 = vst [vmem:[#allocation19_spill] sm:$0xff] %v9123_v56  ;;  %7600 = vmatmul.mubr.msk.f32.gmra.mxu1 %vm465_vm2, %v9093_v45  ;;  %7578 = vmatprep.mubr.msk.f32.mxu0 %vm465_vm2, %v9096_v50  ;;  %v9140_v45 = vsel %vm382_vm1, %v408_v51, %v409_v52  ;;  %v413_v22 = vrot.slane %v9112_v59, 1  ;;  %v414_v12 = vrot.slane %v9115_v1, 1  ;;  %v9145_v38 = vld [vmem:[%s8875_s12 + $0xa0] sm:$0x3]  ;;  %v9148_v50 = vsel %vm382_vm1, %v448_v7, %v449_v18  ;;  %v9156_v24 = vld [vmem:[%s8875_s12 + $0xa8] sm:$0xff] }
  0x24   : > { %7602 = vmatprep.mubr.msk.f32.mxu1 %vm465_vm2, %v9107_v63  ;;  %12240 = vst [vmem:[#allocation22_spill] sm:$0xff] %v9140_v45  ;;  %12241 = vst [vmem:[#allocation23_spill] sm:$0xff] %v9148_v50  ;;  %v453_v37 = vrot.slane %v9120_v11, 1  ;;  %v454_v9 = vrot.slane %v9123_v56, 1  ;;  %v9153_v63 = vld [vmem:[%s8875_s12 + $0x160] sm:$0x3]  ;;  %v9174_v7 = vsel %vm382_vm1, %v409_v52, %v411_v44  ;;  %v9177_v49 = vsel %vm382_vm1, %v449_v18, %v451_v42 }
  0x25   : > { %v9159_v40 = vld [vmem:[%s8875_s12 + $0xb0] sm:$0xff]  ;;  %v9164_v51 = vld [vmem:[%s8875_s12 + $0x168] sm:$0xff]  ;;  %12243 = vst [vmem:[#allocation25_spill] sm:$0xff] %v9174_v7  ;;  %12244 = vst [vmem:[#allocation26_spill] sm:$0xff] %v9177_v49  ;;  %v416_v43 = vrot.slane %v9145_v38, 1  ;;  %v456_v36 = vrot.slane %v9153_v63, 1 }
  0x26   : > { %7579 = vmatmul.mubr.msk.f32.gmra.mxu0 %vm465_vm2, %v9130_v23  ;;  %v9167_v62 = vld [vmem:[%s8875_s12 + $0x170] sm:$0xff]  ;;  %v9183_v23 = vsel %vm382_vm1, %v413_v22, %v414_v12  ;;  %v9189_v56 = vld [vmem:[%s8875_s12 + $0xb8] sm:$0x3]  ;;  %v9192_v44 = vsel %vm382_vm1, %v453_v37, %v454_v9  ;;  %v458_v42 = vrot.slane %v9164_v51, 1 }
  0x27   : > { %12242 = vst [vmem:[#allocation24_spill] sm:$0xff] %v9167_v62  ;;  %7603 = vmatmul.mubr.msk.f32.gmra.mxu1 %vm465_vm2, %v9137_v29  ;;  %7581 = vmatprep.mubr.msk.f32.mxu0 %vm465_vm2, %v9140_v45  ;;  %12245 = vst [vmem:[#allocation27_spill] sm:$0xff] %v9183_v23  ;;  %v418_v29 = vrot.slane %v9156_v24, 1  ;;  %v419_v45 = vrot.slane %v9159_v40, 1  ;;  %v459_v18 = vrot.slane %v9167_v62, 1  ;;  %v9206_v22 = vsel %vm382_vm1, %v414_v12, %v416_v43 }
  0x28   : > { %7605 = vmatprep.mubr.msk.f32.mxu1 %vm465_vm2, %v9148_v50  ;;  %12246 = vst [vmem:[#allocation28_spill] sm:$0xff] %v9192_v44  ;;  %v9197_v52 = vld [vmem:[%s8875_s12 + $0x178] sm:$0x3]  ;;  %12247 = vst [vmem:[#allocation29_spill] sm:$0xff] %v9206_v22  ;;  %v421_v37 = vrot.slane %v9189_v56, 1  ;;  %v1052_v50 = vrot.slane %v8878_v3, 2  ;;  %v9213_v62 = vsel %vm382_vm1, %v454_v9, %v456_v36 }
  0x29   : > { %12248 = vst [vmem:[#allocation30_spill] sm:$0xff] %v9213_v62  ;;  %v9221_v43 = vsel %vm382_vm1, %v458_v42, %v459_v18  ;;  %v1055_v12 = vrot.slane %v8893_v10, 2  ;;  %v1057_v10 = vrot.slane %v8901_v14, 2  ;;  %v1058_v42 = vrot.slane %v8906_v17, 2 }
  0x2a   : > { %7582 = vmatmul.mubr.msk.f32.gmra.mxu0 %vm465_vm2, %v9174_v7  ;;  %v9216_v7 = vsel %vm382_vm1, %v418_v29, %v419_v45  ;;  %12250 = vst [vmem:[#allocation32_spill] sm:$0xff] %v9221_v43  ;;  %v9231_v29 = vsel %vm382_vm1, %v419_v45, %v421_v37  ;;  %v1060_v37 = vrot.slane %v8928_v26, 2  ;;  %v1065_v26 = vrot.slane %v8969_v41, 2 }
  0x2b   : > { %7606 = vmatmul.mubr.msk.f32.gmra.mxu1 %vm465_vm2, %v9177_v49  ;;  %7584 = vmatprep.mubr.msk.f32.mxu0 %vm465_vm2, %v9183_v23  ;;  %12249 = vst [vmem:[#allocation31_spill] sm:$0xff] %v9216_v7  ;;  %v461_v49 = vrot.slane %v9197_v52, 1  ;;  %v1053_v23 = vrot.slane %v8881_v4, 2  ;;  %12251 = vst [vmem:[#allocation33_spill] sm:$0xff] %v9231_v29  ;;  %v1070_v41 = vrot.slane %v9021_v60, 2 }
  0x2c   : > { %7608 = vmatprep.mubr.msk.f32.mxu1 %vm465_vm2, %v9192_v44 }
  0x2d   : > { %v9236_v36 = vsel %vm382_vm1, %v459_v18, %v461_v49  ;;  %v1054_v9 = vsel %vm1051_vm3, %v1052_v50, %v1053_v23  ;;  %v1056_v45 = vsel %vm1051_vm3, %v1053_v23, %v1055_v12  ;;  %v1062_v49 = vrot.slane %v8948_v33, 2  ;;  %v9272_v23 = vld [vmem:[%s12115_s1 + $0x18] sm:$0xf] }
  0x2e   : > { %7585 = vmatmul.mubr.msk.f32.gmra.mxu0 %vm465_vm2, %v9206_v22  ;;  %12252 = vst [vmem:[#allocation34_spill] sm:$0xff] %v9236_v36  ;;  %v1063_v50 = vrot.slane %v8951_v34, 2  ;;  %v9254_v18 = vsel %vm1051_vm3, %v1057_v10, %v1058_v42  ;;  %v1068_v12 = vrot.slane %v8991_v48, 2 }
  0x2f   : > { %7609 = vmatmul.mubr.msk.f32.gmra.mxu1 %vm465_vm2, %v9213_v62  ;;  %7587 = vmatprep.mubr.msk.f32.mxu0 %vm465_vm2, %v9216_v7 }
  0x30   : > { %7611 = vmatprep.mubr.msk.f32.mxu1 %vm465_vm2, %v9221_v43  ;;  %v9313_v60 = vsel %vm1051_vm3, %v1068_v12, %v1070_v41  ;;  %v1082_v41 = vrot.slane %v9112_v59, 2 }
  0x32   : > { %7588 = vmatmul.mubr.msk.f32.gmra.mxu0 %vm465_vm2, %v9231_v29 }
  0x33   : > { %7612 = vmatmul.mubr.msk.f32.gmra.mxu1 %vm465_vm2, %v9236_v36  ;;  %7666 = vmatprep.mubr.msk.f32.mxu0 %vm465_vm2, %v1054_v9  ;;  %v9259_v9 = vld [vmem:[%s12115_s1 + $0x14] sm:$0xf] }
  0x34   : > { %7616 = vmatprep.mubr.msk.f32.mxu1 %vm465_vm2, %v8878_v3  ;;  %v9266_v3 = vsel %vm1051_vm3, %v1058_v42, %v1060_v37  ;;  %v1072_v42 = vrot.slane %v9008_v55, 2  ;;  %v1075_v37 = vrot.slane %v9057_v15, 2 }
  0x36   : > { %7667 = vmatmul.mubr.msk.f32.vlgmr.msra.gmra.mxu0 %vm465_vm2, %v1056_v45  ;;  %v1073_v45 = vrot.slane %v9024_v61, 2 }
  0x37   : > { %7617 = vmatmul.mubr.msk.f32.vlgmr.msra.gmra.mxu1 %vm465_vm2, %v8881_v4  ;;  %7765 = vmatpush3.msk.msra.mxu0 %vm530_vm0, %v8936_v28  ;;  %v9279_v4 = vsel %vm1051_vm3, %v1062_v49, %v1063_v50  ;;  %v1067_v28 = vrot.slane %v8988_v47, 2 }
  0x38   : > { %7715 = vmatpush3.msk.msra.mxu1 %vm530_vm0, %v8918_v21  ;;  %7619 = vmatprep.mubr.msk.f32.mxu1 %vm465_vm2, %v8901_v14  ;;  %v9296_v21 = vsel %vm1051_vm3, %v1063_v50, %v1065_v26  ;;  %v9319_v49 = vsel %vm1051_vm3, %v1072_v42, %v1073_v45  ;;  %v1077_v50 = vrot.slane %v9068_v25, 2  ;;  %v1078_v26 = vrot.slane %v9071_v30, 2 }
  0x39   : > { %7669 = vmatprep.mubr.msk.f32.mxu0 %vm465_vm2, %v9254_v18  ;;  %7814 = vmatprep.subr.msk.mxu1 %vm530_vm0, %v9259_v9  ;;  %v9302_v10 = vsel %vm1051_vm3, %v1067_v28, %v1068_v12  ;;  %v9330_v15 = vsel %vm1051_vm3, %v1073_v45, %v1075_v37  ;;  %v1080_v28 = vrot.slane %v9101_v57, 2  ;;  %v1083_v42 = vrot.slane %v9115_v1, 2 }
  0x3a   : > { %7670 = vmatmul.mubr.msk.f32.gmra.mxu0 %vm465_vm2, %v9266_v3  ;;  %7864 = vmatprep.subr.msk.mxu0 %vm530_vm0, %v9272_v23  ;;  %12253 = vst [vmem:[#allocation35_spill] sm:$0xff] %v9330_v15  ;;  %v9336_v12 = vsel %vm1051_vm3, %v1077_v50, %v1078_v26  ;;  %v1085_v45 = vrot.slane %v9145_v38, 2  ;;  %v1087_v50 = vrot.slane %v9156_v24, 2 }
  0x3b   : > { %7620 = vmatmul.mubr.msk.f32.gmra.mxu1 %vm465_vm2, %v8906_v17  ;;  %7672 = vmatprep.mubr.msk.f32.mxu0 %vm465_vm2, %v9279_v4  ;;  %v9347_v57 = vsel %vm1051_vm3, %v1078_v26, %v1080_v28  ;;  %v9353_v37 = vsel %vm1051_vm3, %v1082_v41, %v1083_v42  ;;  %v1090_v26 = vrot.slane %v9189_v56, 2  ;;  %v1092_v41 = vrot.slane %v8884_v5, 2 }
  0x3c   : > { %7622 = vmatprep.mubr.msk.f32.mxu1 %vm465_vm2, %v8948_v33  ;;  %12254 = vst [vmem:[#allocation36_spill] sm:$0xff] %v9347_v57  ;;  %v9364_v38 = vsel %vm1051_vm3, %v1083_v42, %v1085_v45  ;;  %v1095_v42 = vrot.slane %v8898_v13, 2 }
  0x3d   : > { %12255 = vst [vmem:[#allocation37_spill] sm:$0xff] %v9364_v38 }
  0x3e   : > { %7673 = vmatmul.mubr.msk.f32.gmra.mxu0 %vm465_vm2, %v9296_v21 }
  0x3f   : > { %7623 = vmatmul.mubr.msk.f32.gmra.mxu1 %vm465_vm2, %v8951_v34  ;;  %7675 = vmatprep.mubr.msk.f32.mxu0 %vm465_vm2, %v9302_v10 }
  0x40   : > { %7625 = vmatprep.mubr.msk.f32.mxu1 %vm465_vm2, %v8988_v47 }
  0x42   : > { %7676 = vmatmul.mubr.msk.f32.gmra.mxu0 %vm465_vm2, %v9313_v60 }
  0x43   : > { %7626 = vmatmul.mubr.msk.f32.gmra.mxu1 %vm465_vm2, %v8991_v48  ;;  %7678 = vmatprep.mubr.msk.f32.mxu0 %vm465_vm2, %v9319_v49 }
  0x44   : > { %7628 = vmatprep.mubr.msk.f32.mxu1 %vm465_vm2, %v9008_v55 }
  0x46   : > { %7679 = vmatmul.mubr.msk.f32.gmra.mxu0 %vm465_vm2, %v9330_v15  ;;  %v1088_v15 = vrot.slane %v9159_v40, 2 }
  0x47   : > { %7629 = vmatmul.mubr.msk.f32.gmra.mxu1 %vm465_vm2, %v9024_v61  ;;  %7681 = vmatprep.mubr.msk.f32.mxu0 %vm465_vm2, %v9336_v12 }
  0x48   : > { %7631 = vmatprep.mubr.msk.f32.mxu1 %vm465_vm2, %v9068_v25  ;;  %v9370_v28 = vsel %vm1051_vm3, %v1087_v50, %v1088_v15  ;;  %v9381_v56 = vsel %vm1051_vm3, %v1088_v15, %v1090_v26  ;;  %v1097_v50 = vrot.slane %v8910_v19, 2  ;;  %v1100_v15 = vrot.slane %v8931_v27, 2 }
  0x49   : > { %12256 = vst [vmem:[#allocation38_spill] sm:$0xff] %v9381_v56 }
  0x4a   : > { %7682 = vmatmul.mubr.msk.f32.gmra.mxu0 %vm465_vm2, %v9347_v57  ;;  %v1093_v57 = vrot.slane %v8889_v8, 2 }
  0x4b   : > { %7632 = vmatmul.mubr.msk.f32.gmra.mxu1 %vm465_vm2, %v9071_v30  ;;  %7684 = vmatprep.mubr.msk.f32.mxu0 %vm465_vm2, %v9353_v37 }
  0x4c   : > { %7634 = vmatprep.mubr.msk.f32.mxu1 %vm465_vm2, %v9112_v59  ;;  %v9387_v45 = vsel %vm1051_vm3, %v1092_v41, %v1093_v57  ;;  %v9398_v13 = vsel %vm1051_vm3, %v1093_v57, %v1095_v42  ;;  %v1102_v41 = vrot.slane %v8954_v35, 2  ;;  %v1105_v57 = vrot.slane %v8985_v46, 2 }
  0x4d   : > { %12257 = vst [vmem:[#allocation39_spill] sm:$0xff] %v9398_v13 }
  0x4e   : > { %7685 = vmatmul.mubr.msk.f32.gmra.mxu0 %vm465_vm2, %v9364_v38  ;;  %v1098_v38 = vrot.slane %v8913_v20, 2 }
  0x4f   : > { %7635 = vmatmul.mubr.msk.f32.gmra.mxu1 %vm465_vm2, %v9115_v1  ;;  %7687 = vmatprep.mubr.msk.f32.mxu0 %vm465_vm2, %v9370_v28 }
  0x50   : > { %7637 = vmatprep.mubr.msk.f32.mxu1 %vm465_vm2, %v9156_v24  ;;  %v9404_v26 = vsel %vm1051_vm3, %v1097_v50, %v1098_v38  ;;  %v9415_v27 = vsel %vm1051_vm3, %v1098_v38, %v1100_v15  ;;  %v1107_v50 = vrot.slane %v9002_v53, 2  ;;  %v1110_v38 = vrot.slane %v9037_v0, 2 }
  0x51   : > { %12258 = vst [vmem:[#allocation40_spill] sm:$0xff] %v9415_v27 }
  0x52   : > { %7688 = vmatmul.mubr.msk.f32.gmra.mxu0 %vm465_vm2, %v9381_v56  ;;  %v1103_v56 = vrot.slane %v8965_v39, 2 }
  0x53   : > { %7638 = vmatmul.mubr.msk.f32.gmra.mxu1 %vm465_vm2, %v9159_v40  ;;  %7690 = vmatprep.mubr.msk.f32.mxu0 %vm465_vm2, %v9387_v45 }
  0x54   : > { %7640 = vmatprep.mubr.msk.f32.mxu1 %vm465_vm2, %v8884_v5  ;;  %v9421_v42 = vsel %vm1051_vm3, %v1102_v41, %v1103_v56  ;;  %v9432_v46 = vsel %vm1051_vm3, %v1103_v56, %v1105_v57  ;;  %v1112_v41 = vrot.slane %v9041_v2, 2  ;;  %v1115_v56 = vrot.slane %v9060_v16, 2 }
  0x55   : > { %12259 = vst [vmem:[#allocation41_spill] sm:$0xff] %v9432_v46 }
  0x56   : > { %7691 = vmatmul.mubr.msk.f32.gmra.mxu0 %vm465_vm2, %v9398_v13  ;;  %v1108_v13 = vrot.slane %v9005_v54, 2 }
  0x57   : > { %7641 = vmatmul.mubr.msk.f32.gmra.mxu1 %vm465_vm2, %v8889_v8  ;;  %7693 = vmatprep.mubr.msk.f32.mxu0 %vm465_vm2, %v9404_v26 }
  0x58   : > { %7643 = vmatprep.mubr.msk.f32.mxu1 %vm465_vm2, %v8910_v19  ;;  %v9438_v15 = vsel %vm1051_vm3, %v1107_v50, %v1108_v13  ;;  %v9449_v0 = vsel %vm1051_vm3, %v1108_v13, %v1110_v38  ;;  %v1117_v50 = vrot.slane %v9076_v31, 2  ;;  %v1120_v13 = vrot.slane %v9104_v58, 2 }
  0x59   : > { %12260 = vst [vmem:[#allocation42_spill] sm:$0xff] %v9438_v15  ;;  %12261 = vst [vmem:[#allocation43_spill] sm:$0xff] %v9449_v0 }
  0x5a   : > { %7694 = vmatmul.mubr.msk.f32.gmra.mxu0 %vm465_vm2, %v9415_v27  ;;  %v1113_v27 = vrot.slane %v9044_v6, 2 }
  0x5b   : > { %7644 = vmatmul.mubr.msk.f32.gmra.mxu1 %vm465_vm2, %v8913_v20  ;;  %7696 = vmatprep.mubr.msk.f32.mxu0 %vm465_vm2, %v9421_v42 }
  0x5c   : > { %7646 = vmatprep.mubr.msk.f32.mxu1 %vm465_vm2, %v8954_v35  ;;  %v9455_v57 = vsel %vm1051_vm3, %v1112_v41, %v1113_v27  ;;  %v9466_v16 = vsel %vm1051_vm3, %v1113_v27, %v1115_v56  ;;  %v1122_v41 = vrot.slane %v9120_v11, 2  ;;  %v1125_v27 = vrot.slane %v9153_v63, 2 }
  0x5d   : > { %12262 = vst [vmem:[#allocation44_spill] sm:$0xff] %v9455_v57  ;;  %12263 = vst [vmem:[#allocation45_spill] sm:$0xff] %v9466_v16 }
  0x5e   : > { %7697 = vmatmul.mubr.msk.f32.gmra.mxu0 %vm465_vm2, %v9432_v46  ;;  %v1118_v46 = vrot.slane %v9079_v32, 2 }
  0x5f   : > { %7647 = vmatmul.mubr.msk.f32.gmra.mxu1 %vm465_vm2, %v8965_v39  ;;  %7699 = vmatprep.mubr.msk.f32.mxu0 %vm465_vm2, %v9438_v15 }
  0x60   : > { %7649 = vmatprep.mubr.msk.f32.mxu1 %vm465_vm2, %v9002_v53  ;;  %v9472_v38 = vsel %vm1051_vm3, %v1117_v50, %v1118_v46  ;;  %v9483_v58 = vsel %vm1051_vm3, %v1118_v46, %v1120_v13  ;;  %v1127_v50 = vrot.slane %v9164_v51, 2  ;;  %v1130_v46 = vrot.slane %v9197_v52, 2  ;;  %v12266_v52 = vld [vmem:[#allocation5_spill] sm:$0xff] }
  0x62   : > { %7700 = vmatmul.mubr.msk.f32.gmra.mxu0 %vm465_vm2, %v9449_v0  ;;  %v12264_v0 = vld [vmem:[#allocation19_spill] sm:$0xff] }
  0x63   : > { %7650 = vmatmul.mubr.msk.f32.gmra.mxu1 %vm465_vm2, %v9005_v54  ;;  %7702 = vmatprep.mubr.msk.f32.mxu0 %vm465_vm2, %v9455_v57  ;;  %v1123_v15 = vrot.slane %v12264_v0, 2 }
  0x64   : > { %7652 = vmatprep.mubr.msk.f32.mxu1 %vm465_vm2, %v9041_v2 }
  0x65   : > { %v9489_v56 = vsel %vm1051_vm3, %v1122_v41, %v1123_v15  ;;  %v9500_v63 = vsel %vm1051_vm3, %v1123_v15, %v1125_v27  ;;  %v12267_v41 = vld [vmem:[#allocation7_spill] sm:$0xff]  ;;  %v9541_v27 = vld [vmem:[%s12115_s1 + $0x20] sm:$0xf] }
  0x66   : > { %7703 = vmatmul.mubr.msk.f32.gmra.mxu0 %vm465_vm2, %v9466_v16  ;;  %v12265_v16 = vld [vmem:[#allocation24_spill] sm:$0xff] }
  0x67   : > { %7653 = vmatmul.mubr.msk.f32.gmra.mxu1 %vm465_vm2, %v9044_v6  ;;  %7705 = vmatprep.mubr.msk.f32.mxu0 %vm465_vm2, %v9472_v38  ;;  %v1128_v57 = vrot.slane %v12265_v16, 2 }
  0x68   : > { %7655 = vmatprep.mubr.msk.f32.mxu1 %vm465_vm2, %v9076_v31 }
  0x69   : > { %v9506_v13 = vsel %vm1051_vm3, %v1127_v50, %v1128_v57  ;;  %v9515_v15 = vsel %vm1051_vm3, %v1128_v57, %v1130_v46  ;;  %v9532_v57 = vld [vmem:[%s12115_s1 + $0x1c] sm:$0xf]  ;;  %v12272_v50 = vld [vmem:[#allocation17_spill] sm:$0xff] }
  0x6a   : > { %7706 = vmatmul.mubr.msk.f32.gmra.mxu0 %vm465_vm2, %v9483_v58  ;;  %v12273_v46 = vld [vmem:[#allocation20_spill] sm:$0xff] }
  0x6b   : > { %7656 = vmatmul.mubr.msk.f32.gmra.mxu1 %vm465_vm2, %v9079_v32  ;;  %7708 = vmatprep.mubr.msk.f32.mxu0 %vm465_vm2, %v9489_v56 }
  0x6c   : > { %7658 = vmatprep.mubr.msk.f32.mxu1 %vm465_vm2, %v9120_v11 }
  0x6e   : > { %7709 = vmatmul.mubr.msk.f32.gmra.mxu0 %vm465_vm2, %v9500_v63 }
  0x6f   : > { %7659 = vmatmul.mubr.msk.f32.gmra.mxu1 %vm465_vm2, %v12264_v0  ;;  %7711 = vmatprep.mubr.msk.f32.mxu0 %vm465_vm2, %v9506_v13 }
  0x70   : > { %7661 = vmatprep.mubr.msk.f32.mxu1 %vm465_vm2, %v9164_v51 }
  0x72   : > { %7712 = vmatmul.mubr.msk.f32.gmra.mxu0 %vm465_vm2, %v9515_v15 }
  0x73   : > { %7662 = vmatmul.mubr.msk.f32.gmra.mxu1 %vm465_vm2, %v12265_v16  ;;  %7766 = vmatprep.mubr.msk.f32.mxu0 %vm465_vm2, %v12266_v52  ;;  %v12275_v52 = vld [vmem:[#allocation25_spill] sm:$0xff] }
  0x74   : > { %7716 = vmatprep.mubr.msk.f32.mxu1 %vm465_vm2, %v8901_v14  ;;  %v12268_v14 = vld [vmem:[#allocation9_spill] sm:$0xff] }
  0x76   : > { %7767 = vmatmul.mubr.msk.f32.vlgmr.msra.gmra.mxu0 %vm465_vm2, %v12267_v41  ;;  %v12274_v41 = vld [vmem:[#allocation22_spill] sm:$0xff] }
  0x77   : > { %7717 = vmatmul.mubr.msk.f32.vlgmr.msra.gmra.mxu1 %vm465_vm2, %v8906_v17  ;;  %7865 = vmatpush3.msk.msra.mxu0 %vm530_vm0, %v9272_v23  ;;  %v12269_v17 = vld [vmem:[#allocation11_spill] sm:$0xff]  ;;  %v12270_v23 = vld [vmem:[#allocation13_spill] sm:$0xff] }
  0x78   : > { %7815 = vmatpush3.msk.msra.mxu1 %vm530_vm0, %v9259_v9  ;;  %7719 = vmatprep.mubr.msk.f32.mxu1 %vm465_vm2, %v8948_v33  ;;  %v12271_v9 = vld [vmem:[#allocation15_spill] sm:$0xff] }
  0x79   : > { %7769 = vmatprep.mubr.msk.f32.mxu0 %vm465_vm2, %v12268_v14  ;;  %7914 = vmatprep.subr.msk.mxu1 %vm530_vm0, %v9532_v57 }
  0x7a   : > { %7770 = vmatmul.mubr.msk.f32.gmra.mxu0 %vm465_vm2, %v12269_v17  ;;  %7964 = vmatprep.subr.msk.mxu0 %vm530_vm0, %v9541_v27 }
  0x7b   : > { %7720 = vmatmul.mubr.msk.f32.gmra.mxu1 %vm465_vm2, %v8951_v34  ;;  %7772 = vmatprep.mubr.msk.f32.mxu0 %vm465_vm2, %v12270_v23 }
  0x7c   : > { %7722 = vmatprep.mubr.msk.f32.mxu1 %vm465_vm2, %v8988_v47 }
  0x7e   : > { %7773 = vmatmul.mubr.msk.f32.gmra.mxu0 %vm465_vm2, %v12271_v9 }
  0x7f   : > { %7723 = vmatmul.mubr.msk.f32.gmra.mxu1 %vm465_vm2, %v8991_v48  ;;  %7775 = vmatprep.mubr.msk.f32.mxu0 %vm465_vm2, %v12272_v50  ;;  %v12276_v50 = vld [vmem:[#allocation27_spill] sm:$0xff] }
  0x80   : > { %7725 = vmatprep.mubr.msk.f32.mxu1 %vm465_vm2, %v9008_v55 }
  0x82   : > { %7776 = vmatmul.mubr.msk.f32.gmra.mxu0 %vm465_vm2, %v12273_v46 }
  0x83   : > { %7726 = vmatmul.mubr.msk.f32.gmra.mxu1 %vm465_vm2, %v9024_v61  ;;  %7778 = vmatprep.mubr.msk.f32.mxu0 %vm465_vm2, %v12274_v41  ;;  %v9658_v41 = vld [vmem:[%s8875_s12 + $0x190] sm:$0x3] }
  0x84   : > { %7728 = vmatprep.mubr.msk.f32.mxu1 %vm465_vm2, %v9068_v25 }
  0x86   : > { %7779 = vmatmul.mubr.msk.f32.gmra.mxu0 %vm465_vm2, %v12275_v52  ;;  %v9645_v52 = vld [vmem:[%s8875_s12 + $0x188] sm:$0xff] }
  0x87   : > { %7729 = vmatmul.mubr.msk.f32.gmra.mxu1 %vm465_vm2, %v9071_v30  ;;  %7781 = vmatprep.mubr.msk.f32.mxu0 %vm465_vm2, %v12276_v50  ;;  %v12277_v50 = vld [vmem:[#allocation3_spill] sm:$0xff] }
  0x88   : > { %7731 = vmatprep.mubr.msk.f32.mxu1 %vm465_vm2, %v9112_v59 }
  0x8a   : > { %7782 = vmatmul.mubr.msk.f32.gmra.mxu0 %vm465_vm2, %v9206_v22  ;;  %v12278_v22 = vld [vmem:[#allocation4_spill] sm:$0xff] }
  0x8b   : > { %7732 = vmatmul.mubr.msk.f32.gmra.mxu1 %vm465_vm2, %v9115_v1  ;;  %7784 = vmatprep.mubr.msk.f32.mxu0 %vm465_vm2, %v9216_v7  ;;  %v12279_v7 = vld [vmem:[#allocation6_spill] sm:$0xff] }
  0x8c   : > { %7734 = vmatprep.mubr.msk.f32.mxu1 %vm465_vm2, %v9156_v24 }
  0x8e   : > { %7785 = vmatmul.mubr.msk.f32.gmra.mxu0 %vm465_vm2, %v9231_v29  ;;  %v12280_v29 = vld [vmem:[#allocation8_spill] sm:$0xff] }
  0x8f   : > { %7735 = vmatmul.mubr.msk.f32.gmra.mxu1 %vm465_vm2, %v9159_v40  ;;  %7787 = vmatprep.mubr.msk.f32.mxu0 %vm465_vm2, %v12277_v50  ;;  %v12281_v50 = vld [vmem:[#allocation10_spill] sm:$0xff] }
  0x90   : > { %7737 = vmatprep.mubr.msk.f32.mxu1 %vm465_vm2, %v8884_v5 }
  0x92   : > { %7788 = vmatmul.mubr.msk.f32.gmra.mxu0 %vm465_vm2, %v12278_v22  ;;  %v12282_v22 = vld [vmem:[#allocation12_spill] sm:$0xff] }
  0x93   : > { %7738 = vmatmul.mubr.msk.f32.gmra.mxu1 %vm465_vm2, %v8889_v8  ;;  %7790 = vmatprep.mubr.msk.f32.mxu0 %vm465_vm2, %v12279_v7  ;;  %v12283_v7 = vld [vmem:[#allocation14_spill] sm:$0xff] }
  0x94   : > { %7740 = vmatprep.mubr.msk.f32.mxu1 %vm465_vm2, %v8910_v19 }
  0x96   : > { %7791 = vmatmul.mubr.msk.f32.gmra.mxu0 %vm465_vm2, %v12280_v29  ;;  %v12284_v29 = vld [vmem:[#allocation16_spill] sm:$0xff] }
  0x97   : > { %7741 = vmatmul.mubr.msk.f32.gmra.mxu1 %vm465_vm2, %v8913_v20  ;;  %7793 = vmatprep.mubr.msk.f32.mxu0 %vm465_vm2, %v12281_v50  ;;  %v12285_v50 = vld [vmem:[#allocation18_spill] sm:$0xff] }
  0x98   : > { %7743 = vmatprep.mubr.msk.f32.mxu1 %vm465_vm2, %v8954_v35 }
  0x9a   : > { %7794 = vmatmul.mubr.msk.f32.gmra.mxu0 %vm465_vm2, %v12282_v22  ;;  %v12286_v22 = vld [vmem:[#allocation21_spill] sm:$0xff] }
  0x9b   : > { %7744 = vmatmul.mubr.msk.f32.gmra.mxu1 %vm465_vm2, %v8965_v39  ;;  %7796 = vmatprep.mubr.msk.f32.mxu0 %vm465_vm2, %v12283_v7  ;;  %v12287_v7 = vld [vmem:[#allocation23_spill] sm:$0xff] }
  0x9c   : > { %7746 = vmatprep.mubr.msk.f32.mxu1 %vm465_vm2, %v9002_v53 }
  0x9e   : > { %7797 = vmatmul.mubr.msk.f32.gmra.mxu0 %vm465_vm2, %v12284_v29  ;;  %v9642_v29 = vld [vmem:[%s8875_s12 + $0x180] sm:$0xff] }
  0x9f   : > { %7747 = vmatmul.mubr.msk.f32.gmra.mxu1 %vm465_vm2, %v9005_v54  ;;  %7799 = vmatprep.mubr.msk.f32.mxu0 %vm465_vm2, %v12285_v50  ;;  %v12288_v50 = vld [vmem:[#allocation26_spill] sm:$0xff] }
  0xa0   : > { %7749 = vmatprep.mubr.msk.f32.mxu1 %vm465_vm2, %v9041_v2 }
  0xa2   : > { %7800 = vmatmul.mubr.msk.f32.gmra.mxu0 %vm465_vm2, %v12286_v22  ;;  %v1728_v22 = vrot.slane %v9645_v52, 1 }
  0xa3   : > { %7750 = vmatmul.mubr.msk.f32.gmra.mxu1 %vm465_vm2, %v9044_v6  ;;  %7802 = vmatprep.mubr.msk.f32.mxu0 %vm465_vm2, %v12287_v7  ;;  %v1727_v7 = vrot.slane %v9642_v29, 1 }
  0xa4   : > { %7752 = vmatprep.mubr.msk.f32.mxu1 %vm465_vm2, %v9076_v31 }
  0xa6   : > { %7803 = vmatmul.mubr.msk.f32.gmra.mxu0 %vm465_vm2, %v12288_v50  ;;  %v9670_v50 = vsel %vm382_vm1, %v1727_v7, %v1728_v22 }
  0xa7   : > { %7753 = vmatmul.mubr.msk.f32.gmra.mxu1 %vm465_vm2, %v9079_v32  ;;  %7805 = vmatprep.mubr.msk.f32.mxu0 %vm465_vm2, %v9192_v44  ;;  %v1730_v44 = vrot.slane %v9658_v41, 1  ;;  %12289 = vst [vmem:[#allocation19_spill] sm:$0xff] %v9670_v50 }
  0xa8   : > { %7755 = vmatprep.mubr.msk.f32.mxu1 %vm465_vm2, %v9120_v11 }
  0xaa   : > { %7806 = vmatmul.mubr.msk.f32.gmra.mxu0 %vm465_vm2, %v9213_v62  ;;  %v9679_v62 = vsel %vm382_vm1, %v1728_v22, %v1730_v44  ;;  %v12303_v22 = vld [vmem:[#allocation45_spill] sm:$0xff] }
  0xab   : > { %7756 = vmatmul.mubr.msk.f32.gmra.mxu1 %vm465_vm2, %v12264_v0  ;;  %7808 = vmatprep.mubr.msk.f32.mxu0 %vm465_vm2, %v9221_v43  ;;  %12290 = vst [vmem:[#allocation24_spill] sm:$0xff] %v9679_v62 }
  0xac   : > { %7758 = vmatprep.mubr.msk.f32.mxu1 %vm465_vm2, %v9164_v51 }
  0xae   : > { %7809 = vmatmul.mubr.msk.f32.gmra.mxu0 %vm465_vm2, %v9236_v36 }
  0xaf   : > { %7759 = vmatmul.mubr.msk.f32.gmra.mxu1 %vm465_vm2, %v12265_v16  ;;  %7811 = vmatprep.mubr.msk.f32.mxu0 %vm465_vm2, %v9670_v50 }
  0xb0   : > { %7761 = vmatprep.mubr.msk.f32.mxu1 %vm465_vm2, %v9642_v29 }
  0xb2   : > { %7812 = vmatmul.mubr.msk.f32.gmra.mxu0 %vm465_vm2, %v9679_v62 }
  0xb3   : > { %7762 = vmatmul.mubr.msk.f32.gmra.mxu1 %vm465_vm2, %v9645_v52  ;;  %7866 = vmatprep.mubr.msk.f32.mxu0 %vm465_vm2, %v8948_v33  ;;  %v12291_v33 = vld [vmem:[#allocation35_spill] sm:$0xff] }
  0xb4   : > { %7816 = vmatprep.mubr.msk.f32.mxu1 %vm465_vm2, %v9254_v18 }
  0xb6   : > { %7867 = vmatmul.mubr.msk.f32.vlgmr.msra.gmra.mxu0 %vm465_vm2, %v8951_v34  ;;  %v12292_v34 = vld [vmem:[#allocation36_spill] sm:$0xff] }
  0xb7   : > { %7817 = vmatmul.mubr.msk.f32.vlgmr.msra.gmra.mxu1 %vm465_vm2, %v9266_v3  ;;  %7965 = vmatpush3.msk.msra.mxu0 %vm530_vm0, %v9541_v27 }
  0xb8   : > { %7915 = vmatpush3.msk.msra.mxu1 %vm530_vm0, %v9532_v57  ;;  %7819 = vmatprep.mubr.msk.f32.mxu1 %vm465_vm2, %v9279_v4  ;;  %v1998_v57 = vrot.slane %v9642_v29, 2 }
  0xb9   : > { %7869 = vmatprep.mubr.msk.f32.mxu0 %vm465_vm2, %v8988_v47  ;;  %v12293_v47 = vld [vmem:[#allocation37_spill] sm:$0xff] }
  0xba   : > { %7870 = vmatmul.mubr.msk.f32.gmra.mxu0 %vm465_vm2, %v8991_v48  ;;  %v12294_v48 = vld [vmem:[#allocation38_spill] sm:$0xff] }
  0xbb   : > { %7820 = vmatmul.mubr.msk.f32.gmra.mxu1 %vm465_vm2, %v9296_v21  ;;  %7872 = vmatprep.mubr.msk.f32.mxu0 %vm465_vm2, %v9008_v55  ;;  %v12295_v55 = vld [vmem:[#allocation39_spill] sm:$0xff] }
  0xbc   : > { %7822 = vmatprep.mubr.msk.f32.mxu1 %vm465_vm2, %v9302_v10 }
  0xbe   : > { %7873 = vmatmul.mubr.msk.f32.gmra.mxu0 %vm465_vm2, %v9024_v61 }
  0xbf   : > { %7823 = vmatmul.mubr.msk.f32.gmra.mxu1 %vm465_vm2, %v9313_v60  ;;  %7875 = vmatprep.mubr.msk.f32.mxu0 %vm465_vm2, %v9068_v25  ;;  %v12297_v25 = vld [vmem:[#allocation41_spill] sm:$0xff] }
  0xc0   : > { %7825 = vmatprep.mubr.msk.f32.mxu1 %vm465_vm2, %v9319_v49 }
  0xc2   : > { %7876 = vmatmul.mubr.msk.f32.gmra.mxu0 %vm465_vm2, %v9071_v30  ;;  %v12298_v30 = vld [vmem:[#allocation42_spill] sm:$0xff] }
  0xc3   : > { %7826 = vmatmul.mubr.msk.f32.gmra.mxu1 %vm465_vm2, %v12291_v33  ;;  %7878 = vmatprep.mubr.msk.f32.mxu0 %vm465_vm2, %v9112_v59 }
  0xc4   : > { %7828 = vmatprep.mubr.msk.f32.mxu1 %vm465_vm2, %v9336_v12 }
  0xc6   : > { %7879 = vmatmul.mubr.msk.f32.gmra.mxu0 %vm465_vm2, %v9115_v1 }
  0xc7   : > { %7829 = vmatmul.mubr.msk.f32.gmra.mxu1 %vm465_vm2, %v12292_v34  ;;  %7881 = vmatprep.mubr.msk.f32.mxu0 %vm465_vm2, %v9156_v24  ;;  %v12300_v24 = vld [vmem:[#allocation43_spill] sm:$0xff] }
  0xc8   : > { %7831 = vmatprep.mubr.msk.f32.mxu1 %vm465_vm2, %v9353_v37 }
  0xca   : > { %7882 = vmatmul.mubr.msk.f32.gmra.mxu0 %vm465_vm2, %v9159_v40  ;;  %v12301_v40 = vld [vmem:[#allocation44_spill] sm:$0xff] }
  0xcb   : > { %7832 = vmatmul.mubr.msk.f32.gmra.mxu1 %vm465_vm2, %v12293_v47  ;;  %7884 = vmatprep.mubr.msk.f32.mxu0 %vm465_vm2, %v8884_v5 }
  0xcc   : > { %7834 = vmatprep.mubr.msk.f32.mxu1 %vm465_vm2, %v9370_v28 }
  0xce   : > { %7885 = vmatmul.mubr.msk.f32.gmra.mxu0 %vm465_vm2, %v8889_v8 }
  0xcf   : > { %7835 = vmatmul.mubr.msk.f32.gmra.mxu1 %vm465_vm2, %v12294_v48  ;;  %7887 = vmatprep.mubr.msk.f32.mxu0 %vm465_vm2, %v8910_v19  ;;  %v12296_v19 = vld [vmem:[#allocation40_spill] sm:$0xff] }
  0xd0   : > { %7837 = vmatprep.mubr.msk.f32.mxu1 %vm465_vm2, %v9387_v45 }
  0xd2   : > { %7888 = vmatmul.mubr.msk.f32.gmra.mxu0 %vm465_vm2, %v8913_v20 }
  0xd3   : > { %7838 = vmatmul.mubr.msk.f32.gmra.mxu1 %vm465_vm2, %v12295_v55  ;;  %7890 = vmatprep.mubr.msk.f32.mxu0 %vm465_vm2, %v8954_v35 }
  0xd4   : > { %7840 = vmatprep.mubr.msk.f32.mxu1 %vm465_vm2, %v9404_v26 }
  0xd6   : > { %v9759_v5 = vpop.f32.mrf.mxu0  ;;  %7891 = vmatmul.mubr.msk.f32.gmra.mxu0 %vm465_vm2, %v8965_v39 }
  0xd7   : > { %v9763_v8 = vpop.f32.mrf.mxu1  ;;  %7841 = vmatmul.mubr.msk.f32.gmra.mxu1 %vm465_vm2, %v12296_v19  ;;  %7893 = vmatprep.mubr.msk.f32.mxu0 %vm465_vm2, %v9002_v53 }
  0xd8   : > { %v9769_v20 = vpop.f32.mrf.mxu0  ;;  %7843 = vmatprep.mubr.msk.f32.mxu1 %vm465_vm2, %v9421_v42 }
  0xd9   : > { %v9773_v35 = vpop.f32.mrf.mxu1 }
  0xda   : > { %v9775_v61 = vpop.f32.mrf.mxu0  ;;  %7894 = vmatmul.mubr.msk.f32.gmra.mxu0 %vm465_vm2, %v9005_v54 }
  0xdb   : > { %v9779_v39 = vpop.f32.mrf.mxu1  ;;  %7844 = vmatmul.mubr.msk.f32.gmra.mxu1 %vm465_vm2, %v12297_v25  ;;  %7896 = vmatprep.mubr.msk.f32.mxu0 %vm465_vm2, %v9041_v2 }
  0xdc   : > { %v9785_v53 = vpop.f32.mrf.mxu0  ;;  %7846 = vmatprep.mubr.msk.f32.mxu1 %vm465_vm2, %v12298_v30 }
  0xdd   : > { %v9789_v59 = vpop.f32.mrf.mxu1 }
  0xde   : > { %12299 = vst [vmem:[#allocation35_spill] sm:$0xff] %v9789_v59  ;;  %v9791_v1 = vpop.f32.mrf.mxu0  ;;  %7897 = vmatmul.mubr.msk.f32.gmra.mxu0 %vm465_vm2, %v9044_v6  ;;  %v2001_v59 = vrot.slane %v9658_v41, 2 }
  0xdf   : > { %v9795_v54 = vpop.f32.mrf.mxu1  ;;  %7847 = vmatmul.mubr.msk.f32.gmra.mxu1 %vm465_vm2, %v12300_v24  ;;  %7899 = vmatprep.mubr.msk.f32.mxu0 %vm465_vm2, %v9076_v31 }
  0xe0   : > { %v9801_v2 = vpop.f32.mrf.mxu0  ;;  %7849 = vmatprep.mubr.msk.f32.mxu1 %vm465_vm2, %v12301_v40 }
  0xe1   : > { %v9805_v7 = vpop.f32.mrf.mxu1 }
  0xe2   : > { %12302 = vst [vmem:[#allocation36_spill] sm:$0xff] %v9805_v7  ;;  %v9807_v44 = vpop.f32.mrf.mxu0  ;;  %7900 = vmatmul.mubr.msk.f32.gmra.mxu0 %vm465_vm2, %v9079_v32 }
  0xe3   : > { %v9811_v6 = vpop.f32.mrf.mxu1  ;;  %7850 = vmatmul.mubr.msk.f32.gmra.mxu1 %vm465_vm2, %v12303_v22  ;;  %7902 = vmatprep.mubr.msk.f32.mxu0 %vm465_vm2, %v9120_v11 }
  0xe4   : > { %v9817_v31 = vpop.f32.mrf.mxu0  ;;  %7852 = vmatprep.mubr.msk.f32.mxu1 %vm465_vm2, %v9472_v38 }
  0xe5   : > { %v9821_v18 = vpop.f32.mrf.mxu1 }
  0xe6   : > { %12304 = vst [vmem:[#allocation37_spill] sm:$0xff] %v9821_v18  ;;  %v9823_v3 = vpop.f32.mrf.mxu0  ;;  %7903 = vmatmul.mubr.msk.f32.gmra.mxu0 %vm465_vm2, %v12264_v0  ;;  %v1999_v0 = vrot.slane %v9645_v52, 2 }
  0xe7   : > { %v9827_v32 = vpop.f32.mrf.mxu1  ;;  %7853 = vmatmul.mubr.msk.f32.gmra.mxu1 %vm465_vm2, %v9483_v58  ;;  %7905 = vmatprep.mubr.msk.f32.mxu0 %vm465_vm2, %v9164_v51 }
  0xe8   : > { %v9833_v11 = vpop.f32.mrf.mxu0  ;;  %7855 = vmatprep.mubr.msk.f32.mxu1 %vm465_vm2, %v9489_v56 }
  0xe9   : > { %v9838_v27 = vpop.f32.mrf.mxu1 }
  0xea   : > { %12305 = vst [vmem:[#allocation38_spill] sm:$0xff] %v9838_v27  ;;  %v9841_v18 = vpop.f32.mrf.mxu0  ;;  %7906 = vmatmul.mubr.msk.f32.gmra.mxu0 %vm465_vm2, %v12265_v16  ;;  %v9856_v27 = vld [vmem:[%s8875_s12 + $0x198] sm:$0xff]  ;;  %v9862_v16 = vsel %vm1051_vm3, %v1998_v57, %v1999_v0  ;;  %v9882_v57 = vsel %vm1051_vm3, %v1999_v0, %v2001_v59 }
  0xeb   : > { %v9845_v7 = vpop.f32.mrf.mxu1  ;;  %7856 = vmatmul.mubr.msk.f32.gmra.mxu1 %vm465_vm2, %v9500_v63  ;;  %7908 = vmatprep.mubr.msk.f32.mxu0 %vm465_vm2, %v9642_v29  ;;  %12308 = vst [vmem:[#allocation41_spill] sm:$0xff] %v9862_v16  ;;  %12310 = vst [vmem:[#allocation43_spill] sm:$0xff] %v9882_v57 }
  0xec   : > { %12306 = vst [vmem:[#allocation39_spill] sm:$0xff] %v9845_v7  ;;  %v9851_v51 = vpop.f32.mrf.mxu0  ;;  %7858 = vmatprep.mubr.msk.f32.mxu1 %vm465_vm2, %v9506_v13  ;;  %v9875_v7 = vld [vmem:[%s8875_s12 + $0x1a0] sm:$0xff] }
  0xed   : > { %v9859_v62 = vpop.f32.mrf.mxu1 }
  0xee   : > { %12307 = vst [vmem:[#allocation40_spill] sm:$0xff] %v9859_v62  ;;  %v9864_v50 = vpop.f32.mrf.mxu0  ;;  %7909 = vmatmul.mubr.msk.f32.gmra.mxu0 %vm465_vm2, %v9645_v52 }
  0xef   : > { %v9868_v29 = vpop.f32.mrf.mxu1  ;;  %7859 = vmatmul.mubr.msk.f32.gmra.mxu1 %vm465_vm2, %v9515_v15  ;;  %7911 = vmatprep.mubr.msk.f32.mxu0 %vm465_vm2, %v9856_v27 }
  0xf0   : > { %12309 = vst [vmem:[#allocation42_spill] sm:$0xff] %v9868_v29  ;;  %v9877_v41 = vpop.f32.mrf.mxu0  ;;  %7861 = vmatprep.mubr.msk.f32.mxu1 %vm465_vm2, %v9862_v16 }
  0xf1   : > { %v9884_v62 = vpop.f32.mrf.mxu1 }
  0xf2   : > { %12311 = vst [vmem:[#allocation44_spill] sm:$0xff] %v9884_v62  ;;  %v9886_v52 = vpop.f32.mrf.mxu0  ;;  %7912 = vmatmul.mubr.msk.f32.gmra.mxu0 %vm465_vm2, %v9875_v7 }
  0xf3   : > { %v9890_v29 = vpop.f32.mrf.mxu1  ;;  %7862 = vmatmul.mubr.msk.f32.gmra.mxu1 %vm465_vm2, %v9882_v57  ;;  %7966 = vmatprep.mubr.msk.f32.mxu0 %vm465_vm2, %v9279_v4 }
  0xf4   : > { %12312 = vst [vmem:[#allocation45_spill] sm:$0xff] %v9890_v29  ;;  %v9896_v36 = vpop.f32.mrf.mxu0  ;;  %7916 = vmatprep.mubr.msk.f32.mxu1 %vm465_vm2, %v12268_v14 }
  0xf5   : > { %v9900_v59 = vpop.f32.mrf.mxu1 }
  0xf6   : > { %12313 = vst [vmem:[#allocation46_spill] sm:$0xff] %v9900_v59  ;;  %v7668_v0 = vpop.f32.mrf.mxu0  ;;  %7967 = vmatmul.mubr.msk.f32.vlgmr.msra.gmra.mxu0 %vm465_vm2, %v9296_v21 }
  0xf7   : > { %v7618_v62 = vpop.f32.mrf.mxu1  ;;  %7917 = vmatmul.mubr.msk.f32.vlgmr.msra.gmra.mxu1 %vm465_vm2, %v12269_v17  ;;  %7969 = vmatprep.mubr.msk.f32.mxu0 %vm465_vm2, %v9302_v10 }
  0xf8   : > { %v898_v4 = vadd.f32 %v7618_v62, %v9759_v5  ;;  %v1267_v29 = vpop.f32.mrf.mxu0  ;;  %7919 = vmatprep.mubr.msk.f32.mxu1 %vm465_vm2, %v12270_v23 }
  0xf9   : > { %v892_v14 = vpop.f32.mrf.mxu1 }
  0xfa   : > { %v9911_v57 = vadd.f32 %v7668_v0, %v898_v4  ;;  %v893_v59 = vadd.f32 %v892_v14, %v9769_v20  ;;  %v7671_v16 = vpop.f32.mrf.mxu0  ;;  %7970 = vmatmul.mubr.msk.f32.gmra.mxu0 %vm465_vm2, %v9313_v60  ;;  %v12314_v0 = vld [vmem:[#allocation17_spill] sm:$0xff] }
  0xfb   : > { %v7621_v21 = vpop.f32.mrf.mxu1  ;;  %7920 = vmatmul.mubr.msk.f32.gmra.mxu1 %vm465_vm2, %v12271_v9  ;;  %7972 = vmatprep.mubr.msk.f32.mxu0 %vm465_vm2, %v9319_v49 }
  0xfc   : > { %v9920_v62 = vadd.f32 %v1267_v29, %v893_v59  ;;  %v908_v10 = vadd.f32 %v7621_v21, %v9775_v61  ;;  %v1277_v5 = vpop.f32.mrf.mxu0  ;;  %7922 = vmatprep.mubr.msk.f32.mxu1 %vm465_vm2, %v12314_v0 }
  0xfd   : > { %v902_v14 = vpop.f32.mrf.mxu1 }
  0xfe   : > { %v9925_v20 = vadd.f32 %v7671_v16, %v908_v10  ;;  %v903_v60 = vadd.f32 %v902_v14, %v9785_v53  ;;  %v7674_v4 = vpop.f32.mrf.mxu0  ;;  %7973 = vmatmul.mubr.msk.f32.gmra.mxu0 %vm465_vm2, %v12291_v33  ;;  %v12315_v16 = vld [vmem:[#allocation22_spill] sm:$0xff]  ;;  %v12316_v14 = vld [vmem:[#allocation25_spill] sm:$0xff] }
  0xff   : > { %v7624_v9 = vpop.f32.mrf.mxu1  ;;  %7923 = vmatmul.mubr.msk.f32.gmra.mxu1 %vm465_vm2, %v12273_v46  ;;  %7975 = vmatprep.mubr.msk.f32.mxu0 %vm465_vm2, %v9336_v12  ;;  %v6666_v46 = vld [vmem:[%s12117_s3 + $0x170] sm:$0xff] }
 0x100   : > { %v9934_v49 = vadd.f32 %v1277_v5, %v903_v60  ;;  %v918_v61 = vadd.f32 %v7624_v9, %v9791_v1  ;;  %v1287_v29 = vpop.f32.mrf.mxu0  ;;  %7925 = vmatprep.mubr.msk.f32.mxu1 %vm465_vm2, %v12315_v16  ;;  %v12317_v5 = vld [vmem:[#allocation27_spill] sm:$0xff] }
 0x101   : > { %v912_v53 = vpop.f32.mrf.mxu1 }
 0x102   : > { %v9939_v59 = vadd.f32 %v7674_v4, %v918_v61  ;;  %v913_v33 = vadd.f32 %v912_v53, %v9801_v2  ;;  %v7677_v21 = vpop.f32.mrf.mxu0  ;;  %7976 = vmatmul.mubr.msk.f32.gmra.mxu0 %vm465_vm2, %v12292_v34  ;;  %v12318_v53 = vld [vmem:[#allocation29_spill] sm:$0xff] }
 0x103   : > { %v7627_v10 = vpop.f32.mrf.mxu1  ;;  %7926 = vmatmul.mubr.msk.f32.gmra.mxu1 %vm465_vm2, %v12316_v14  ;;  %7978 = vmatprep.mubr.msk.f32.mxu0 %vm465_vm2, %v9353_v37 }
 0x104   : > { %v9948_v12 = vadd.f32 %v1287_v29, %v913_v33  ;;  %v928_v9 = vadd.f32 %v7627_v10, %v9807_v44  ;;  %v1297_v1 = vpop.f32.mrf.mxu0  ;;  %7928 = vmatprep.mubr.msk.f32.mxu1 %vm465_vm2, %v12317_v5  ;;  %v12319_v33 = vld [vmem:[#allocation31_spill] sm:$0xff] }
 0x105   : > { %v922_v2 = vpop.f32.mrf.mxu1 }
 0x106   : > { %v9953_v60 = vadd.f32 %v7677_v21, %v928_v9  ;;  %v923_v34 = vadd.f32 %v922_v2, %v9817_v31  ;;  %v7680_v4 = vpop.f32.mrf.mxu0  ;;  %7979 = vmatmul.mubr.msk.f32.gmra.mxu0 %vm465_vm2, %v12293_v47  ;;  %v6651_v31 = vld [vmem:[%s12117_s3 + $0xf8] sm:$0xff] }
 0x107   : > { %v7630_v61 = vpop.f32.mrf.mxu1  ;;  %7929 = vmatmul.mubr.msk.f32.gmra.mxu1 %vm465_vm2, %v12318_v53  ;;  %7981 = vmatprep.mubr.msk.f32.mxu0 %vm465_vm2, %v9370_v28  ;;  %v3285_v28 = vld [vmem:[%s12117_s3 + $0x78] sm:$0xff] }
 0x108   : > { %v9962_v37 = vadd.f32 %v1297_v1, %v923_v34  ;;  %v938_v44 = vadd.f32 %v7630_v61, %v9823_v3  ;;  %v1307_v29 = vpop.f32.mrf.mxu0  ;;  %7931 = vmatprep.mubr.msk.f32.mxu1 %vm465_vm2, %v12319_v33  ;;  %8014 = vmatprep.subr.mxu1 %v6651_v31  ;;  %v12320_v1 = vld [vmem:[#allocation33_spill] sm:$0xff]  ;;  %v12353_v33 = vmov 0.0  }
 0x109   : > { %v932_v47 = vpop.f32.mrf.mxu1  ;;  %8015 = vmatpush3.msra.mxu1 %v6651_v31  ;;  %8094 = vmatprep.subr.mxu0 %v3285_v28 }
 0x10a   : > { %v9970_v21 = vadd.f32 %v7680_v4, %v938_v44  ;;  %v933_v10 = vadd.f32 %v932_v47, %v9833_v11  ;;  %v7683_v9 = vpop.f32.mrf.mxu0  ;;  %7982 = vmatmul.mubr.msk.f32.gmra.mxu0 %vm465_vm2, %v12294_v48  ;;  %v12321_v4 = vld [vmem:[#allocation3_spill] sm:$0xff]  ;;  %v12322_v47 = vld [vmem:[#allocation4_spill] sm:$0xff] }
 0x10b   : > { %v7633_v3 = vpop.f32.mrf.mxu1  ;;  %7932 = vmatmul.mubr.msk.f32.gmra.mxu1 %vm465_vm2, %v12320_v1  ;;  %7984 = vmatprep.mubr.msk.f32.mxu0 %vm465_vm2, %v9387_v45  ;;  %v6650_v48 = vld [vmem:[%s12117_s3 + $0xf0] sm:$0xff] }
 0x10c   : > { %v9982_v2 = vadd.f32 %v1307_v29, %v933_v10  ;;  %v948_v11 = vadd.f32 %v7633_v3, %v9841_v18  ;;  %v1317_v34 = vpop.f32.mrf.mxu0  ;;  %7934 = vmatprep.mubr.msk.f32.mxu1 %vm465_vm2, %v12321_v4  ;;  %8095 = vmatpush3.msra.mxu0 %v3285_v28  ;;  %v3284_v18 = vld [vmem:[%s12117_s3 + $0x70] sm:$0xff]  ;;  %v12323_v28 = vld [vmem:[#allocation6_spill] sm:$0xff] }
 0x10d   : > { %v942_v61 = vpop.f32.mrf.mxu1  ;;  %8016 = vmatprep.subr.mxu1 %v6650_v48  ;;  %8096 = vmatprep.subr.mxu0 %v3284_v18 }
 0x10e   : > { %v9990_v44 = vadd.f32 %v7683_v9, %v948_v11  ;;  %v943_v45 = vadd.f32 %v942_v61, %v9851_v51  ;;  %v7686_v29 = vpop.f32.mrf.mxu0  ;;  %7985 = vmatmul.mubr.msk.f32.gmra.mxu0 %vm465_vm2, %v12295_v55  ;;  %8017 = vmatpush3.msra.mxu1 %v6650_v48  ;;  %v6649_v55 = vld [vmem:[%s12117_s3 + $0xe8] sm:$0xff]  ;;  %v12324_v61 = vld [vmem:[#allocation8_spill] sm:$0xff] }
 0x10f   : > { %v7636_v31 = vpop.f32.mrf.mxu1  ;;  %7935 = vmatmul.mubr.msk.f32.gmra.mxu1 %vm465_vm2, %v12322_v47  ;;  %7987 = vmatprep.mubr.msk.f32.mxu0 %vm465_vm2, %v9404_v26 }
 0x110   : > { %v10002_v10 = vadd.f32 %v1317_v34, %v943_v45  ;;  %v958_v51 = vadd.f32 %v7636_v31, %v9864_v50  ;;  %v1327_v9 = vpop.f32.mrf.mxu0  ;;  %7937 = vmatprep.mubr.msk.f32.mxu1 %vm465_vm2, %v12323_v28  ;;  %8097 = vmatpush3.msra.mxu0 %v3284_v18  ;;  %v3283_v50 = vld [vmem:[%s12117_s3 + $0x68] sm:$0xff] }
 0x111   : > { %v952_v3 = vpop.f32.mrf.mxu1  ;;  %8018 = vmatprep.subr.mxu1 %v6649_v55  ;;  %v12325_v18 = vld [vmem:[#allocation10_spill] sm:$0xff]  ;;  %8098 = vmatprep.subr.mxu0 %v3283_v50 }
 0x112   : > { %v10010_v11 = vadd.f32 %v7686_v29, %v958_v51  ;;  %v953_v26 = vadd.f32 %v952_v3, %v9877_v41  ;;  %v7689_v34 = vpop.f32.mrf.mxu0  ;;  %7988 = vmatmul.mubr.msk.f32.gmra.mxu0 %vm465_vm2, %v12296_v19  ;;  %8019 = vmatpush3.msra.mxu1 %v6649_v55  ;;  %v6648_v19 = vld [vmem:[%s12117_s3 + $0xe0] sm:$0xff]  ;;  %v12326_v3 = vld [vmem:[#allocation12_spill] sm:$0xff] }
 0x113   : > { %v7639_v48 = vpop.f32.mrf.mxu1  ;;  %7938 = vmatmul.mubr.msk.f32.gmra.mxu1 %vm465_vm2, %v12324_v61  ;;  %7990 = vmatprep.mubr.msk.f32.mxu0 %vm465_vm2, %v9421_v42 }
 0x114   : > { %v10022_v45 = vadd.f32 %v1327_v9, %v953_v26  ;;  %v968_v41 = vadd.f32 %v7639_v48, %v9886_v52  ;;  %v1337_v29 = vpop.f32.mrf.mxu0  ;;  %7940 = vmatprep.mubr.msk.f32.mxu1 %vm465_vm2, %v12325_v18  ;;  %8099 = vmatpush3.msra.mxu0 %v3283_v50  ;;  %v3282_v52 = vld [vmem:[%s12117_s3 + $0x60] sm:$0xff]  ;;  %v12328_v50 = vld [vmem:[#allocation14_spill] sm:$0xff] }
 0x115   : > { %v962_v31 = vpop.f32.mrf.mxu1  ;;  %8020 = vmatprep.subr.mxu1 %v6648_v19  ;;  %8100 = vmatprep.subr.mxu0 %v3282_v52 }
 0x116   : > { %v10030_v51 = vadd.f32 %v7689_v34, %v968_v41  ;;  %v963_v42 = vadd.f32 %v962_v31, %v9896_v36  ;;  %v7692_v9 = vpop.f32.mrf.mxu0  ;;  %7991 = vmatmul.mubr.msk.f32.gmra.mxu0 %vm465_vm2, %v12297_v25  ;;  %8021 = vmatpush3.msra.mxu1 %v6648_v19  ;;  %v6647_v25 = vld [vmem:[%s12117_s3 + $0xd8] sm:$0xff] }
 0x117   : > { %v7642_v55 = vpop.f32.mrf.mxu1  ;;  %7941 = vmatmul.mubr.msk.f32.gmra.mxu1 %vm465_vm2, %v12326_v3  ;;  %7993 = vmatprep.mubr.msk.f32.mxu0 %vm465_vm2, %v12298_v30  ;;  %v12329_v31 = vld [vmem:[#allocation16_spill] sm:$0xff]  ;;  %v12345_v3 = vld [vmem:[#allocation43_spill] sm:$0xff] }
 0x118   : > { %v10042_v26 = vadd.f32 %v1337_v29, %v963_v42  ;;  %v978_v36 = vadd.f32 %v7642_v55, %v9763_v8  ;;  %v1347_v34 = vpop.f32.mrf.mxu0  ;;  %7943 = vmatprep.mubr.msk.f32.mxu1 %vm465_vm2, %v12328_v50  ;;  %8101 = vmatpush3.msra.mxu0 %v3282_v52  ;;  %v3281_v8 = vld [vmem:[%s12117_s3 + $0x58] sm:$0xff]  ;;  %v12331_v52 = vld [vmem:[#allocation18_spill] sm:$0xff]  ;;  %v6642_v50 = vld [vmem:[%s12117_s3 + $0xb0] sm:$0xff] }
 0x119   : > { %v972_v48 = vpop.f32.mrf.mxu1  ;;  %8022 = vmatprep.subr.mxu1 %v6647_v25  ;;  %8102 = vmatprep.subr.mxu0 %v3281_v8 }
 0x11a   : > { %12327 = vst [vmem:[#allocation47_spill] sm:$0xff] %v10042_v26  ;;  %v10050_v41 = vadd.f32 %v7692_v9, %v978_v36  ;;  %v973_v30 = vadd.f32 %v972_v48, %v9773_v35  ;;  %v7695_v29 = vpop.f32.mrf.mxu0  ;;  %7994 = vmatmul.mubr.msk.f32.gmra.mxu0 %vm465_vm2, %v12300_v24  ;;  %8023 = vmatpush3.msra.mxu1 %v6647_v25  ;;  %v6646_v24 = vld [vmem:[%s12117_s3 + $0xd0] sm:$0xff]  ;;  %v12332_v25 = vld [vmem:[#allocation21_spill] sm:$0xff] }
 0x11b   : > { %v7645_v19 = vpop.f32.mrf.mxu1  ;;  %7944 = vmatmul.mubr.msk.f32.gmra.mxu1 %vm465_vm2, %v12329_v31  ;;  %7996 = vmatprep.mubr.msk.f32.mxu0 %vm465_vm2, %v12301_v40  ;;  %v12343_v31 = vld [vmem:[#allocation19_spill] sm:$0xff] }
 0x11c   : > { %v10062_v42 = vadd.f32 %v1347_v34, %v973_v30  ;;  %v988_v35 = vadd.f32 %v7645_v19, %v9779_v39  ;;  %v10065_v9 = vpop.f32.mrf.mxu0  ;;  %7946 = vmatprep.mubr.msk.f32.mxu1 %vm465_vm2, %v12331_v52  ;;  %8103 = vmatpush3.msra.mxu0 %v3281_v8  ;;  %v3280_v39 = vld [vmem:[%s12117_s3 + $0x50] sm:$0xff] }
 0x11d   : > { %v10072_v55 = vpop.f32.mrf.mxu1  ;;  %8024 = vmatprep.subr.mxu1 %v6646_v24  ;;  %8104 = vmatprep.subr.mxu0 %v3280_v39  ;;  %v12341_v52 = vld [vmem:[#allocation39_spill] sm:$0xff] }
 0x11e   : > { %12330 = vst [vmem:[#allocation48_spill] sm:$0xff] %v10062_v42  ;;  %v10074_v36 = vadd.f32 %v7695_v29, %v988_v35  ;;  %v7698_v40 = vpop.f32.mrf.mxu0  ;;  %7997 = vmatmul.mubr.msk.f32.gmra.mxu0 %vm465_vm2, %v12303_v22  ;;  %8025 = vmatpush3.msra.mxu1 %v6646_v24  ;;  %v12333_v29 = vld [vmem:[#allocation23_spill] sm:$0xff]  ;;  %v6645_v22 = vld [vmem:[%s12117_s3 + $0xc8] sm:$0xff] }
 0x11f   : > { %v7648_v34 = vpop.f32.mrf.mxu1  ;;  %7947 = vmatmul.mubr.msk.f32.gmra.mxu1 %vm465_vm2, %v12332_v25  ;;  %7999 = vmatprep.mubr.msk.f32.mxu0 %vm465_vm2, %v9472_v38  ;;  %v3279_v38 = vld [vmem:[%s12117_s3 + $0x48] sm:$0xff] }
 0x120   : > { %v998_v48 = vadd.f32 %v7648_v34, %v9795_v54  ;;  %v10086_v30 = vpop.f32.mrf.mxu0  ;;  %7949 = vmatprep.mubr.msk.f32.mxu1 %vm465_vm2, %v12333_v29  ;;  %8105 = vmatpush3.msra.mxu0 %v3280_v39  ;;  %v12334_v24 = vld [vmem:[#allocation26_spill] sm:$0xff]  ;;  %v12335_v34 = vld [vmem:[#allocation28_spill] sm:$0xff] }
 0x121   : > { %v10093_v8 = vpop.f32.mrf.mxu1  ;;  %8026 = vmatprep.subr.mxu1 %v6645_v22  ;;  %8106 = vmatprep.subr.mxu0 %v3279_v38  ;;  %v332_v29 = vld [vmem:[%s8875_s12 + $0x1a8] sm:$0x3] }
 0x122   : > { %v10095_v19 = vadd.f32 %v7698_v40, %v998_v48  ;;  %v7701_v35 = vpop.f32.mrf.mxu0  ;;  %8000 = vmatmul.mubr.msk.f32.gmra.mxu0 %vm465_vm2, %v9483_v58  ;;  %8027 = vmatpush3.msra.mxu1 %v6645_v22  ;;  %v6644_v58 = vld [vmem:[%s12117_s3 + $0xc0] sm:$0xff] }
 0x123   : > { %v7651_v54 = vpop.f32.mrf.mxu1  ;;  %7950 = vmatmul.mubr.msk.f32.gmra.mxu1 %vm465_vm2, %v12334_v24  ;;  %8002 = vmatprep.mubr.msk.f32.mxu0 %vm465_vm2, %v9489_v56  ;;  %v3278_v56 = vld [vmem:[%s12117_s3 + $0x40] sm:$0xff] }
 0x124   : > { %v1008_v39 = vadd.f32 %v7651_v54, %v9811_v6  ;;  %v10107_v40 = vpop.f32.mrf.mxu0  ;;  %7952 = vmatprep.mubr.msk.f32.mxu1 %vm465_vm2, %v12335_v34  ;;  %8107 = vmatpush3.msra.mxu0 %v3279_v38  ;;  %v12336_v54 = vld [vmem:[#allocation30_spill] sm:$0xff]  ;;  %v2810_v38 = vrot.slane %v9875_v7, 2 }
 0x125   : > { %v10114_v48 = vpop.f32.mrf.mxu1  ;;  %8028 = vmatprep.subr.mxu1 %v6644_v58  ;;  %8108 = vmatprep.subr.mxu0 %v3278_v56 }
 0x126   : > { %v10116_v22 = vadd.f32 %v7701_v35, %v1008_v39  ;;  %v7704_v24 = vpop.f32.mrf.mxu0  ;;  %8003 = vmatmul.mubr.msk.f32.gmra.mxu0 %vm465_vm2, %v9500_v63  ;;  %8029 = vmatpush3.msra.mxu1 %v6644_v58  ;;  %v2809_v35 = vrot.slane %v9856_v27, 2  ;;  %v6643_v58 = vld [vmem:[%s12117_s3 + $0xb8] sm:$0xff] }
 0x127   : > { %v7654_v6 = vpop.f32.mrf.mxu1  ;;  %7953 = vmatmul.mubr.msk.f32.gmra.mxu1 %vm465_vm2, %v12336_v54  ;;  %8005 = vmatprep.mubr.msk.f32.mxu0 %vm465_vm2, %v9506_v13  ;;  %v2538_v54 = vrot.slane %v9856_v27, 1  ;;  %v2539_v13 = vrot.slane %v9875_v7, 1  ;;  %v12339_v27 = vld [vmem:[#allocation34_spill] sm:$0xff]  ;;  %v12340_v7 = vld [vmem:[#allocation41_spill] sm:$0xff] }
 0x128   : > { %v1018_v39 = vadd.f32 %v7654_v6, %v9827_v32  ;;  %v10130_v63 = vpop.f32.mrf.mxu0  ;;  %7955 = vmatprep.mubr.msk.f32.mxu1 %vm465_vm2, %v9221_v43  ;;  %8109 = vmatpush3.msra.mxu0 %v3278_v56  ;;  %v3277_v43 = vld [vmem:[%s12117_s3 + $0x38] sm:$0xff]  ;;  %v2812_v56 = vrot.slane %v332_v29, 2 }
 0x129   : > { %12337 = vst [vmem:[#allocation49_spill] sm:$0xff] %v10130_v63  ;;  %v10139_v34 = vpop.f32.mrf.mxu1  ;;  %8030 = vmatprep.subr.mxu1 %v6643_v58  ;;  %8110 = vmatprep.subr.mxu0 %v3277_v43 }
 0x12a   : > { %12338 = vst [vmem:[#allocation50_spill] sm:$0xff] %v10139_v34  ;;  %v10142_v32 = vadd.f32 %v7704_v24, %v1018_v39  ;;  %v7707_v6 = vpop.f32.mrf.mxu0  ;;  %8006 = vmatmul.mubr.msk.f32.gmra.mxu0 %vm465_vm2, %v9515_v15  ;;  %8031 = vmatpush3.msra.mxu1 %v6643_v58  ;;  %v2541_v15 = vrot.slane %v332_v29, 1  ;;  %v2811_v58 = vsel %vm1051_vm3, %v2809_v35, %v2810_v38  ;;  %v3276_v29 = vld [vmem:[%s12117_s3 + $0x30] sm:$0xff] }
 0x12b   : > { %v7657_v25 = vpop.f32.mrf.mxu1  ;;  %7956 = vmatmul.mubr.msk.f32.gmra.mxu1 %vm465_vm2, %v12339_v27  ;;  %8008 = vmatprep.mubr.msk.f32.mxu0 %vm465_vm2, %v12340_v7  ;;  %v2540_v7 = vsel %vm382_vm1, %v2538_v54, %v2539_v13  ;;  %v12347_v54 = vld [vmem:[#allocation42_spill] sm:$0xff] }
 0x12c   : > { %v1028_v24 = vadd.f32 %v7657_v25, %v12341_v52  ;;  %v10154_v39 = vpop.f32.mrf.mxu0  ;;  %7958 = vmatprep.mubr.msk.f32.mxu1 %vm465_vm2, %v12343_v31  ;;  %8111 = vmatpush3.msra.mxu0 %v3277_v43  ;;  %v12346_v31 = vld [vmem:[#allocation24_spill] sm:$0xff]  ;;  %v2813_v43 = vsel %vm1051_vm3, %v2810_v38, %v2812_v56  ;;  %v3275_v56 = vld [vmem:[%s12117_s3 + $0x28] sm:$0xff] }
 0x12d   : > { %12342 = vst [vmem:[#allocation41_spill] sm:$0xff] %v10154_v39  ;;  %v10162_v27 = vpop.f32.mrf.mxu1  ;;  %8032 = vmatprep.subr.mxu1 %v6642_v50  ;;  %8112 = vmatprep.subr.mxu0 %v3276_v29 }
 0x12e   : > { %12344 = vst [vmem:[#allocation39_spill] sm:$0xff] %v10162_v27  ;;  %v10165_v52 = vadd.f32 %v7707_v6, %v1028_v24  ;;  %v7710_v25 = vpop.f32.mrf.mxu0  ;;  %8009 = vmatmul.mubr.msk.f32.gmra.mxu0 %vm465_vm2, %v12345_v3  ;;  %8033 = vmatpush3.msra.mxu1 %v6642_v50  ;;  %v2542_v3 = vsel %vm382_vm1, %v2539_v13, %v2541_v15  ;;  %v6641_v50 = vld [vmem:[%s12117_s3 + $0xa8] sm:$0xff]  ;;  %v12350_v15 = vld [vmem:[#allocation45_spill] sm:$0xff] }
 0x12f   : > { %v7660_v35 = vpop.f32.mrf.mxu1  ;;  %7959 = vmatmul.mubr.msk.f32.gmra.mxu1 %vm465_vm2, %v12346_v31  ;;  %8011 = vmatprep.mubr.msk.f32.mxu0 %vm465_vm2, %v2811_v58  ;;  %v3273_v31 = vld [vmem:[%s12117_s3 + $0x18] sm:$0xff] }
 0x130   : > { %v1038_v6 = vadd.f32 %v7660_v35, %v12347_v54  ;;  %v10177_v24 = vpop.f32.mrf.mxu0  ;;  %7961 = vmatprep.mubr.msk.f32.mxu1 %vm465_vm2, %v2540_v7  ;;  %8113 = vmatpush3.msra.mxu0 %v3276_v29 }
 0x131   : > { %12348 = vst [vmem:[#allocation43_spill] sm:$0xff] %v10177_v24  ;;  %v10184_v18 = vpop.f32.mrf.mxu1  ;;  %8034 = vmatprep.subr.mxu1 %v6641_v50  ;;  %8114 = vmatprep.subr.mxu0 %v3275_v56 }
 0x132   : > { %12349 = vst [vmem:[#allocation42_spill] sm:$0xff] %v10184_v18  ;;  %v10186_v58 = vadd.f32 %v7710_v25, %v1038_v6  ;;  %v7713_v38 = vpop.f32.mrf.mxu0  ;;  %8012 = vmatmul.mubr.msk.f32.gmra.mxu0 %vm465_vm2, %v2813_v43  ;;  %8035 = vmatpush3.msra.mxu1 %v6641_v50  ;;  %v6640_v25 = vld [vmem:[%s12117_s3 + $0xa0] sm:$0xff]  ;;  %v12215_v50 = vmov 0.0  }
 0x133   : > { %v7663_v13 = vpop.f32.mrf.mxu1  ;;  %7962 = vmatmul.mubr.msk.f32.gmra.mxu1 %vm465_vm2, %v2542_v3  ;;  %8115 = vmatpush3.msra.mxu0 %v3275_v56  ;;  %v3274_v6 = vld [vmem:[%s12117_s3 + $0x20] sm:$0xff]  ;;  %v6639_v3 = vld [vmem:[%s12117_s3 + $0x98] sm:$0xff]  ;;  %3155 = vst [vmem:[#allocation2 + $0x20] sm:$0xff] %v12215_v50  ;;  %3156 = vst [vmem:[#allocation2 + $0x28] sm:$0x3] %v12215_v50 }
 0x134   : > { %v1048_v7 = vadd.f32 %v7663_v13, %v12350_v15  ;;  %v10194_v35 = vpop.f32.mrf.mxu0  ;;  %8036 = vmatprep.subr.mxu1 %v6640_v25  ;;  %3151 = vst [vmem:[#allocation2] sm:$0xff] %v12215_v50  ;;  %3152 = vst [vmem:[#allocation2 + $0x8] sm:$0xff] %v12215_v50  ;;  %8126 = vmatprep.mubr.f32.mxu0 %v12215_v50  ;;  %v6638_v15 = vld [vmem:[%s12117_s3 + $0x90] sm:$0xff] }
 0x135   : > { %12351 = vst [vmem:[#allocation45_spill] sm:$0xff] %v10194_v35  ;;  %v10199_v29 = vpop.f32.mrf.mxu1  ;;  %8037 = vmatpush3.msra.mxu1 %v6640_v25  ;;  %3153 = vst [vmem:[#allocation2 + $0x10] sm:$0x3] %v12215_v50  ;;  %8116 = vmatprep.subr.mxu0 %v3274_v6 }
 0x136   : > { %12352 = vst [vmem:[#allocation51_spill] sm:$0xff] %v10199_v29  ;;  %v10201_v43 = vadd.f32 %v7713_v38, %v1048_v7  ;;  %v10203_v54 = vpop.f32.mrf.mxu0  ;;  %3154 = vst [vmem:[#allocation2 + $0x18] sm:$0xff] %v12215_v50  ;;  %8038 = vmatprep.subr.mxu1 %v6639_v3  ;;  %8117 = vmatpush3.msra.mxu0 %v3274_v6 }
 0x137   : > { %3157 = vst [vmem:[#allocation2 + $0x30] sm:$0xff] %v12215_v50  ;;  %3158 = vst [vmem:[#allocation2 + $0x38] sm:$0xff] %v12215_v50  ;;  %v7718_v38 = vpop.f32.mrf.mxu1  ;;  %8039 = vmatpush3.msra.mxu1 %v6639_v3  ;;  %8118 = vmatprep.subr.mxu0 %v3273_v31 }
 0x138   : > { %3159 = vst [vmem:[#allocation2 + $0x40] sm:$0x3] %v12215_v50  ;;  %3160 = vst [vmem:[#allocation2 + $0x48] sm:$0xff] %v12215_v50  ;;  %v1695_v56 = vadd.f32 %v7718_v38, %v9911_v57  ;;  %v10267_v13 = vpop.f32.mrf.mxu0  ;;  %8040 = vmatprep.subr.mxu1 %v6638_v15  ;;  %v6637_v57 = vld [vmem:[%s12117_s3 + $0x88] sm:$0xff]  ;;  %8119 = vmatpush3.msra.mxu0 %v3273_v31 }
 0x139   : > { %3161 = vst [vmem:[#allocation2 + $0x50] sm:$0xff] %v12215_v50  ;;  %3162 = vst [vmem:[#allocation2 + $0x58] sm:$0x3] %v12215_v50  ;;  %v10272_v7 = vpop.f32.mrf.mxu1  ;;  %8041 = vmatpush3.msra.mxu1 %v6638_v15  ;;  %v3271_v31 = vld [vmem:[%s12117_s3 + $0x8] sm:$0xff] }
 0x13a   : > { %3163 = vst [vmem:[#allocation2 + $0x60] sm:$0xff] %v12215_v50  ;;  %3164 = vst [vmem:[#allocation2 + $0x68] sm:$0xff] %v12215_v50  ;;  %v10275_v25 = vadd.f32 %v10203_v54, %v1695_v56  ;;  %8042 = vmatprep.subr.mxu1 %v6637_v57  ;;  %v3272_v54 = vld [vmem:[%s12117_s3 + $0x10] sm:$0xff]  ;;  %v6636_v56 = vld [vmem:[%s12117_s3 + $0x80] sm:$0xff] }
 0x13b   : > { %3165 = vst [vmem:[#allocation2 + $0x70] sm:$0x3] %v12215_v50  ;;  %3166 = vst [vmem:[#allocation2 + $0x78] sm:$0xff] %v12215_v50  ;;  %v7721_v6 = vpop.f32.mrf.mxu1  ;;  %8043 = vmatpush3.msra.mxu1 %v6637_v57  ;;  %8120 = vmatprep.subr.mxu0 %v3272_v54  ;;  %v3286_v61 = vld [vmem:[#allocation2 + $0x1] sm:$0xff] }
 0x13c   : > { %3167 = vst [vmem:[#allocation2 + $0x80] sm:$0xff] %v12215_v50  ;;  %3168 = vst [vmem:[#allocation2 + $0x88] sm:$0x3] %v12215_v50  ;;  %v1697_v3 = vadd.f32 %v7721_v6, %v9925_v20  ;;  %8044 = vmatprep.subr.mxu1 %v6636_v56  ;;  %8121 = vmatpush3.msra.mxu0 %v3272_v54  ;;  %v3287_v6 = vld [vmem:[#allocation2 + $0x9] sm:$0xff] }
 0x13d   : > { %3169 = vst [vmem:[#allocation2 + $0x90] sm:$0xff] %v12215_v50  ;;  %3170 = vst [vmem:[#allocation2 + $0x98] sm:$0xff] %v12215_v50  ;;  %v10292_v15 = vpop.f32.mrf.mxu1  ;;  %8045 = vmatpush3.msra.mxu1 %v6636_v56  ;;  %8122 = vmatprep.subr.mxu0 %v3271_v31 }
 0x13e   : > { %3171 = vst [vmem:[#allocation2 + $0xa0] sm:$0x3] %v12215_v50  ;;  %3172 = vst [vmem:[#allocation2 + $0xa8] sm:$0xff] %v12215_v50  ;;  %8046 = vmatprep.mubr.f32.mxu1 %v3286_v61  ;;  %8123 = vmatpush3.msra.mxu0 %v3271_v31 }
 0x13f   : > { %3173 = vst [vmem:[#allocation2 + $0xb0] sm:$0xff] %v12215_v50  ;;  %3174 = vst [vmem:[#allocation2 + $0xb8] sm:$0x3] %v12215_v50  ;;  %v7724_v57 = vpop.f32.mrf.mxu1  ;;  %8047 = vmatmul.mubr.f32.vlgmr.msra.gmra.mxu1 %v3287_v6 }
 0x140   : > { %3175 = vst [vmem:[#allocation2 + $0xc0] sm:$0xff] %v12215_v50  ;;  %3176 = vst [vmem:[#allocation2 + $0xc8] sm:$0xff] %v12215_v50  ;;  %v1699_v47 = vadd.f32 %v7724_v57, %v9939_v59 }
 0x141   : > { %3177 = vst [vmem:[#allocation2 + $0xd0] sm:$0x3] %v12215_v50  ;;  %3178 = vst [vmem:[#allocation2 + $0xd8] sm:$0xff] %v12215_v50 }
 0x142   : > { %3179 = vst [vmem:[#allocation2 + $0xe0] sm:$0xff] %v12215_v50  ;;  %3180 = vst [vmem:[#allocation2 + $0xe8] sm:$0x3] %v12215_v50 }
 0x143   : > { %3181 = vst [vmem:[#allocation2 + $0xf0] sm:$0xff] %v12215_v50  ;;  %3182 = vst [vmem:[#allocation2 + $0xf8] sm:$0xff] %v12215_v50 }
 0x144   : > { %3183 = vst [vmem:[#allocation2 + $0x100] sm:$0x3] %v12215_v50  ;;  %3184 = vst [vmem:[#allocation2 + $0x108] sm:$0xff] %v12215_v50 }
 0x145   : > { %3185 = vst [vmem:[#allocation2 + $0x110] sm:$0xff] %v12215_v50  ;;  %3186 = vst [vmem:[#allocation2 + $0x118] sm:$0x3] %v12215_v50 }
 0x146   : > { %3187 = vst [vmem:[#allocation2 + $0x120] sm:$0xff] %v12215_v50  ;;  %3188 = vst [vmem:[#allocation2 + $0x128] sm:$0xff] %v12215_v50 }
 0x147   : > { %3189 = vst [vmem:[#allocation2 + $0x130] sm:$0x3] %v12215_v50  ;;  %3190 = vst [vmem:[#allocation2 + $0x138] sm:$0xff] %v12215_v50 }
 0x148   : > { %3191 = vst [vmem:[#allocation2 + $0x140] sm:$0xff] %v12215_v50  ;;  %3192 = vst [vmem:[#allocation2 + $0x148] sm:$0x3] %v12215_v50 }
 0x149   : > { %3193 = vst [vmem:[#allocation2 + $0x150] sm:$0xff] %v12215_v50  ;;  %3194 = vst [vmem:[#allocation2 + $0x158] sm:$0xff] %v12215_v50 }
 0x14a   : > { %3195 = vst [vmem:[#allocation2 + $0x160] sm:$0x3] %v12215_v50  ;;  %3196 = vst [vmem:[#allocation2 + $0x168] sm:$0xff] %v12215_v50 }
 0x14b   : > { %3197 = vst [vmem:[#allocation2 + $0x170] sm:$0xff] %v12215_v50  ;;  %3198 = vst [vmem:[#allocation2 + $0x178] sm:$0x3] %v12215_v50 }
 0x14c   : > { %3199 = vst [vmem:[#allocation2 + $0x180] sm:$0xff] %v12215_v50  ;;  %3200 = vst [vmem:[#allocation2 + $0x188] sm:$0xff] %v12215_v50 }
 0x14d   : > { %3201 = vst [vmem:[#allocation2 + $0x190] sm:$0x3] %v12215_v50  ;;  %3202 = vst [vmem:[#allocation2 + $0x198] sm:$0xff] %v12215_v50 }
 0x14e   : > { %3203 = vst [vmem:[#allocation2 + $0x1a0] sm:$0xff] %v12215_v50  ;;  %3204 = vst [vmem:[#allocation2 + $0x1a8] sm:$0x3] %v12215_v50  ;;  %v7771_v50 = vpop.f32.mrf.mxu0 }
 0x14f   : > { %v10294_v28 = vadd.f32 %v7771_v50, %v1697_v3  ;;  %v3270_v50 = vld [vmem:[%s12117_s3] sm:$0xff]  ;;  %v10305_v3 = vpop.f32.mrf.mxu1 }
 0x150   : > { %v10284_v38 = vpop.f32.mrf.mxu0  ;;  %8124 = vmatprep.subr.mxu0 %v3270_v50 }
 0x151   : > { %8125 = vmatpush3.msra.mxu0 %v3270_v50  ;;  %v7727_v1 = vpop.f32.mrf.mxu1 }
 0x152   : > { %v7774_v20 = vpop.f32.mrf.mxu0  ;;  %8127 = vmatmul.mubr.f32.vlgmr.msra.gmra.mxu0 %v12353_v33  ;;  %v1701_v59 = vadd.f32 %v7727_v1, %v9953_v60 }
 0x153   : > { %v10307_v54 = vadd.f32 %v7774_v20, %v1699_v47  ;;  %v10313_v31 = vpop.f32.mrf.mxu1 }
 0x154   : > { %v10300_v4 = vpop.f32.mrf.mxu0 }
 0x155   : > { %v7730_v6 = vpop.f32.mrf.mxu1 }
 0x156   : > { %v7777_v56 = vpop.f32.mrf.mxu0  ;;  %v1703_v5 = vadd.f32 %v7730_v6, %v9970_v21  ;;  %v6667_v21 = vld [vmem:[%s12117_s3 + $0x178] sm:$0xff] }
 0x157   : > { %v10315_v57 = vadd.f32 %v7777_v56, %v1701_v59  ;;  %v10320_v47 = vpop.f32.mrf.mxu1  ;;  %8174 = vmatprep.subr.mxu1 %v6667_v21 }
 0x158   : > { %v10311_v61 = vpop.f32.mrf.mxu0  ;;  %8175 = vmatpush3.msra.mxu1 %v6667_v21 }
 0x159   : > { %v7733_v33 = vpop.f32.mrf.mxu1  ;;  %8176 = vmatprep.subr.mxu1 %v6666_v46 }
 0x15a   : > { %v7780_v53 = vpop.f32.mrf.mxu0  ;;  %v1705_v60 = vadd.f32 %v7733_v33, %v9990_v44  ;;  %v6683_v44 = vld [vmem:[%s12117_s3 + $0x1f8] sm:$0xff]  ;;  %8177 = vmatpush3.msra.mxu1 %v6666_v46 }
 0x15b   : > { %v10322_v20 = vadd.f32 %v7780_v53, %v1703_v5  ;;  %v10327_v16 = vpop.f32.mrf.mxu1  ;;  %8254 = vmatprep.subr.mxu0 %v6683_v44 }
 0x15c   : > { %v10318_v14 = vpop.f32.mrf.mxu0  ;;  %8255 = vmatpush3.msra.mxu0 %v6683_v44  ;;  %v6665_v44 = vld [vmem:[%s12117_s3 + $0x168] sm:$0xff] }
 0x15d   : > { %v7736_v6 = vpop.f32.mrf.mxu1  ;;  %8178 = vmatprep.subr.mxu1 %v6665_v44 }
 0x15e   : > { %v7783_v50 = vpop.f32.mrf.mxu0  ;;  %v1707_v5 = vadd.f32 %v7736_v6, %v10010_v11  ;;  %v6682_v6 = vld [vmem:[%s12117_s3 + $0x1f0] sm:$0xff]  ;;  %8179 = vmatpush3.msra.mxu1 %v6665_v44  ;;  %v6680_v44 = vld [vmem:[%s12117_s3 + $0x1e0] sm:$0xff] }
 0x15f   : > { %v10329_v56 = vadd.f32 %v7783_v50, %v1705_v60  ;;  %v10340_v33 = vpop.f32.mrf.mxu1  ;;  %8256 = vmatprep.subr.mxu0 %v6682_v6 }
 0x160   : > { %v10325_v1 = vpop.f32.mrf.mxu0  ;;  %8257 = vmatpush3.msra.mxu0 %v6682_v6  ;;  %v6664_v6 = vld [vmem:[%s12117_s3 + $0x160] sm:$0xff] }
 0x161   : > { %v7739_v0 = vpop.f32.mrf.mxu1  ;;  %8180 = vmatprep.subr.mxu1 %v6664_v6 }
 0x162   : > { %v7786_v59 = vpop.f32.mrf.mxu0  ;;  %v1709_v11 = vadd.f32 %v7739_v0, %v10030_v51  ;;  %v6681_v51 = vld [vmem:[%s12117_s3 + $0x1e8] sm:$0xff]  ;;  %8181 = vmatpush3.msra.mxu1 %v6664_v6  ;;  %v6679_v6 = vld [vmem:[%s12117_s3 + $0x1d8] sm:$0xff] }
 0x163   : > { %v10342_v50 = vadd.f32 %v7786_v59, %v1707_v5  ;;  %v10353_v23 = vpop.f32.mrf.mxu1  ;;  %8258 = vmatprep.subr.mxu0 %v6681_v51 }
 0x164   : > { %v10335_v53 = vpop.f32.mrf.mxu0  ;;  %12357 = vst [vmem:[#allocation55_spill] sm:$0xff] %v10353_v23  ;;  %8259 = vmatpush3.msra.mxu0 %v6681_v51  ;;  %v6663_v51 = vld [vmem:[%s12117_s3 + $0x158] sm:$0xff] }
 0x165   : > { %12354 = vst [vmem:[#allocation52_spill] sm:$0xff] %v10335_v53  ;;  %12355 = vst [vmem:[#allocation53_spill] sm:$0xff] %v10342_v50  ;;  %v7742_v17 = vpop.f32.mrf.mxu1  ;;  %8260 = vmatprep.subr.mxu0 %v6680_v44  ;;  %8182 = vmatprep.subr.mxu1 %v6663_v51 }
 0x166   : > { %v7789_v60 = vpop.f32.mrf.mxu0  ;;  %v1711_v0 = vadd.f32 %v7742_v17, %v10050_v41  ;;  %8261 = vmatpush3.msra.mxu0 %v6680_v44  ;;  %8183 = vmatpush3.msra.mxu1 %v6663_v51  ;;  %v6662_v44 = vld [vmem:[%s12117_s3 + $0x150] sm:$0xff] }
 0x167   : > { %v10355_v59 = vadd.f32 %v7789_v60, %v1709_v11  ;;  %v10366_v35 = vpop.f32.mrf.mxu1  ;;  %8262 = vmatprep.subr.mxu0 %v6679_v6  ;;  %8184 = vmatprep.subr.mxu1 %v6662_v44  ;;  %v6678_v51 = vld [vmem:[%s12117_s3 + $0x1d0] sm:$0xff] }
 0x168   : > { %v10348_v21 = vpop.f32.mrf.mxu0  ;;  %12360 = vst [vmem:[#allocation58_spill] sm:$0xff] %v10366_v35  ;;  %8263 = vmatpush3.msra.mxu0 %v6679_v6  ;;  %8185 = vmatpush3.msra.mxu1 %v6662_v44  ;;  %v6661_v6 = vld [vmem:[%s12117_s3 + $0x148] sm:$0xff] }
 0x169   : > { %12356 = vst [vmem:[#allocation54_spill] sm:$0xff] %v10348_v21  ;;  %12358 = vst [vmem:[#allocation56_spill] sm:$0xff] %v10355_v59  ;;  %v7745_v29 = vpop.f32.mrf.mxu1  ;;  %8264 = vmatprep.subr.mxu0 %v6678_v51  ;;  %8186 = vmatprep.subr.mxu1 %v6661_v6  ;;  %v6677_v44 = vld [vmem:[%s12117_s3 + $0x1c8] sm:$0xff] }
 0x16a   : > { %v7792_v5 = vpop.f32.mrf.mxu0  ;;  %v1713_v17 = vadd.f32 %v7745_v29, %v10074_v36  ;;  %8265 = vmatpush3.msra.mxu0 %v6678_v51  ;;  %8187 = vmatpush3.msra.mxu1 %v6661_v6  ;;  %v6660_v51 = vld [vmem:[%s12117_s3 + $0x140] sm:$0xff] }
 0x16b   : > { %v10368_v60 = vadd.f32 %v7792_v5, %v1711_v0  ;;  %v10379_v24 = vpop.f32.mrf.mxu1  ;;  %8266 = vmatprep.subr.mxu0 %v6677_v44  ;;  %8188 = vmatprep.subr.mxu1 %v6660_v51  ;;  %v6676_v6 = vld [vmem:[%s12117_s3 + $0x1c0] sm:$0xff] }
 0x16c   : > { %v10361_v46 = vpop.f32.mrf.mxu0  ;;  %12363 = vst [vmem:[#allocation61_spill] sm:$0xff] %v10379_v24  ;;  %8267 = vmatpush3.msra.mxu0 %v6677_v44  ;;  %8189 = vmatpush3.msra.mxu1 %v6660_v51  ;;  %v6659_v44 = vld [vmem:[%s12117_s3 + $0x138] sm:$0xff] }
 0x16d   : > { %12359 = vst [vmem:[#allocation57_spill] sm:$0xff] %v10361_v46  ;;  %12361 = vst [vmem:[#allocation59_spill] sm:$0xff] %v10368_v60  ;;  %v7748_v18 = vpop.f32.mrf.mxu1  ;;  %8268 = vmatprep.subr.mxu0 %v6676_v6  ;;  %8190 = vmatprep.subr.mxu1 %v6659_v44  ;;  %v6675_v51 = vld [vmem:[%s12117_s3 + $0x1b8] sm:$0xff] }
 0x16e   : > { %v7795_v11 = vpop.f32.mrf.mxu0  ;;  %v1715_v36 = vadd.f32 %v7748_v18, %v10095_v19  ;;  %8269 = vmatpush3.msra.mxu0 %v6676_v6  ;;  %8191 = vmatpush3.msra.mxu1 %v6659_v44 }
 0x16f   : > { %v10381_v5 = vadd.f32 %v7795_v11, %v1713_v17  ;;  %v10392_v39 = vpop.f32.mrf.mxu1  ;;  %8270 = vmatprep.subr.mxu0 %v6675_v51 }
 0x170   : > { %v10374_v41 = vpop.f32.mrf.mxu0  ;;  %12366 = vst [vmem:[#allocation64_spill] sm:$0xff] %v10392_v39  ;;  %8271 = vmatpush3.msra.mxu0 %v6675_v51 }
 0x171   : > { %12362 = vst [vmem:[#allocation60_spill] sm:$0xff] %v10374_v41  ;;  %12364 = vst [vmem:[#allocation62_spill] sm:$0xff] %v10381_v5  ;;  %v7751_v5 = vpop.f32.mrf.mxu1 }
 0x172   : > { %v7798_v0 = vpop.f32.mrf.mxu0  ;;  %v1717_v18 = vadd.f32 %v7751_v5, %v10116_v22 }
 0x173   : > { %v10394_v11 = vadd.f32 %v7798_v0, %v1715_v36 }
 0x174   : > { %v10387_v29 = vpop.f32.mrf.mxu0 }
 0x175   : > { %12365 = vst [vmem:[#allocation63_spill] sm:$0xff] %v10387_v29  ;;  %12367 = vst [vmem:[#allocation65_spill] sm:$0xff] %v10394_v11  ;;  %v10405_v29 = vpop.f32.mrf.mxu1 }
 0x176   : > { %v7801_v17 = vpop.f32.mrf.mxu0  ;;  %12369 = vst [vmem:[#allocation67_spill] sm:$0xff] %v10405_v29 }
 0x177   : > { %v10407_v0 = vadd.f32 %v7801_v17, %v1717_v18  ;;  %v7754_v11 = vpop.f32.mrf.mxu1 }
 0x178   : > { %v10400_v19 = vpop.f32.mrf.mxu0  ;;  %v1719_v22 = vadd.f32 %v7754_v11, %v10142_v32 }
 0x179   : > { %12368 = vst [vmem:[#allocation66_spill] sm:$0xff] %v10400_v19  ;;  %12370 = vst [vmem:[#allocation68_spill] sm:$0xff] %v10407_v0  ;;  %v10418_v19 = vpop.f32.mrf.mxu1 }
 0x17a   : > { %v7804_v36 = vpop.f32.mrf.mxu0  ;;  %12372 = vst [vmem:[#allocation70_spill] sm:$0xff] %v10418_v19  ;;  %v6669_v19 = vld [vmem:[%s12117_s3 + $0x188] sm:$0xff] }
 0x17b   : > { %v10420_v17 = vadd.f32 %v7804_v36, %v1719_v22  ;;  %v7757_v0 = vpop.f32.mrf.mxu1 }
 0x17c   : > { %v10413_v5 = vpop.f32.mrf.mxu0  ;;  %v1721_v32 = vadd.f32 %v7757_v0, %v10165_v52 }
 0x17d   : > { %12371 = vst [vmem:[#allocation69_spill] sm:$0xff] %v10413_v5  ;;  %12373 = vst [vmem:[#allocation71_spill] sm:$0xff] %v10420_v17  ;;  %v10431_v5 = vpop.f32.mrf.mxu1 }
 0x17e   : > { %v7807_v18 = vpop.f32.mrf.mxu0  ;;  %12375 = vst [vmem:[#allocation73_spill] sm:$0xff] %v10431_v5  ;;  %v6670_v5 = vld [vmem:[%s12117_s3 + $0x190] sm:$0xff] }
 0x17f   : > { %v10433_v36 = vadd.f32 %v7807_v18, %v1721_v32  ;;  %v7760_v17 = vpop.f32.mrf.mxu1  ;;  %v6658_v18 = vld [vmem:[%s12117_s3 + $0x130] sm:$0xff] }
 0x180   : > { %v10426_v11 = vpop.f32.mrf.mxu0  ;;  %v1723_v52 = vadd.f32 %v7760_v17, %v10186_v58  ;;  %8192 = vmatprep.subr.mxu1 %v6658_v18  ;;  %v6657_v58 = vld [vmem:[%s12117_s3 + $0x128] sm:$0xff] }
 0x181   : > { %12374 = vst [vmem:[#allocation72_spill] sm:$0xff] %v10426_v11  ;;  %12376 = vst [vmem:[#allocation74_spill] sm:$0xff] %v10433_v36  ;;  %v10447_v32 = vpop.f32.mrf.mxu1  ;;  %8193 = vmatpush3.msra.mxu1 %v6658_v18  ;;  %v6671_v11 = vld [vmem:[%s12117_s3 + $0x198] sm:$0xff] }
 0x182   : > { %v7810_v22 = vpop.f32.mrf.mxu0  ;;  %12378 = vst [vmem:[#allocation76_spill] sm:$0xff] %v10447_v32  ;;  %8194 = vmatprep.subr.mxu1 %v6657_v58  ;;  %v6674_v32 = vld [vmem:[%s12117_s3 + $0x1b0] sm:$0xff] }
 0x183   : > { %v10449_v6 = vadd.f32 %v7810_v22, %v1723_v52  ;;  %v7763_v17 = vpop.f32.mrf.mxu1  ;;  %8195 = vmatpush3.msra.mxu1 %v6657_v58  ;;  %v6656_v22 = vld [vmem:[%s12117_s3 + $0x120] sm:$0xff]  ;;  %8272 = vmatprep.subr.mxu0 %v6674_v32 }
 0x184   : > { %v10439_v0 = vpop.f32.mrf.mxu0  ;;  %v1725_v44 = vadd.f32 %v7763_v17, %v10201_v43  ;;  %8196 = vmatprep.subr.mxu1 %v6656_v22  ;;  %8273 = vmatpush3.msra.mxu0 %v6674_v32  ;;  %v6655_v43 = vld [vmem:[%s12117_s3 + $0x118] sm:$0xff] }
 0x185   : > { %12377 = vst [vmem:[#allocation75_spill] sm:$0xff] %v10439_v0  ;;  %12379 = vst [vmem:[#allocation77_spill] sm:$0xff] %v10449_v6  ;;  %v10463_v52 = vpop.f32.mrf.mxu1  ;;  %8197 = vmatpush3.msra.mxu1 %v6656_v22  ;;  %v6672_v22 = vld [vmem:[%s12117_s3 + $0x1a0] sm:$0xff] }
 0x186   : > { %v7813_v36 = vpop.f32.mrf.mxu0  ;;  %12381 = vst [vmem:[#allocation79_spill] sm:$0xff] %v10463_v52  ;;  %8198 = vmatprep.subr.mxu1 %v6655_v43 }
 0x187   : > { %v10465_v51 = vadd.f32 %v7813_v36, %v1725_v44  ;;  %v10472_v17 = vpop.f32.mrf.mxu1  ;;  %8199 = vmatpush3.msra.mxu1 %v6655_v43  ;;  %v6654_v36 = vld [vmem:[%s12117_s3 + $0x110] sm:$0xff]  ;;  %v6653_v43 = vld [vmem:[%s12117_s3 + $0x108] sm:$0xff] }
 0x188   : > { %v10455_v0 = vpop.f32.mrf.mxu0  ;;  %8200 = vmatprep.subr.mxu1 %v6654_v36 }
 0x189   : > { %12380 = vst [vmem:[#allocation78_spill] sm:$0xff] %v10455_v0  ;;  %12382 = vst [vmem:[#allocation80_spill] sm:$0xff] %v10465_v51  ;;  %v6673_v0 = vld [vmem:[%s12117_s3 + $0x1a8] sm:$0xff]  ;;  %v10482_v32 = vpop.f32.mrf.mxu1  ;;  %8201 = vmatpush3.msra.mxu1 %v6654_v36 }
 0x18a   : > { %v10467_v18 = vpop.f32.mrf.mxu0  ;;  %8274 = vmatprep.subr.mxu0 %v6673_v0  ;;  %8202 = vmatprep.subr.mxu1 %v6653_v43 }
 0x18b   : > { %8275 = vmatpush3.msra.mxu0 %v6673_v0  ;;  %v10492_v51 = vpop.f32.mrf.mxu1  ;;  %8203 = vmatpush3.msra.mxu1 %v6653_v43  ;;  %v6652_v0 = vld [vmem:[%s12117_s3 + $0x100] sm:$0xff] }
 0x18c   : > { %v10474_v58 = vpop.f32.mrf.mxu0  ;;  %8276 = vmatprep.subr.mxu0 %v6672_v22  ;;  %8204 = vmatprep.subr.mxu1 %v6652_v0 }
 0x18d   : > { %8277 = vmatpush3.msra.mxu0 %v6672_v22  ;;  %v10499_v52 = vpop.f32.mrf.mxu1  ;;  %8205 = vmatpush3.msra.mxu1 %v6652_v0  ;;  %v6668_v0 = vld [vmem:[%s12117_s3 + $0x180] sm:$0xff] }
 0x18e   : > { %v10484_v44 = vpop.f32.mrf.mxu0  ;;  %8278 = vmatprep.subr.mxu0 %v6671_v11 }
 0x18f   : > { %v10509_v22 = vpop.f32.mrf.mxu1  ;;  %8279 = vmatpush3.msra.mxu0 %v6671_v11  ;;  %v10530_v11 = vld [vmem:[%s12117_s3 + $0x278] sm:$0xff] }
 0x190   : > { %v10494_v6 = vpop.f32.mrf.mxu0  ;;  %8280 = vmatprep.subr.mxu0 %v6670_v5  ;;  %12383 = vst [vmem:[#allocation81_spill] sm:$0xff] %v10530_v11  ;;  %8334 = vmatprep.subr.mxu1 %v10530_v11 }
 0x191   : > { %v10516_v29 = vpop.f32.mrf.mxu1  ;;  %8281 = vmatpush3.msra.mxu0 %v6670_v5 }
 0x192   : > { %v10501_v36 = vpop.f32.mrf.mxu0  ;;  %8282 = vmatprep.subr.mxu0 %v6669_v19 }
 0x193   : > { %v10520_v41 = vpop.f32.mrf.mxu1  ;;  %8283 = vmatpush3.msra.mxu0 %v6669_v19  ;;  %v10544_v19 = vld [vmem:[%s12117_s3 + $0x2f8] sm:$0xff] }
 0x194   : > { %v10511_v43 = vpop.f32.mrf.mxu0  ;;  %8284 = vmatprep.subr.mxu0 %v6668_v0  ;;  %12384 = vst [vmem:[#allocation82_spill] sm:$0xff] %v10544_v19 }
 0x195   : > { %v10532_v60 = vpop.f32.mrf.mxu1  ;;  %8285 = vmatpush3.msra.mxu0 %v6668_v0 }
 0x196   : > { %v10518_v39 = vpop.f32.mrf.mxu0  ;;  %8414 = vmatprep.subr.mxu0 %v10544_v19 }
 0x197   : > { %v10537_v24 = vpop.f32.mrf.mxu1 }
 0x198   : > { %v10525_v27 = vpop.f32.mrf.mxu0 }
 0x199   : > { %v10546_v63 = vpop.f32.mrf.mxu1 }
 0x19a   : > { %v10535_v5 = vpop.f32.mrf.mxu0 }
 0x19b   : > { %v10551_v35 = vpop.f32.mrf.mxu1 }
 0x19c   : > { %v10539_v46 = vpop.f32.mrf.mxu0 }
 0x19d   : > { %v10555_v0 = vpop.f32.mrf.mxu1 }
 0x19e   : > { %v10549_v59 = vpop.f32.mrf.mxu0  ;;  %12387 = vst [vmem:[#allocation85_spill] sm:$0xff] %v10555_v0 }
 0x19f   : > { %12385 = vst [vmem:[#allocation83_spill] sm:$0xff] %v10549_v59  ;;  %v10559_v21 = vpop.f32.mrf.mxu1 }
 0x1a0   : > { %v10553_v11 = vpop.f32.mrf.mxu0  ;;  %12389 = vst [vmem:[#allocation87_spill] sm:$0xff] %v10559_v21 }
 0x1a1   : > { %12386 = vst [vmem:[#allocation84_spill] sm:$0xff] %v10553_v11  ;;  %v10563_v50 = vpop.f32.mrf.mxu1 }
 0x1a2   : > { %v10557_v42 = vpop.f32.mrf.mxu0  ;;  %12391 = vst [vmem:[#allocation89_spill] sm:$0xff] %v10563_v50 }
 0x1a3   : > { %12388 = vst [vmem:[#allocation86_spill] sm:$0xff] %v10557_v42  ;;  %v10567_v26 = vpop.f32.mrf.mxu1 }
 0x1a4   : > { %v10561_v34 = vpop.f32.mrf.mxu0  ;;  %12393 = vst [vmem:[#allocation91_spill] sm:$0xff] %v10567_v26 }
 0x1a5   : > { %12390 = vst [vmem:[#allocation88_spill] sm:$0xff] %v10561_v34  ;;  %v10571_v59 = vpop.f32.mrf.mxu1 }
 0x1a6   : > { %v10565_v23 = vpop.f32.mrf.mxu0  ;;  %12395 = vst [vmem:[#allocation93_spill] sm:$0xff] %v10571_v59 }
 0x1a7   : > { %12392 = vst [vmem:[#allocation90_spill] sm:$0xff] %v10565_v23  ;;  %v10575_v11 = vpop.f32.mrf.mxu1 }
 0x1a8   : > { %v10569_v19 = vpop.f32.mrf.mxu0  ;;  %12397 = vst [vmem:[#allocation95_spill] sm:$0xff] %v10575_v11 }
 0x1a9   : > { %12394 = vst [vmem:[#allocation92_spill] sm:$0xff] %v10569_v19  ;;  %v10579_v42 = vpop.f32.mrf.mxu1 }
 0x1aa   : > { %v10573_v53 = vpop.f32.mrf.mxu0  ;;  %12399 = vst [vmem:[#allocation97_spill] sm:$0xff] %v10579_v42 }
 0x1ab   : > { %12396 = vst [vmem:[#allocation94_spill] sm:$0xff] %v10573_v53  ;;  %v10583_v34 = vpop.f32.mrf.mxu1 }
 0x1ac   : > { %v10577_v0 = vpop.f32.mrf.mxu0  ;;  %12401 = vst [vmem:[#allocation99_spill] sm:$0xff] %v10583_v34 }
 0x1ad   : > { %12398 = vst [vmem:[#allocation96_spill] sm:$0xff] %v10577_v0  ;;  %v10587_v23 = vpop.f32.mrf.mxu1 }
 0x1ae   : > { %v10581_v21 = vpop.f32.mrf.mxu0  ;;  %12403 = vst [vmem:[#allocation101_spill] sm:$0xff] %v10587_v23 }
 0x1af   : > { %12400 = vst [vmem:[#allocation98_spill] sm:$0xff] %v10581_v21  ;;  %v10591_v19 = vpop.f32.mrf.mxu1 }
 0x1b0   : > { %v10585_v50 = vpop.f32.mrf.mxu0  ;;  %12405 = vst [vmem:[#allocation103_spill] sm:$0xff] %v10591_v19 }
 0x1b1   : > { %12402 = vst [vmem:[#allocation100_spill] sm:$0xff] %v10585_v50  ;;  %v10595_v53 = vpop.f32.mrf.mxu1 }
 0x1b2   : > { %v10589_v26 = vpop.f32.mrf.mxu0  ;;  %12407 = vst [vmem:[#allocation105_spill] sm:$0xff] %v10595_v53 }
 0x1b3   : > { %12404 = vst [vmem:[#allocation102_spill] sm:$0xff] %v10589_v26  ;;  %v10599_v0 = vpop.f32.mrf.mxu1 }
 0x1b4   : > { %v10593_v59 = vpop.f32.mrf.mxu0 }
 0x1b5   : > { %12406 = vst [vmem:[#allocation104_spill] sm:$0xff] %v10593_v59  ;;  %v10603_v21 = vpop.f32.mrf.mxu1 }
 0x1b6   : > { %v10597_v11 = vpop.f32.mrf.mxu0  ;;  %12410 = vst [vmem:[#allocation108_spill] sm:$0xff] %v10603_v21 }
 0x1b7   : > { %12408 = vst [vmem:[#allocation106_spill] sm:$0xff] %v10597_v11  ;;  %v10607_v50 = vpop.f32.mrf.mxu1 }
 0x1b8   : > { %v10601_v42 = vpop.f32.mrf.mxu0  ;;  %12412 = vst [vmem:[#allocation110_spill] sm:$0xff] %v10607_v50 }
 0x1b9   : > { %12409 = vst [vmem:[#allocation107_spill] sm:$0xff] %v10601_v42  ;;  %v10611_v26 = vpop.f32.mrf.mxu1  ;;  %v1694_v42 = vadd.f32 %v10272_v7, %v9920_v62 }
 0x1ba   : > { %v10605_v34 = vpop.f32.mrf.mxu0  ;;  %12414 = vst [vmem:[#allocation112_spill] sm:$0xff] %v10611_v26 }
 0x1bb   : > { %12411 = vst [vmem:[#allocation109_spill] sm:$0xff] %v10605_v34  ;;  %v10615_v59 = vpop.f32.mrf.mxu1  ;;  %v1966_v26 = vadd.f32 %v10267_v13, %v1694_v42  ;;  %v2240_v13 = vadd.f32 %v10492_v51, %v10294_v28  ;;  %v10661_v28 = vld [vmem:[%s12116_s2] ss:$0 sm:$0xff] }
 0x1bc   : > { %v10609_v23 = vpop.f32.mrf.mxu0  ;;  %12416 = vst [vmem:[#allocation114_spill] sm:$0xff] %v10615_v59 }
 0x1bd   : > { %12413 = vst [vmem:[#allocation111_spill] sm:$0xff] %v10609_v23  ;;  %v10619_v11 = vpop.f32.mrf.mxu1  ;;  %v2237_v62 = vadd.f32 %v10482_v32, %v1966_v26 }
 0x1be   : > { %v10613_v19 = vpop.f32.mrf.mxu0  ;;  %12418 = vst [vmem:[#allocation116_spill] sm:$0xff] %v10619_v11 }
 0x1bf   : > { %12415 = vst [vmem:[#allocation113_spill] sm:$0xff] %v10613_v19  ;;  %v10625_v34 = vpop.f32.mrf.mxu1  ;;  %v1696_v19 = vadd.f32 %v10292_v15, %v9934_v49 }
 0x1c0   : > { %v10617_v53 = vpop.f32.mrf.mxu0 }
 0x1c1   : > { %12417 = vst [vmem:[#allocation115_spill] sm:$0xff] %v10617_v53  ;;  %v10629_v23 = vpop.f32.mrf.mxu1  ;;  %v2238_v53 = vadd.f32 %v10472_v17, %v10275_v25  ;;  %v1968_v42 = vadd.f32 %v10284_v38, %v1696_v19  ;;  %v2505_v17 = vadd.f32 %v10474_v58, %v2237_v62  ;;  %v2242_v38 = vadd.f32 %v10509_v22, %v10307_v54  ;;  %v12423_v58 = vld [vmem:[#allocation35_spill] sm:$0xff] }
 0x1c2   : > { %v10623_v21 = vpop.f32.mrf.mxu0 }
 0x1c3   : > { %12419 = vst [vmem:[#allocation117_spill] sm:$0xff] %v10623_v21  ;;  %v10638_v59 = vpop.f32.mrf.mxu1  ;;  %v2506_v49 = vadd.f32 %v10467_v18, %v2238_v53  ;;  %v2239_v26 = vadd.f32 %v10499_v52, %v1968_v42  ;;  %v2508_v53 = vadd.f32 %v10484_v44, %v2240_v13  ;;  %v1702_v44 = vadd.f32 %v10320_v47, %v9982_v2 }
 0x1c4   : > { %v10627_v50 = vpop.f32.mrf.mxu0 }
 0x1c5   : > { %12420 = vst [vmem:[#allocation118_spill] sm:$0xff] %v10627_v50  ;;  %v1698_v50 = vadd.f32 %v10305_v3, %v9948_v12  ;;  %v10645_v21 = vpop.f32.mrf.mxu1  ;;  %v1700_v12 = vadd.f32 %v10313_v31, %v9962_v37  ;;  %v2507_v31 = vadd.f32 %v10494_v6, %v2239_v26 }
 0x1c6   : > { %v10636_v11 = vpop.f32.mrf.mxu0 }
 0x1c7   : > { %12421 = vst [vmem:[#allocation119_spill] sm:$0xff] %v10636_v11  ;;  %v7918_v15 = vpop.f32.mrf.mxu1  ;;  %v1970_v11 = vadd.f32 %v10300_v4, %v1698_v50  ;;  %v983_v4 = vadd.f32 %v10072_v55, %v12423_v58  ;;  %v1972_v42 = vadd.f32 %v10311_v61, %v1700_v12  ;;  %v2244_v55 = vadd.f32 %v10520_v41, %v10315_v57  ;;  %v12425_v58 = vld [vmem:[#allocation37_spill] sm:$0xff] }
 0x1c8   : > { %v10641_v7 = vpop.f32.mrf.mxu0  ;;  %v2778_v32 = vadd.f32 %v7918_v15, %v2506_v49  ;;  %v2510_v49 = vadd.f32 %v10501_v36, %v2242_v38  ;;  %v1704_v12 = vadd.f32 %v10327_v16, %v10002_v10  ;;  %v1003_v16 = vadd.f32 %v10114_v48, %v12425_v58 }
 0x1c9   : > { %12422 = vst [vmem:[#allocation120_spill] sm:$0xff] %v10641_v7  ;;  %v2618_v3 = vpop.f32.mrf.mxu1  ;;  %v2241_v50 = vadd.f32 %v10516_v29, %v1970_v11 }
 0x1ca   : > { %v7968_v25 = vpop.f32.mrf.mxu0  ;;  %v2777_v52 = vadd.f32 %v2618_v3, %v2505_v17  ;;  %v2243_v17 = vadd.f32 %v10532_v60, %v1972_v42 }
 0x1cb   : > { %v3049_v51 = vadd.f32 %v7968_v25, %v2778_v32  ;;  %v7921_v37 = vpop.f32.mrf.mxu1  ;;  %v2509_v61 = vadd.f32 %v10511_v43, %v2241_v50  ;;  %v1974_v32 = vadd.f32 %v10318_v14, %v1702_v44  ;;  %v2246_v43 = vadd.f32 %v10537_v24, %v10322_v20 }
 0x1cc   : > { %v2889_v7 = vpop.f32.mrf.mxu0  ;;  %v2780_v19 = vadd.f32 %v7921_v37, %v2508_v53  ;;  %v2511_v10 = vadd.f32 %v10525_v27, %v2243_v17  ;;  %v2248_v27 = vadd.f32 %v10551_v35, %v10329_v56 }
 0x1cd   : > { %v3088_v54 = vadd.f32 %v10661_v28, %v3049_v51  ;;  %v3048_v22 = vadd.f32 %v2889_v7, %v2777_v52  ;;  %v2628_v13 = vpop.f32.mrf.mxu1  ;;  %v10677_v7 = vadd.f32 %v10065_v9, %v983_v4  ;;  %v2512_v9 = vadd.f32 %v10518_v39, %v2244_v55 }
 0x1ce   : > { %v7971_v18 = vpop.f32.mrf.mxu0  ;;  %v2779_v25 = vadd.f32 %v2628_v13, %v2507_v31  ;;  %v2245_v39 = vadd.f32 %v10546_v63, %v1974_v32  ;;  %v2514_v48 = vadd.f32 %v10535_v5, %v2246_v43 }
 0x1cf   : > { %v3120_v29 = vmax.f32 %v3088_v54, 0.0  ;;  %v3087_v11 = vadd.f32 %v10661_v28, %v3048_v22  ;;  %v3051_v6 = vadd.f32 %v7971_v18, %v2780_v19  ;;  %v7924_v2 = vpop.f32.mrf.mxu1  ;;  %v12424_v18 = vld [vmem:[#allocation36_spill] sm:$0xff]  ;;  %v1976_v54 = vadd.f32 %v10325_v1, %v1704_v12 }
 0x1d0   : > { %v2899_v62 = vpop.f32.mrf.mxu0  ;;  %v2782_v41 = vadd.f32 %v7924_v2, %v2510_v49  ;;  %v993_v14 = vadd.f32 %v10093_v8, %v12424_v18  ;;  %v1706_v8 = vadd.f32 %v10340_v33, %v10022_v45  ;;  %v10707_v1 = vadd.f32 %v10107_v40, %v1003_v16  ;;  %v12426_v33 = vld [vmem:[#allocation85_spill] sm:$0xff]  ;;  %v12430_v40 = vld [vmem:[#allocation83_spill] sm:$0xff] }
 0x1d1   : > { %3207 = vst [vmem:[#allocation2 + $0x21] sm:$0xff] %v3120_v29  ;;  %v3119_v47 = vmax.f32 %v3087_v11, 0.0  ;;  %v3090_v36 = vadd.f32 %v10661_v28, %v3051_v6  ;;  %v3050_v57 = vadd.f32 %v2899_v62, %v2779_v25  ;;  %v2638_v38 = vpop.f32.mrf.mxu1  ;;  %v2513_v45 = vadd.f32 %v10539_v46, %v2245_v39  ;;  %v12427_v6 = vld [vmem:[#allocation52_spill] sm:$0xff]  ;;  %v12431_v2 = vld [vmem:[#allocation53_spill] sm:$0xff]  ;;  %v12432_v46 = vld [vmem:[#allocation87_spill] sm:$0xff] }
 0x1d2   : > { %v7974_v15 = vpop.f32.mrf.mxu0  ;;  %v2781_v51 = vadd.f32 %v2638_v38, %v2509_v61  ;;  %v10704_v49 = vadd.f32 %v10086_v30, %v993_v14  ;;  %v2247_v5 = vadd.f32 %v12426_v33, %v1976_v54  ;;  %v1978_v25 = vadd.f32 %v12427_v6, %v1706_v8  ;;  %v12428_v30 = vld [vmem:[#allocation47_spill] sm:$0xff]  ;;  %v12433_v38 = vld [vmem:[#allocation38_spill] sm:$0xff] }
 0x1d3   : > { %3206 = vst [vmem:[#allocation2 + $0x19] sm:$0xff] %v3119_v47  ;;  %v3122_v60 = vmax.f32 %v3090_v36, 0.0  ;;  %v3089_v3 = vadd.f32 %v10661_v28, %v3050_v57  ;;  %v3053_v53 = vadd.f32 %v7974_v15, %v2782_v41  ;;  %8049 = vmatprep.mubr.f32.mxu1 %v3119_v47  ;;  %v7927_v24 = vpop.f32.mrf.mxu1  ;;  %v12429_v15 = vld [vmem:[#allocation55_spill] sm:$0xff]  ;;  %v2516_v17 = vadd.f32 %v12430_v40, %v2248_v27  ;;  %v12440_v54 = vld [vmem:[#allocation86_spill] sm:$0xff] }
 0x1d4   : > { %v2909_v26 = vpop.f32.mrf.mxu0  ;;  %8050 = vmatmul.mubr.f32.gmra.mxu1 %v3120_v29  ;;  %v2784_v37 = vadd.f32 %v7927_v24, %v2512_v9  ;;  %v1708_v61 = vadd.f32 %v12429_v15, %v12428_v30  ;;  %v2250_v47 = vadd.f32 %v12432_v46, %v12431_v2  ;;  %v12442_v27 = vld [vmem:[#allocation91_spill] sm:$0xff]  ;;  %v12447_v46 = vld [vmem:[#allocation61_spill] sm:$0xff] }
 0x1d5   : > { %3209 = vst [vmem:[#allocation2 + $0x39] sm:$0xff] %v3122_v60  ;;  %v3121_v20 = vmax.f32 %v3089_v3, 0.0  ;;  %v3092_v4 = vadd.f32 %v10661_v28, %v3053_v53  ;;  %v3052_v50 = vadd.f32 %v2909_v26, %v2781_v51  ;;  %v2648_v63 = vpop.f32.mrf.mxu1  ;;  %v12435_v53 = vld [vmem:[#allocation84_spill] sm:$0xff] }
 0x1d6   : > { %v7977_v52 = vpop.f32.mrf.mxu0  ;;  %v2783_v42 = vadd.f32 %v2648_v63, %v2511_v10  ;;  %v2515_v51 = vadd.f32 %v12435_v53, %v2247_v5  ;;  %v2518_v8 = vadd.f32 %v12440_v54, %v2250_v47  ;;  %v1712_v47 = vadd.f32 %v12447_v46, %v10677_v7  ;;  %v12451_v7 = vld [vmem:[#allocation40_spill] sm:$0xff] }
 0x1d7   : > { %3208 = vst [vmem:[#allocation2 + $0x31] sm:$0xff] %v3121_v20  ;;  %v3124_v22 = vmax.f32 %v3092_v4, 0.0  ;;  %v3091_v19 = vadd.f32 %v10661_v28, %v3052_v50  ;;  %v3055_v62 = vadd.f32 %v7977_v52, %v2784_v37  ;;  %8052 = vmatprep.mubr.f32.mxu1 %v3121_v20  ;;  %v7930_v35 = vpop.f32.mrf.mxu1  ;;  %v12436_v52 = vld [vmem:[#allocation89_spill] sm:$0xff]  ;;  %v12437_v20 = vld [vmem:[#allocation54_spill] sm:$0xff]  ;;  %v12438_v50 = vld [vmem:[#allocation48_spill] sm:$0xff] }
 0x1d8   : > { %v2919_v31 = vpop.f32.mrf.mxu0  ;;  %8053 = vmatmul.mubr.f32.gmra.mxu1 %v3122_v60  ;;  %v2786_v29 = vadd.f32 %v7930_v35, %v2514_v48  ;;  %v12434_v60 = vld [vmem:[#allocation50_spill] sm:$0xff]  ;;  %v2249_v18 = vadd.f32 %v12436_v52, %v1978_v25  ;;  %v1980_v4 = vadd.f32 %v12437_v20, %v1708_v61  ;;  %v12441_v48 = vld [vmem:[#allocation56_spill] sm:$0xff]  ;;  %v12443_v35 = vld [vmem:[#allocation49_spill] sm:$0xff] }
 0x1d9   : > { %3211 = vst [vmem:[#allocation2 + $0x51] sm:$0xff] %v3124_v22  ;;  %v3123_v56 = vmax.f32 %v3091_v19, 0.0  ;;  %v3094_v55 = vadd.f32 %v10661_v28, %v3055_v62  ;;  %v3054_v13 = vadd.f32 %v2919_v31, %v2783_v42  ;;  %v2658_v36 = vpop.f32.mrf.mxu1  ;;  %v1013_v3 = vadd.f32 %v12434_v60, %v12433_v38  ;;  %v12439_v37 = vld [vmem:[#allocation58_spill] sm:$0xff] }
 0x1da   : > { %v7980_v44 = vpop.f32.mrf.mxu0  ;;  %v10718_v57 = vld [vmem:[#allocation2 + $0x18] sm:$0xff]  ;;  %v10720_v41 = vld [vmem:[#allocation2 + $0x20] sm:$0xff]  ;;  %v2785_v9 = vadd.f32 %v2658_v36, %v2513_v45  ;;  %v1710_v31 = vadd.f32 %v12439_v37, %v12438_v50  ;;  %v2252_v63 = vadd.f32 %v12442_v27, %v12441_v48  ;;  %v12448_v36 = vld [vmem:[#allocation90_spill] sm:$0xff] }
 0x1db   : > { %3210 = vst [vmem:[#allocation2 + $0x49] sm:$0xff] %v3123_v56  ;;  %v3126_v26 = vmax.f32 %v3094_v55, 0.0  ;;  %v3093_v32 = vadd.f32 %v10661_v28, %v3054_v13  ;;  %v3057_v12 = vadd.f32 %v7980_v44, %v2786_v29  ;;  %8129 = vmatprep.mubr.f32.mxu0 %v10718_v57  ;;  %8055 = vmatprep.mubr.f32.mxu1 %v3123_v56  ;;  %v7933_v14 = vpop.f32.mrf.mxu1  ;;  %v12444_v55 = vld [vmem:[#allocation88_spill] sm:$0xff]  ;;  %v12445_v29 = vld [vmem:[#allocation93_spill] sm:$0xff] }
 0x1dc   : > { %v2929_v11 = vpop.f32.mrf.mxu0  ;;  %8130 = vmatmul.mubr.f32.gmra.mxu0 %v10720_v41  ;;  %8056 = vmatmul.mubr.f32.gmra.mxu1 %v3124_v22  ;;  %v2788_v39 = vadd.f32 %v7933_v14, %v2516_v17  ;;  %v10743_v56 = vadd.f32 %v12443_v35, %v1013_v3  ;;  %v2517_v13 = vadd.f32 %v12444_v55, %v2249_v18  ;;  %v12446_v17 = vld [vmem:[#allocation57_spill] sm:$0xff]  ;;  %v12452_v14 = vld [vmem:[#allocation39_spill] sm:$0xff]  ;;  %v12456_v27 = vld [vmem:[#allocation64_spill] sm:$0xff] }
 0x1dd   : > { %3213 = vst [vmem:[#allocation2 + $0x69] sm:$0xff] %v3126_v26  ;;  %v3125_v58 = vmax.f32 %v3093_v32, 0.0  ;;  %v3096_v16 = vadd.f32 %v10661_v28, %v3057_v12  ;;  %v3056_v10 = vadd.f32 %v2929_v11, %v2785_v9  ;;  %v2668_v19 = vpop.f32.mrf.mxu1  ;;  %v2251_v11 = vadd.f32 %v12445_v29, %v1980_v4  ;;  %v12449_v12 = vld [vmem:[#allocation59_spill] sm:$0xff] }
 0x1de   : > { %v7983_v43 = vpop.f32.mrf.mxu0  ;;  %v10736_v62 = vld [vmem:[#allocation2 + $0x30] sm:$0xff]  ;;  %v10738_v22 = vld [vmem:[#allocation2 + $0x38] sm:$0xff]  ;;  %v2787_v33 = vadd.f32 %v2668_v19, %v2515_v51  ;;  %v1982_v2 = vadd.f32 %v12446_v17, %v1710_v31  ;;  %v2520_v32 = vadd.f32 %v12448_v36, %v2252_v63  ;;  %v1714_v63 = vadd.f32 %v12456_v27, %v10704_v49  ;;  %v12457_v19 = vld [vmem:[#allocation94_spill] sm:$0xff] }
 0x1df   : > { %3212 = vst [vmem:[#allocation2 + $0x61] sm:$0xff] %v3125_v58  ;;  %v3128_v42 = vmax.f32 %v3096_v16, 0.0  ;;  %v3095_v44 = vadd.f32 %v10661_v28, %v3056_v10  ;;  %v3059_v45 = vadd.f32 %v7983_v43, %v2788_v39  ;;  %8132 = vmatprep.mubr.f32.mxu0 %v10736_v62  ;;  %8058 = vmatprep.mubr.f32.mxu1 %v3125_v58  ;;  %v7936_v6 = vpop.f32.mrf.mxu1  ;;  %v12450_v9 = vld [vmem:[#allocation95_spill] sm:$0xff]  ;;  %v12453_v16 = vld [vmem:[#allocation92_spill] sm:$0xff]  ;;  %v12454_v39 = vld [vmem:[#allocation97_spill] sm:$0xff] }
 0x1e0   : > { %v2939_v24 = vpop.f32.mrf.mxu0  ;;  %8133 = vmatmul.mubr.f32.gmra.mxu0 %v10738_v22  ;;  %8059 = vmatmul.mubr.f32.gmra.mxu1 %v3126_v26  ;;  %v2790_v61 = vadd.f32 %v7936_v6, %v2518_v8  ;;  %v2254_v43 = vadd.f32 %v12450_v9, %v12449_v12  ;;  %v1023_v58 = vadd.f32 %v12452_v14, %v12451_v7  ;;  %v12455_v8 = vld [vmem:[#allocation60_spill] sm:$0xff]  ;;  %v12460_v49 = vld [vmem:[#allocation41_spill] sm:$0xff]  ;;  %v12463_v9 = vld [vmem:[#allocation63_spill] sm:$0xff] }
 0x1e1   : > { %3215 = vst [vmem:[#allocation2 + $0x81] sm:$0xff] %v3128_v42  ;;  %v3127_v25 = vmax.f32 %v3095_v44, 0.0  ;;  %v3098_v30 = vadd.f32 %v10661_v28, %v3059_v45  ;;  %v3058_v15 = vadd.f32 %v2939_v24, %v2787_v33  ;;  %v2678_v38 = vpop.f32.mrf.mxu1  ;;  %v2519_v10 = vadd.f32 %v12453_v16, %v2251_v11  ;;  %v12458_v45 = vld [vmem:[#allocation62_spill] sm:$0xff]  ;;  %v12459_v33 = vld [vmem:[#allocation99_spill] sm:$0xff] }
 0x1e2   : > { %v7986_v5 = vpop.f32.mrf.mxu0  ;;  %v10755_v60 = vld [vmem:[#allocation2 + $0x48] sm:$0xff]  ;;  %v10757_v26 = vld [vmem:[#allocation2 + $0x50] sm:$0xff]  ;;  %v2789_v52 = vadd.f32 %v2678_v38, %v2517_v13  ;;  %v2253_v24 = vadd.f32 %v12454_v39, %v1982_v2  ;;  %v1984_v48 = vadd.f32 %v12455_v8, %v1712_v47  ;;  %v2522_v44 = vadd.f32 %v12457_v19, %v2254_v43  ;;  %v12471_v8 = vld [vmem:[#allocation105_spill] sm:$0xff] }
 0x1e3   : > { %3214 = vst [vmem:[#allocation2 + $0x79] sm:$0xff] %v3127_v25  ;;  %v3130_v3 = vmax.f32 %v3098_v30, 0.0  ;;  %v3097_v53 = vadd.f32 %v10661_v28, %v3058_v15  ;;  %v3061_v51 = vadd.f32 %v7986_v5, %v2790_v61  ;;  %8135 = vmatprep.mubr.f32.mxu0 %v10755_v60  ;;  %8061 = vmatprep.mubr.f32.mxu1 %v3127_v25  ;;  %v7939_v20 = vpop.f32.mrf.mxu1  ;;  %v12461_v15 = vld [vmem:[#allocation96_spill] sm:$0xff]  ;;  %v12464_v38 = vld [vmem:[#allocation67_spill] sm:$0xff] }
 0x1e4   : > { %v2949_v40 = vpop.f32.mrf.mxu0  ;;  %8136 = vmatmul.mubr.f32.gmra.mxu0 %v10757_v26  ;;  %8062 = vmatmul.mubr.f32.gmra.mxu1 %v3128_v42  ;;  %v2792_v31 = vadd.f32 %v7939_v20, %v2520_v32  ;;  %v2256_v5 = vadd.f32 %v12459_v33, %v12458_v45  ;;  %v10780_v30 = vadd.f32 %v12460_v49, %v1023_v58  ;;  %v12467_v7 = vld [vmem:[#allocation103_spill] sm:$0xff]  ;;  %v12475_v49 = vld [vmem:[#allocation68_spill] sm:$0xff] }
 0x1e5   : > { %3217 = vst [vmem:[#allocation2 + $0x99] sm:$0xff] %v3130_v3  ;;  %v3129_v4 = vmax.f32 %v3097_v53, 0.0  ;;  %v3100_v50 = vadd.f32 %v10661_v28, %v3061_v51  ;;  %v3060_v37 = vadd.f32 %v2949_v40, %v2789_v52  ;;  %v2688_v35 = vpop.f32.mrf.mxu1  ;;  %v2521_v61 = vadd.f32 %v12461_v15, %v2253_v24  ;;  %v12462_v40 = vld [vmem:[#allocation101_spill] sm:$0xff]  ;;  %v12465_v51 = vld [vmem:[#allocation98_spill] sm:$0xff] }
 0x1e6   : > { %v7989_v18 = vpop.f32.mrf.mxu0  ;;  %v10773_v55 = vld [vmem:[#allocation2 + $0x60] sm:$0xff]  ;;  %v10775_v42 = vld [vmem:[#allocation2 + $0x68] sm:$0xff]  ;;  %v2791_v6 = vadd.f32 %v2688_v35, %v2519_v10  ;;  %v2255_v17 = vadd.f32 %v12462_v40, %v1984_v48  ;;  %v1986_v43 = vadd.f32 %v12463_v9, %v1714_v63  ;;  %v1716_v53 = vadd.f32 %v12464_v38, %v10707_v1  ;;  %v12468_v1 = vld [vmem:[#allocation44_spill] sm:$0xff] }
 0x1e7   : > { %3216 = vst [vmem:[#allocation2 + $0x91] sm:$0xff] %v3129_v4  ;;  %v3132_v13 = vmax.f32 %v3100_v50, 0.0  ;;  %v3099_v29 = vadd.f32 %v10661_v28, %v3060_v37  ;;  %v3063_v11 = vadd.f32 %v7989_v18, %v2792_v31  ;;  %8138 = vmatprep.mubr.f32.mxu0 %v10773_v55  ;;  %8064 = vmatprep.mubr.f32.mxu1 %v3129_v4  ;;  %v7942_v2 = vpop.f32.mrf.mxu1  ;;  %v12466_v18 = vld [vmem:[#allocation65_spill] sm:$0xff]  ;;  %v12469_v50 = vld [vmem:[#allocation42_spill] sm:$0xff]  ;;  %v12470_v31 = vld [vmem:[#allocation100_spill] sm:$0xff] }
 0x1e8   : > { %v2959_v54 = vpop.f32.mrf.mxu0  ;;  %8139 = vmatmul.mubr.f32.gmra.mxu0 %v10775_v42  ;;  %8065 = vmatmul.mubr.f32.gmra.mxu1 %v3130_v3  ;;  %v2794_v32 = vadd.f32 %v7942_v2, %v2522_v44  ;;  %v2524_v52 = vadd.f32 %v12465_v51, %v2256_v5  ;;  %v2258_v14 = vadd.f32 %v12467_v7, %v12466_v18  ;;  %v12472_v5 = vld [vmem:[#allocation66_spill] sm:$0xff] }
 0x1e9   : > { %3219 = vst [vmem:[#allocation2 + $0xb1] sm:$0xff] %v3132_v13  ;;  %v3131_v46 = vmax.f32 %v3099_v29, 0.0  ;;  %v3102_v47 = vadd.f32 %v10661_v28, %v3063_v11  ;;  %v3062_v36 = vadd.f32 %v2959_v54, %v2791_v6  ;;  %v2698_v58 = vpop.f32.mrf.mxu1  ;;  %v1033_v37 = vadd.f32 %v12469_v50, %v12468_v1  ;;  %v12473_v29 = vld [vmem:[#allocation70_spill] sm:$0xff]  ;;  %v12482_v1 = vld [vmem:[#allocation71_spill] sm:$0xff] }
 0x1ea   : > { %v7992_v25 = vpop.f32.mrf.mxu0  ;;  %v10792_v16 = vld [vmem:[#allocation2 + $0x78] sm:$0xff]  ;;  %v10794_v3 = vld [vmem:[#allocation2 + $0x80] sm:$0xff]  ;;  %v2793_v20 = vadd.f32 %v2698_v58, %v2521_v61  ;;  %v2523_v54 = vadd.f32 %v12470_v31, %v2255_v17  ;;  %v2257_v48 = vadd.f32 %v12471_v8, %v1986_v43  ;;  %v1988_v35 = vadd.f32 %v12472_v5, %v1716_v53  ;;  %v12474_v6 = vld [vmem:[#allocation102_spill] sm:$0xff] }
 0x1eb   : > { %3218 = vst [vmem:[#allocation2 + $0xa9] sm:$0xff] %v3131_v46  ;;  %v3134_v10 = vmax.f32 %v3102_v47, 0.0  ;;  %v3101_v39 = vadd.f32 %v10661_v28, %v3062_v36  ;;  %v3065_v24 = vadd.f32 %v7992_v25, %v2794_v32  ;;  %8141 = vmatprep.mubr.f32.mxu0 %v10792_v16  ;;  %8067 = vmatprep.mubr.f32.mxu1 %v3131_v46  ;;  %v7945_v27 = vpop.f32.mrf.mxu1  ;;  %v12483_v50 = vld [vmem:[#allocation110_spill] sm:$0xff] }
 0x1ec   : > { %v2969_v12 = vpop.f32.mrf.mxu0  ;;  %8142 = vmatmul.mubr.f32.gmra.mxu0 %v10794_v3  ;;  %8068 = vmatmul.mubr.f32.gmra.mxu1 %v3132_v13  ;;  %v2796_v45 = vadd.f32 %v7945_v27, %v2524_v52  ;;  %v1718_v11 = vadd.f32 %v12473_v29, %v10743_v56  ;;  %v2526_v25 = vadd.f32 %v12474_v6, %v2258_v14  ;;  %v12476_v56 = vld [vmem:[#allocation43_spill] sm:$0xff]  ;;  %v12479_v14 = vld [vmem:[#allocation69_spill] sm:$0xff] }
 0x1ed   : > { %3221 = vst [vmem:[#allocation2 + $0xc9] sm:$0xff] %v3134_v10  ;;  %v3133_v63 = vmax.f32 %v3101_v39, 0.0  ;;  %v3104_v19 = vadd.f32 %v10661_v28, %v3065_v24  ;;  %v3064_v44 = vadd.f32 %v2969_v12, %v2793_v20  ;;  %v2260_v15 = vadd.f32 %v10599_v0, %v12475_v49  ;;  %v2708_v61 = vpop.f32.mrf.mxu1  ;;  %v12477_v12 = vld [vmem:[#allocation104_spill] sm:$0xff]  ;;  %v12480_v39 = vld [vmem:[#allocation73_spill] sm:$0xff]  ;;  %v12481_v20 = vld [vmem:[#allocation106_spill] sm:$0xff] }
 0x1ee   : > { %v7995_v4 = vpop.f32.mrf.mxu0  ;;  %v10810_v40 = vld [vmem:[#allocation2 + $0x90] sm:$0xff]  ;;  %v10812_v13 = vld [vmem:[#allocation2 + $0x98] sm:$0xff]  ;;  %v2795_v47 = vadd.f32 %v2708_v61, %v2523_v54  ;;  %v1454_v32 = vadd.f32 %v12476_v56, %v1033_v37  ;;  %v2525_v9 = vadd.f32 %v12477_v12, %v2257_v48  ;;  %v1990_v58 = vadd.f32 %v12479_v14, %v1718_v11  ;;  %v12490_v56 = vld [vmem:[#allocation109_spill] sm:$0xff] }
 0x1ef   : > { %3220 = vst [vmem:[#allocation2 + $0xc1] sm:$0xff] %v3133_v63  ;;  %v3136_v17 = vmax.f32 %v3104_v19, 0.0  ;;  %v3103_v2 = vadd.f32 %v10661_v28, %v3064_v44  ;;  %v3067_v46 = vadd.f32 %v7995_v4, %v2796_v45  ;;  %8144 = vmatprep.mubr.f32.mxu0 %v10810_v40  ;;  %8070 = vmatprep.mubr.f32.mxu1 %v3133_v63  ;;  %v12478_v0 = vld [vmem:[#allocation108_spill] sm:$0xff]  ;;  %v7948_v38 = vpop.f32.mrf.mxu1  ;;  %v12485_v44 = vld [vmem:[#allocation51_spill] sm:$0xff] }
 0x1f0   : > { %v2979_v33 = vpop.f32.mrf.mxu0  ;;  %v2259_v43 = vadd.f32 %v12478_v0, %v1988_v35  ;;  %8145 = vmatmul.mubr.f32.gmra.mxu0 %v10812_v13  ;;  %8071 = vmatmul.mubr.f32.gmra.mxu1 %v3134_v10  ;;  %v2798_v18 = vadd.f32 %v7948_v38, %v2526_v25  ;;  %v1720_v24 = vadd.f32 %v12480_v39, %v10780_v30  ;;  %v12484_v30 = vld [vmem:[#allocation46_spill] sm:$0xff]  ;;  %v12487_v35 = vld [vmem:[#allocation112_spill] sm:$0xff]  ;;  %v12494_v39 = vld [vmem:[#allocation111_spill] sm:$0xff] }
 0x1f1   : > { %3223 = vst [vmem:[#allocation2 + $0xe1] sm:$0xff] %v3136_v17  ;;  %v3135_v53 = vmax.f32 %v3103_v2, 0.0  ;;  %v3106_v51 = vadd.f32 %v10661_v28, %v3067_v46  ;;  %v3066_v52 = vadd.f32 %v2979_v33, %v2795_v47  ;;  %v2528_v4 = vadd.f32 %v12481_v20, %v2260_v15  ;;  %v2718_v31 = vpop.f32.mrf.mxu1  ;;  %v12486_v33 = vld [vmem:[#allocation107_spill] sm:$0xff]  ;;  %v12488_v2 = vld [vmem:[#allocation72_spill] sm:$0xff]  ;;  %v12492_v0 = vld [vmem:[#allocation114_spill] sm:$0xff] }
 0x1f2   : > { %v7998_v36 = vpop.f32.mrf.mxu0  ;;  %v2262_v37 = vadd.f32 %v12483_v50, %v12482_v1  ;;  %v10827_v54 = vld [vmem:[#allocation2 + $0xa8] sm:$0xff]  ;;  %v10829_v10 = vld [vmem:[#allocation2 + $0xb0] sm:$0xff]  ;;  %v2797_v63 = vadd.f32 %v2718_v31, %v2525_v9  ;;  %v1043_v45 = vadd.f32 %v12485_v44, %v12484_v30  ;;  %v2527_v5 = vadd.f32 %v12486_v33, %v2259_v43  ;;  %v12489_v47 = vld [vmem:[#allocation76_spill] sm:$0xff] }
 0x1f3   : > { %3222 = vst [vmem:[#allocation2 + $0xd9] sm:$0xff] %v3135_v53  ;;  %v3138_v8 = vmax.f32 %v3106_v51, 0.0  ;;  %v3105_v48 = vadd.f32 %v10661_v28, %v3066_v52  ;;  %v3069_v27 = vadd.f32 %v7998_v36, %v2798_v18  ;;  %8147 = vmatprep.mubr.f32.mxu0 %v10827_v54  ;;  %8073 = vmatprep.mubr.f32.mxu1 %v3135_v53  ;;  %v7951_v11 = vpop.f32.mrf.mxu1  ;;  %v12491_v9 = vld [vmem:[#allocation74_spill] sm:$0xff]  ;;  %v12495_v20 = vld [vmem:[#allocation116_spill] sm:$0xff]  ;;  %v12497_v30 = vld [vmem:[#allocation79_spill] sm:$0xff] }
 0x1f4   : > { %v2989_v7 = vpop.f32.mrf.mxu0  ;;  %v2261_v29 = vadd.f32 %v12487_v35, %v1990_v58  ;;  %8148 = vmatmul.mubr.f32.gmra.mxu0 %v10829_v10  ;;  %8074 = vmatmul.mubr.f32.gmra.mxu1 %v3136_v17  ;;  %v2800_v15 = vadd.f32 %v7951_v11, %v2528_v4  ;;  %v1992_v46 = vadd.f32 %v12488_v2, %v1720_v24  ;;  %v12500_v2 = vld [vmem:[#allocation115_spill] sm:$0xff] }
 0x1f5   : > { %3225 = vst [vmem:[#allocation2 + $0xf9] sm:$0xff] %v3138_v8  ;;  %v3137_v6 = vmax.f32 %v3105_v48, 0.0  ;;  %v3108_v25 = vadd.f32 %v10661_v28, %v3069_v27  ;;  %v3068_v49 = vadd.f32 %v2989_v7, %v2797_v63  ;;  %v1722_v36 = vadd.f32 %v12489_v47, %v1454_v32  ;;  %v2728_v38 = vpop.f32.mrf.mxu1  ;;  %v12493_v32 = vld [vmem:[#allocation45_spill] sm:$0xff]  ;;  %v12496_v63 = vld [vmem:[#allocation75_spill] sm:$0xff] }
 0x1f6   : > { %v8001_v19 = vpop.f32.mrf.mxu0  ;;  %v2530_v12 = vadd.f32 %v12490_v56, %v2262_v37  ;;  %v2264_v43 = vadd.f32 %v12492_v0, %v12491_v9  ;;  %v10844_v53 = vld [vmem:[#allocation2 + $0xc0] sm:$0xff]  ;;  %v10846_v17 = vld [vmem:[#allocation2 + $0xc8] sm:$0xff]  ;;  %v2799_v7 = vadd.f32 %v2728_v38, %v2527_v5  ;;  %v1456_v58 = vadd.f32 %v12493_v32, %v1043_v45 }
 0x1f7   : > { %3224 = vst [vmem:[#allocation2 + $0xf1] sm:$0xff] %v3137_v6  ;;  %v3140_v51 = vmax.f32 %v3108_v25, 0.0  ;;  %v3107_v52 = vadd.f32 %v10661_v28, %v3068_v49  ;;  %v3071_v18 = vadd.f32 %v8001_v19, %v2800_v15  ;;  %8150 = vmatprep.mubr.f32.mxu0 %v10844_v53  ;;  %8076 = vmatprep.mubr.f32.mxu1 %v3137_v6  ;;  %v7954_v1 = vpop.f32.mrf.mxu1  ;;  %v12498_v45 = vld [vmem:[#allocation113_spill] sm:$0xff] }
 0x1f8   : > { %v2999_v61 = vpop.f32.mrf.mxu0  ;;  %v2529_v24 = vadd.f32 %v12494_v39, %v2261_v29  ;;  %v2263_v4 = vadd.f32 %v12495_v20, %v1992_v46  ;;  %8151 = vmatmul.mubr.f32.gmra.mxu0 %v10846_v17  ;;  %8077 = vmatmul.mubr.f32.gmra.mxu1 %v3138_v8  ;;  %v2802_v48 = vadd.f32 %v7954_v1, %v2530_v12  ;;  %v12499_v5 = vld [vmem:[#allocation77_spill] sm:$0xff]  ;;  %v12504_v1 = vld [vmem:[#allocation118_spill] sm:$0xff] }
 0x1f9   : > { %3227 = vst [vmem:[#allocation2 + $0x111] sm:$0xff] %v3140_v51  ;;  %v3139_v50 = vmax.f32 %v3107_v52, 0.0  ;;  %v3110_v37 = vadd.f32 %v10661_v28, %v3071_v18  ;;  %v3070_v31 = vadd.f32 %v2999_v61, %v2799_v7  ;;  %v1994_v19 = vadd.f32 %v12496_v63, %v1722_v36  ;;  %v2738_v29 = vpop.f32.mrf.mxu1  ;;  %v12502_v52 = vld [vmem:[#allocation117_spill] sm:$0xff]  ;;  %v12503_v7 = vld [vmem:[#allocation80_spill] sm:$0xff] }
 0x1fa   : > { %v8004_v14 = vpop.f32.mrf.mxu0  ;;  %v1724_v44 = vadd.f32 %v12497_v30, %v1456_v58  ;;  %v2532_v33 = vadd.f32 %v12498_v45, %v2264_v43  ;;  %v2266_v35 = vadd.f32 %v10625_v34, %v12499_v5  ;;  %v10860_v11 = vld [vmem:[#allocation2 + $0xd8] sm:$0xff]  ;;  %v10862_v8 = vld [vmem:[#allocation2 + $0xe0] sm:$0xff]  ;;  %v2801_v15 = vadd.f32 %v2738_v29, %v2529_v24  ;;  %v12501_v43 = vld [vmem:[#allocation78_spill] sm:$0xff] }
 0x1fb   : > { %3226 = vst [vmem:[#allocation2 + $0x109] sm:$0xff] %v3139_v50  ;;  %v3142_v6 = vmax.f32 %v3110_v37, 0.0  ;;  %v3109_v25 = vadd.f32 %v10661_v28, %v3070_v31  ;;  %v3073_v49 = vadd.f32 %v8004_v14, %v2802_v48  ;;  %8153 = vmatprep.mubr.f32.mxu0 %v10860_v11  ;;  %8079 = vmatprep.mubr.f32.mxu1 %v3139_v50  ;;  %v7957_v34 = vpop.f32.mrf.mxu1  ;;  %v12505_v30 = vld [vmem:[#allocation119_spill] sm:$0xff] }
 0x1fc   : > { %v3009_v27 = vpop.f32.mrf.mxu0  ;;  %v2531_v46 = vadd.f32 %v12500_v2, %v2263_v4  ;;  %v2265_v47 = vadd.f32 %v10629_v23, %v1994_v19  ;;  %8154 = vmatmul.mubr.f32.gmra.mxu0 %v10862_v8  ;;  %8080 = vmatmul.mubr.f32.gmra.mxu1 %v3140_v51  ;;  %v2804_v9 = vadd.f32 %v7957_v34, %v2532_v33 }
 0x1fd   : > { %3229 = vst [vmem:[#allocation2 + $0x129] sm:$0xff] %v3142_v6  ;;  %v3141_v36 = vmax.f32 %v3109_v25, 0.0  ;;  %v3112_v56 = vadd.f32 %v10661_v28, %v3073_v49  ;;  %v3072_v12 = vadd.f32 %v3009_v27, %v2801_v15  ;;  %v1996_v38 = vadd.f32 %v12501_v43, %v1724_v44  ;;  %v2748_v32 = vpop.f32.mrf.mxu1  ;;  %v12506_v49 = vld [vmem:[#allocation120_spill] sm:$0xff] }
 0x1fe   : > { %v8007_v61 = vpop.f32.mrf.mxu0  ;;  %v2534_v18 = vadd.f32 %v12502_v52, %v2266_v35  ;;  %v2268_v14 = vadd.f32 %v10638_v59, %v12503_v7  ;;  %v10874_v23 = vld [vmem:[#allocation2 + $0xf0] sm:$0xff]  ;;  %v10876_v58 = vld [vmem:[#allocation2 + $0xf8] sm:$0xff]  ;;  %v2803_v20 = vadd.f32 %v2748_v32, %v2531_v46  ;;  %v2533_v50 = vadd.f32 %v12504_v1, %v2265_v47 }
 0x1ff   : > { %3228 = vst [vmem:[#allocation2 + $0x121] sm:$0xff] %v3141_v36  ;;  %v3144_v51 = vmax.f32 %v3112_v56, 0.0  ;;  %v3111_v39 = vadd.f32 %v10661_v28, %v3072_v12  ;;  %v3075_v24 = vadd.f32 %v8007_v61, %v2804_v9  ;;  %8156 = vmatprep.mubr.f32.mxu0 %v10874_v23  ;;  %8082 = vmatprep.mubr.f32.mxu1 %v3141_v36  ;;  %v7960_v59 = vpop.f32.mrf.mxu1  ;;  %v3786_v1 = vld [vmem:[#allocation2 + $0xa] sm:$0xff] }
 0x200   : > { %v3019_v0 = vpop.f32.mrf.mxu0  ;;  %v2267_v37 = vadd.f32 %v10645_v21, %v1996_v38  ;;  %8157 = vmatmul.mubr.f32.gmra.mxu0 %v10876_v58  ;;  %8083 = vmatmul.mubr.f32.gmra.mxu1 %v3142_v6  ;;  %v2806_v63 = vadd.f32 %v7960_v59, %v2534_v18  ;;  %v2536_v44 = vadd.f32 %v12505_v30, %v2268_v14  ;;  %v10932_v59 = vld [vmem:[#allocation2 + $0x1a] sm:$0xff]  ;;  %v10948_v30 = vld [vmem:[#allocation2 + $0x32] sm:$0xff] }
 0x201   : > { %3231 = vst [vmem:[#allocation2 + $0x141] sm:$0xff] %v3144_v51  ;;  %v3143_v31 = vmax.f32 %v3111_v39, 0.0  ;;  %v3114_v48 = vadd.f32 %v10661_v28, %v3075_v24  ;;  %v3074_v27 = vadd.f32 %v3019_v0, %v2803_v20  ;;  %v2758_v45 = vpop.f32.mrf.mxu1  ;;  %v3785_v39 = vld [vmem:[#allocation2 + $0x2] sm:$0xff] }
 0x202   : > { %v8010_v4 = vpop.f32.mrf.mxu0  ;;  %v10885_v33 = vld [vmem:[#allocation2 + $0x108] sm:$0xff]  ;;  %v10887_v5 = vld [vmem:[#allocation2 + $0x110] sm:$0xff]  ;;  %v2805_v6 = vadd.f32 %v2758_v45, %v2533_v50  ;;  %v2535_v15 = vadd.f32 %v12506_v49, %v2267_v37 }
 0x203   : > { %3230 = vst [vmem:[#allocation2 + $0x139] sm:$0xff] %v3143_v31  ;;  %v3146_v21 = vmax.f32 %v3114_v48, 0.0  ;;  %v3113_v35 = vadd.f32 %v10661_v28, %v3074_v27  ;;  %v3077_v29 = vadd.f32 %v8010_v4, %v2806_v63  ;;  %8159 = vmatprep.mubr.f32.mxu0 %v10885_v33  ;;  %8085 = vmatprep.mubr.f32.mxu1 %v3143_v31  ;;  %v7963_v61 = vpop.f32.mrf.mxu1  ;;  %v12507_v31 = vld [vmem:[#allocation81_spill] sm:$0xff]  ;;  %v6713_v49 = vld [vmem:[%s12117_s3 + $0x2e8] sm:$0xff] }
 0x204   : > { %v3029_v19 = vpop.f32.mrf.mxu0  ;;  %8160 = vmatmul.mubr.f32.gmra.mxu0 %v10887_v5  ;;  %8086 = vmatmul.mubr.f32.gmra.mxu1 %v3144_v51  ;;  %v2808_v34 = vadd.f32 %v7963_v61, %v2536_v44  ;;  %v10941_v63 = vld [vmem:[#allocation2 + $0x22] sm:$0xff] }
 0x205   : > { %3233 = vst [vmem:[#allocation2 + $0x159] sm:$0xff] %v3146_v21  ;;  %v3145_v2 = vmax.f32 %v3113_v35, 0.0  ;;  %v3116_v46 = vadd.f32 %v10661_v28, %v3077_v29  ;;  %v3076_v47 = vadd.f32 %v3029_v19, %v2805_v6  ;;  %v2768_v36 = vpop.f32.mrf.mxu1  ;;  %v6697_v19 = vld [vmem:[%s12117_s3 + $0x268] sm:$0xff]  ;;  %v6714_v35 = vld [vmem:[%s12117_s3 + $0x2f0] sm:$0xff]  ;;  %v10957_v29 = vld [vmem:[#allocation2 + $0x3a] sm:$0xff] }
 0x206   : > { %v8013_v25 = vpop.f32.mrf.mxu0  ;;  %v10894_v56 = vld [vmem:[#allocation2 + $0x120] sm:$0xff]  ;;  %v10896_v9 = vld [vmem:[#allocation2 + $0x128] sm:$0xff]  ;;  %v2807_v38 = vadd.f32 %v2768_v36, %v2535_v15  ;;  %v6695_v15 = vld [vmem:[%s12117_s3 + $0x258] sm:$0xff] }
 0x207   : > { %3232 = vst [vmem:[#allocation2 + $0x151] sm:$0xff] %v3145_v2  ;;  %v3148_v0 = vmax.f32 %v3116_v46, 0.0  ;;  %v3115_v43 = vadd.f32 %v10661_v28, %v3076_v47  ;;  %v3079_v52 = vadd.f32 %v8013_v25, %v2808_v34  ;;  %8162 = vmatprep.mubr.f32.mxu0 %v10894_v56  ;;  %8088 = vmatprep.mubr.f32.mxu1 %v3145_v2  ;;  %v8048_v44 = vpop.f32.mrf.mxu1  ;;  %v12508_v6 = vld [vmem:[#allocation82_spill] sm:$0xff]  ;;  %v6694_v2 = vld [vmem:[%s12117_s3 + $0x250] sm:$0xff]  ;;  %v10997_v46 = vld [vmem:[#allocation2 + $0x7a] sm:$0xff] }
 0x208   : > { %v3039_v12 = vpop.f32.mrf.mxu0  ;;  %8163 = vmatmul.mubr.f32.gmra.mxu0 %v10896_v9  ;;  %8089 = vmatmul.mubr.f32.gmra.mxu1 %v3146_v21  ;;  %v10966_v25 = vld [vmem:[#allocation2 + $0x4a] sm:$0xff]  ;;  %v10983_v61 = vld [vmem:[#allocation2 + $0x62] sm:$0xff]  ;;  %v11011_v34 = vld [vmem:[#allocation2 + $0x92] sm:$0xff] }
 0x209   : > { %3235 = vst [vmem:[#allocation2 + $0x171] sm:$0xff] %v3148_v0  ;;  %v10901_v18 = vmax.f32 %v3115_v43, 0.0  ;;  %v10904_v7 = vadd.f32 %v10661_v28, %v3079_v52  ;;  %v3078_v14 = vadd.f32 %v3039_v12, %v2807_v38  ;;  %v6693_v47 = vld [vmem:[%s12117_s3 + $0x248] sm:$0xff]  ;;  %v6692_v36 = vld [vmem:[%s12117_s3 + $0x240] sm:$0xff]  ;;  %v6690_v38 = vld [vmem:[%s12117_s3 + $0x230] sm:$0xff] }
 0x20a   : > { %v10906_v32 = vld [vmem:[#allocation2 + $0x138] sm:$0xff]  ;;  %v10908_v51 = vld [vmem:[#allocation2 + $0x140] sm:$0xff]  ;;  %v11025_v12 = vld [vmem:[#allocation2 + $0xaa] sm:$0xff] }
 0x20b   : > { %3234 = vst [vmem:[#allocation2 + $0x169] sm:$0xff] %v10901_v18  ;;  %v3150_v24 = vmax.f32 %v10904_v7, 0.0  ;;  %v10913_v20 = vadd.f32 %v10661_v28, %v3078_v14  ;;  %8165 = vmatprep.mubr.f32.mxu0 %v10906_v32  ;;  %8091 = vmatprep.mubr.f32.mxu1 %v10901_v18  ;;  %v6698_v28 = vld [vmem:[%s12117_s3 + $0x270] sm:$0xff]  ;;  %v11039_v43 = vld [vmem:[#allocation2 + $0xc2] sm:$0xff]  ;;  %v11053_v52 = vld [vmem:[#allocation2 + $0xda] sm:$0xff] }
 0x20c   : > { %8166 = vmatmul.mubr.f32.gmra.mxu0 %v10908_v51  ;;  %8092 = vmatmul.mubr.f32.gmra.mxu1 %v3148_v0  ;;  %v6691_v0 = vld [vmem:[%s12117_s3 + $0x238] sm:$0xff]  ;;  %v6689_v14 = vld [vmem:[%s12117_s3 + $0x228] sm:$0xff] }
 0x20d   : > { %3237 = vst [vmem:[#allocation2 + $0x189] sm:$0xff] %v3150_v24  ;;  %v3149_v4 = vmax.f32 %v10913_v20, 0.0  ;;  %8206 = vmatprep.mubr.f32.mxu1 %v3785_v39  ;;  %v11067_v39 = vld [vmem:[#allocation2 + $0xf2] sm:$0xff]  ;;  %v5967_v20 = vld [vmem:[%s12119_s5] sm:$0xf] }
 0x20e   : > { %v10921_v50 = vld [vmem:[#allocation2 + $0x150] sm:$0xff]  ;;  %v10923_v37 = vld [vmem:[#allocation2 + $0x158] sm:$0xff] }
 0x20f   : > { %3236 = vst [vmem:[#allocation2 + $0x181] sm:$0xff] %v3149_v4  ;;  %8168 = vmatprep.mubr.f32.mxu0 %v10921_v50  ;;  %v5011_v7 = vld [vmem:[#allocation2 + $0x38] sm:$0xff] }
 0x210   : > { %8169 = vmatmul.mubr.f32.gmra.mxu0 %v10923_v37  ;;  %8207 = vmatmul.mubr.f32.vlgmr.msra.gmra.mxu1 %v3786_v1  ;;  %v6688_v1 = vld [vmem:[%s12117_s3 + $0x220] sm:$0xff] }
 0x211   : > { %8335 = vmatpush3.msra.mxu1 %v12507_v31  ;;  %8209 = vmatprep.mubr.f32.mxu1 %v10932_v59  ;;  %v6687_v31 = vld [vmem:[%s12117_s3 + $0x218] sm:$0xff] }
 0x212   : > { %v10936_v48 = vld [vmem:[#allocation2 + $0x168] sm:$0xff]  ;;  %v10938_v27 = vld [vmem:[#allocation2 + $0x170] sm:$0xff]  ;;  %8336 = vmatprep.subr.mxu1 %v6698_v28  ;;  %v8128_v45 = vpop.f32.mrf.mxu0 }
 0x213   : > { %8171 = vmatprep.mubr.f32.mxu0 %v10936_v48  ;;  %8337 = vmatpush3.msra.mxu1 %v6698_v28  ;;  %v10952_v21 = vadd.f32 %v8128_v45, %v8048_v44  ;;  %v11081_v28 = vld [vmem:[#allocation2 + $0x10a] sm:$0xff]  ;;  %v11109_v45 = vld [vmem:[#allocation2 + $0x13a] sm:$0xff] }
 0x214   : > { %8172 = vmatmul.mubr.f32.gmra.mxu0 %v10938_v27  ;;  %8210 = vmatmul.mubr.f32.gmra.mxu1 %v10941_v63  ;;  %v6686_v44 = vld [vmem:[%s12117_s3 + $0x210] sm:$0xff] }
 0x215   : > { %8286 = vmatprep.mubr.f32.mxu0 %v10718_v57  ;;  %8212 = vmatprep.mubr.f32.mxu1 %v10948_v30  ;;  %v6696_v57 = vld [vmem:[%s12117_s3 + $0x260] sm:$0xff] }
 0x216   : > { %8338 = vmatprep.subr.mxu1 %v6697_v19 }
 0x217   : > { %8339 = vmatpush3.msra.mxu1 %v6697_v19  ;;  %v11095_v19 = vld [vmem:[#allocation2 + $0x122] sm:$0xff] }
 0x218   : > { %8287 = vmatmul.mubr.f32.vlgmr.msra.gmra.mxu0 %v10720_v41  ;;  %8213 = vmatmul.mubr.f32.gmra.mxu1 %v10957_v29  ;;  %v6712_v41 = vld [vmem:[%s12117_s3 + $0x2e0] sm:$0xff] }
 0x219   : > { %8289 = vmatprep.mubr.f32.mxu0 %v10736_v62  ;;  %8415 = vmatpush3.msra.mxu0 %v12508_v6  ;;  %v10977_v62 = vld [vmem:[#allocation2 + $0x52] sm:$0xff]  ;;  %v6684_v6 = vld [vmem:[%s12117_s3 + $0x200] sm:$0xff] }
 0x21a   : > { %8416 = vmatprep.subr.mxu0 %v6714_v35  ;;  %8215 = vmatprep.mubr.f32.mxu1 %v10966_v25 }
 0x21b   : > { %8417 = vmatpush3.msra.mxu0 %v6714_v35  ;;  %8340 = vmatprep.subr.mxu1 %v6696_v57  ;;  %v6685_v35 = vld [vmem:[%s12117_s3 + $0x208] sm:$0xff] }
 0x21c   : > { %8290 = vmatmul.mubr.f32.gmra.mxu0 %v10738_v22  ;;  %8418 = vmatprep.subr.mxu0 %v6713_v49  ;;  %v6711_v22 = vld [vmem:[%s12117_s3 + $0x2d8] sm:$0xff] }
 0x21d   : > { %8292 = vmatprep.mubr.f32.mxu0 %v10755_v60  ;;  %8419 = vmatpush3.msra.mxu0 %v6713_v49  ;;  %v10991_v60 = vld [vmem:[#allocation2 + $0x6a] sm:$0xff] }
 0x21e   : > { %8216 = vmatmul.mubr.f32.gmra.mxu1 %v10977_v62  ;;  %8420 = vmatprep.subr.mxu0 %v6712_v41  ;;  %v11137_v49 = vld [vmem:[#allocation2 + $0x16a] sm:$0xff] }
 0x21f   : > { %8341 = vmatpush3.msra.mxu1 %v6696_v57  ;;  %8218 = vmatprep.mubr.f32.mxu1 %v10983_v61  ;;  %v11123_v57 = vld [vmem:[#allocation2 + $0x152] sm:$0xff] }
 0x220   : > { %8293 = vmatmul.mubr.f32.gmra.mxu0 %v10757_v26  ;;  %8342 = vmatprep.subr.mxu1 %v6695_v15  ;;  %v6710_v26 = vld [vmem:[%s12117_s3 + $0x2d0] sm:$0xff] }
 0x221   : > { %8295 = vmatprep.mubr.f32.mxu0 %v10773_v55  ;;  %8421 = vmatpush3.msra.mxu0 %v6712_v41  ;;  %v11005_v55 = vld [vmem:[#allocation2 + $0x82] sm:$0xff]  ;;  %v6731_v41 = vld [vmem:[%s12117_s3 + $0x378] sm:$0xff] }
 0x222   : > { %8219 = vmatmul.mubr.f32.gmra.mxu1 %v10991_v60  ;;  %8422 = vmatprep.subr.mxu0 %v6711_v22 }
 0x223   : > { %8343 = vmatpush3.msra.mxu1 %v6695_v15  ;;  %8221 = vmatprep.mubr.f32.mxu1 %v10997_v46  ;;  %v4397_v15 = vld [vmem:[#allocation2 + $0x19] sm:$0xff] }
 0x224   : > { %8296 = vmatmul.mubr.f32.gmra.mxu0 %v10775_v42  ;;  %8344 = vmatprep.subr.mxu1 %v6694_v2  ;;  %v6709_v42 = vld [vmem:[%s12117_s3 + $0x2c8] sm:$0xff] }
 0x225   : > { %8298 = vmatprep.mubr.f32.mxu0 %v10792_v16  ;;  %8423 = vmatpush3.msra.mxu0 %v6711_v22  ;;  %v11019_v16 = vld [vmem:[#allocation2 + $0x9a] sm:$0xff] }
 0x226   : > { %8222 = vmatmul.mubr.f32.gmra.mxu1 %v11005_v55  ;;  %8424 = vmatprep.subr.mxu0 %v6710_v26  ;;  %v4398_v22 = vld [vmem:[#allocation2 + $0x21] sm:$0xff] }
 0x227   : > { %8345 = vmatpush3.msra.mxu1 %v6694_v2  ;;  %8224 = vmatprep.mubr.f32.mxu1 %v11011_v34  ;;  %v6730_v2 = vld [vmem:[%s12117_s3 + $0x370] sm:$0xff] }
 0x228   : > { %8299 = vmatmul.mubr.f32.gmra.mxu0 %v10794_v3  ;;  %8346 = vmatprep.subr.mxu1 %v6693_v47  ;;  %v6708_v3 = vld [vmem:[%s12117_s3 + $0x2c0] sm:$0xff] }
 0x229   : > { %8301 = vmatprep.mubr.f32.mxu0 %v10810_v40  ;;  %8425 = vmatpush3.msra.mxu0 %v6710_v26  ;;  %v11033_v40 = vld [vmem:[#allocation2 + $0xb2] sm:$0xff] }
 0x22a   : > { %8225 = vmatmul.mubr.f32.gmra.mxu1 %v11019_v16  ;;  %8426 = vmatprep.subr.mxu0 %v6709_v42  ;;  %v11161_v26 = vld [vmem:[#allocation2 + $0x31] sm:$0xff] }
 0x22b   : > { %8347 = vmatpush3.msra.mxu1 %v6693_v47  ;;  %8227 = vmatprep.mubr.f32.mxu1 %v11025_v12  ;;  %v11163_v47 = vld [vmem:[#allocation2 + $0x188] sm:$0xff] }
 0x22c   : > { %8302 = vmatmul.mubr.f32.gmra.mxu0 %v10812_v13  ;;  %8348 = vmatprep.subr.mxu1 %v6692_v36  ;;  %v6707_v13 = vld [vmem:[%s12117_s3 + $0x2b8] sm:$0xff] }
 0x22d   : > { %8304 = vmatprep.mubr.f32.mxu0 %v10827_v54  ;;  %8427 = vmatpush3.msra.mxu0 %v6709_v42  ;;  %v11047_v54 = vld [vmem:[#allocation2 + $0xca] sm:$0xff]  ;;  %v11171_v42 = vld [vmem:[#allocation2 + $0x39] sm:$0xff] }
 0x22e   : > { %8228 = vmatmul.mubr.f32.gmra.mxu1 %v11033_v40  ;;  %8428 = vmatprep.subr.mxu0 %v6708_v3 }
 0x22f   : > { %8349 = vmatpush3.msra.mxu1 %v6692_v36  ;;  %8230 = vmatprep.mubr.f32.mxu1 %v11039_v43  ;;  %v6728_v36 = vld [vmem:[%s12117_s3 + $0x360] sm:$0xff] }
 0x230   : > { %8305 = vmatmul.mubr.f32.gmra.mxu0 %v10829_v10  ;;  %8350 = vmatprep.subr.mxu1 %v6691_v0  ;;  %v6706_v10 = vld [vmem:[%s12117_s3 + $0x2b0] sm:$0xff] }
 0x231   : > { %8307 = vmatprep.mubr.f32.mxu0 %v10844_v53  ;;  %8429 = vmatpush3.msra.mxu0 %v6708_v3  ;;  %v11061_v53 = vld [vmem:[#allocation2 + $0xe2] sm:$0xff] }
 0x232   : > { %8231 = vmatmul.mubr.f32.gmra.mxu1 %v11047_v54  ;;  %8430 = vmatprep.subr.mxu0 %v6707_v13  ;;  %v11177_v3 = vld [vmem:[#allocation2 + $0x49] sm:$0xff] }
 0x233   : > { %8351 = vmatpush3.msra.mxu1 %v6691_v0  ;;  %8233 = vmatprep.mubr.f32.mxu1 %v11053_v52  ;;  %v6746_v0 = vld [vmem:[%s12117_s3 + $0x3f0] sm:$0xff] }
 0x234   : > { %8308 = vmatmul.mubr.f32.gmra.mxu0 %v10846_v17  ;;  %8352 = vmatprep.subr.mxu1 %v6690_v38  ;;  %v6705_v17 = vld [vmem:[%s12117_s3 + $0x2a8] sm:$0xff] }
 0x235   : > { %8310 = vmatprep.mubr.f32.mxu0 %v10860_v11  ;;  %8431 = vmatpush3.msra.mxu0 %v6707_v13  ;;  %v11075_v11 = vld [vmem:[#allocation2 + $0xfa] sm:$0xff]  ;;  %v6745_v13 = vld [vmem:[%s12117_s3 + $0x3e8] sm:$0xff] }
 0x236   : > { %8234 = vmatmul.mubr.f32.gmra.mxu1 %v11061_v53  ;;  %8432 = vmatprep.subr.mxu0 %v6706_v10 }
 0x237   : > { %8353 = vmatpush3.msra.mxu1 %v6690_v38  ;;  %8236 = vmatprep.mubr.f32.mxu1 %v11067_v39  ;;  %v11191_v38 = vld [vmem:[#allocation2 + $0x61] sm:$0xff] }
 0x238   : > { %8311 = vmatmul.mubr.f32.gmra.mxu0 %v10862_v8  ;;  %8354 = vmatprep.subr.mxu1 %v6689_v14  ;;  %v6704_v8 = vld [vmem:[%s12117_s3 + $0x2a0] sm:$0xff] }
 0x239   : > { %8313 = vmatprep.mubr.f32.mxu0 %v10874_v23  ;;  %8433 = vmatpush3.msra.mxu0 %v6706_v10  ;;  %v11089_v23 = vld [vmem:[#allocation2 + $0x112] sm:$0xff] }
 0x23a   : > { %8237 = vmatmul.mubr.f32.gmra.mxu1 %v11075_v11  ;;  %8434 = vmatprep.subr.mxu0 %v6705_v17  ;;  %v6727_v10 = vld [vmem:[%s12117_s3 + $0x358] sm:$0xff] }
 0x23b   : > { %8355 = vmatpush3.msra.mxu1 %v6689_v14  ;;  %8239 = vmatprep.mubr.f32.mxu1 %v11081_v28  ;;  %v11205_v14 = vld [vmem:[#allocation2 + $0x79] sm:$0xff] }
 0x23c   : > { %8314 = vmatmul.mubr.f32.gmra.mxu0 %v10876_v58  ;;  %8356 = vmatprep.subr.mxu1 %v6688_v1  ;;  %v6703_v58 = vld [vmem:[%s12117_s3 + $0x298] sm:$0xff] }
 0x23d   : > { %8316 = vmatprep.mubr.f32.mxu0 %v10885_v33  ;;  %8435 = vmatpush3.msra.mxu0 %v6705_v17  ;;  %v11103_v33 = vld [vmem:[#allocation2 + $0x12a] sm:$0xff] }
 0x23e   : > { %8240 = vmatmul.mubr.f32.gmra.mxu1 %v11089_v23  ;;  %8436 = vmatprep.subr.mxu0 %v6704_v8  ;;  %v6726_v17 = vld [vmem:[%s12117_s3 + $0x350] sm:$0xff] }
 0x23f   : > { %8357 = vmatpush3.msra.mxu1 %v6688_v1  ;;  %8242 = vmatprep.mubr.f32.mxu1 %v11095_v19  ;;  %v11219_v1 = vld [vmem:[#allocation2 + $0x91] sm:$0xff] }
 0x240   : > { %8317 = vmatmul.mubr.f32.gmra.mxu0 %v10887_v5  ;;  %8358 = vmatprep.subr.mxu1 %v6687_v31  ;;  %v6702_v5 = vld [vmem:[%s12117_s3 + $0x290] sm:$0xff] }
 0x241   : > { %8319 = vmatprep.mubr.f32.mxu0 %v10894_v56  ;;  %8437 = vmatpush3.msra.mxu0 %v6704_v8  ;;  %v11117_v56 = vld [vmem:[#allocation2 + $0x142] sm:$0xff] }
 0x242   : > { %8243 = vmatmul.mubr.f32.gmra.mxu1 %v11103_v33  ;;  %8438 = vmatprep.subr.mxu0 %v6703_v58  ;;  %v6725_v8 = vld [vmem:[%s12117_s3 + $0x348] sm:$0xff] }
 0x243   : > { %8359 = vmatpush3.msra.mxu1 %v6687_v31  ;;  %8245 = vmatprep.mubr.f32.mxu1 %v11109_v45  ;;  %v11233_v31 = vld [vmem:[#allocation2 + $0xa9] sm:$0xff] }
 0x244   : > { %8320 = vmatmul.mubr.f32.gmra.mxu0 %v10896_v9  ;;  %8360 = vmatprep.subr.mxu1 %v6686_v44  ;;  %v6701_v9 = vld [vmem:[%s12117_s3 + $0x288] sm:$0xff] }
 0x245   : > { %8322 = vmatprep.mubr.f32.mxu0 %v10906_v32  ;;  %8439 = vmatpush3.msra.mxu0 %v6703_v58  ;;  %v11131_v32 = vld [vmem:[#allocation2 + $0x15a] sm:$0xff] }
 0x246   : > { %8246 = vmatmul.mubr.f32.gmra.mxu1 %v11117_v56  ;;  %8440 = vmatprep.subr.mxu0 %v6702_v5  ;;  %v6724_v58 = vld [vmem:[%s12117_s3 + $0x340] sm:$0xff] }
 0x247   : > { %8361 = vmatpush3.msra.mxu1 %v6686_v44  ;;  %8248 = vmatprep.mubr.f32.mxu1 %v11123_v57  ;;  %v11247_v44 = vld [vmem:[#allocation2 + $0xc1] sm:$0xff] }
 0x248   : > { %8323 = vmatmul.mubr.f32.gmra.mxu0 %v10908_v51  ;;  %8362 = vmatprep.subr.mxu1 %v6685_v35  ;;  %v6700_v51 = vld [vmem:[%s12117_s3 + $0x280] sm:$0xff] }
 0x249   : > { %8325 = vmatprep.mubr.f32.mxu0 %v10921_v50  ;;  %8441 = vmatpush3.msra.mxu0 %v6702_v5  ;;  %v11145_v50 = vld [vmem:[#allocation2 + $0x172] sm:$0xff] }
 0x24a   : > { %8249 = vmatmul.mubr.f32.gmra.mxu1 %v11131_v32  ;;  %8442 = vmatprep.subr.mxu0 %v6701_v9  ;;  %v6723_v5 = vld [vmem:[%s12117_s3 + $0x338] sm:$0xff] }
 0x24b   : > { %8363 = vmatpush3.msra.mxu1 %v6685_v35  ;;  %8251 = vmatprep.mubr.f32.mxu1 %v11137_v49  ;;  %v11261_v35 = vld [vmem:[#allocation2 + $0xd9] sm:$0xff] }
 0x24c   : > { %8326 = vmatmul.mubr.f32.gmra.mxu0 %v10923_v37  ;;  %8364 = vmatprep.subr.mxu1 %v6684_v6  ;;  %v6747_v37 = vld [vmem:[%s12117_s3 + $0x3f8] sm:$0xff] }
 0x24d   : > { %8328 = vmatprep.mubr.f32.mxu0 %v10936_v48  ;;  %8443 = vmatpush3.msra.mxu0 %v6701_v9  ;;  %v11155_v48 = vld [vmem:[#allocation2 + $0x180] sm:$0xff]  ;;  %v6722_v9 = vld [vmem:[%s12117_s3 + $0x330] sm:$0xff] }
 0x24e   : > { %8252 = vmatmul.mubr.f32.gmra.mxu1 %v11145_v50  ;;  %8444 = vmatprep.subr.mxu0 %v6700_v51 }
 0x24f   : > { %8365 = vmatpush3.msra.mxu1 %v6684_v6  ;;  %8366 = vmatprep.mubr.f32.mxu1 %v4397_v15  ;;  %v11275_v6 = vld [vmem:[#allocation2 + $0xf1] sm:$0xff]  ;;  %v6720_v15 = vld [vmem:[%s12117_s3 + $0x320] sm:$0xff] }
 0x250   : > { %8329 = vmatmul.mubr.f32.gmra.mxu0 %v10938_v27  ;;  %8494 = vmatprep.subr.mxu1 %v6731_v41  ;;  %v6729_v27 = vld [vmem:[%s12117_s3 + $0x368] sm:$0xff] }
 0x251   : > { %8331 = vmatprep.mubr.f32.mxu0 %v11155_v48  ;;  %8445 = vmatpush3.msra.mxu0 %v6700_v51  ;;  %v6721_v51 = vld [vmem:[%s12117_s3 + $0x328] sm:$0xff] }
 0x252   : > { %8367 = vmatmul.mubr.f32.vlgmr.msra.gmra.mxu1 %v4398_v22  ;;  %8574 = vmatprep.subr.mxu0 %v6747_v37  ;;  %v6719_v22 = vld [vmem:[%s12117_s3 + $0x318] sm:$0xff] }
 0x253   : > { %8495 = vmatpush3.msra.mxu1 %v6731_v41  ;;  %8369 = vmatprep.mubr.f32.mxu1 %v11161_v26  ;;  %v11289_v41 = vld [vmem:[#allocation2 + $0x109] sm:$0xff] }
 0x254   : > { %8332 = vmatmul.mubr.f32.gmra.mxu0 %v11163_v47  ;;  %8496 = vmatprep.subr.mxu1 %v6730_v2 }
 0x255   : > { %8446 = vmatprep.mubr.f32.mxu0 %v10932_v59  ;;  %8497 = vmatpush3.msra.mxu1 %v6730_v2  ;;  %v11185_v59 = vld [vmem:[#allocation2 + $0x51] sm:$0xff]  ;;  %v11317_v2 = vld [vmem:[#allocation2 + $0x139] sm:$0xff] }
 0x256   : > { %8370 = vmatmul.mubr.f32.gmra.mxu1 %v11171_v42  ;;  %8498 = vmatprep.subr.mxu1 %v6729_v27 }
 0x257   : > { %8372 = vmatprep.mubr.f32.mxu1 %v11177_v3  ;;  %8499 = vmatpush3.msra.mxu1 %v6729_v27  ;;  %v6718_v27 = vld [vmem:[%s12117_s3 + $0x310] sm:$0xff] }
 0x258   : > { %8447 = vmatmul.mubr.f32.vlgmr.msra.gmra.mxu0 %v10941_v63  ;;  %8500 = vmatprep.subr.mxu1 %v6728_v36  ;;  %v6744_v63 = vld [vmem:[%s12117_s3 + $0x3e0] sm:$0xff] }
 0x259   : > { %8449 = vmatprep.mubr.f32.mxu0 %v10948_v30  ;;  %8575 = vmatpush3.msra.mxu0 %v6747_v37  ;;  %v11199_v30 = vld [vmem:[#allocation2 + $0x69] sm:$0xff]  ;;  %v11303_v37 = vld [vmem:[#allocation2 + $0x121] sm:$0xff] }
 0x25a   : > { %8576 = vmatprep.subr.mxu0 %v6746_v0  ;;  %8373 = vmatmul.mubr.f32.gmra.mxu1 %v11185_v59 }
 0x25b   : > { %8577 = vmatpush3.msra.mxu0 %v6746_v0  ;;  %8375 = vmatprep.mubr.f32.mxu1 %v11191_v38  ;;  %v6717_v0 = vld [vmem:[%s12117_s3 + $0x308] sm:$0xff] }
 0x25c   : > { %8450 = vmatmul.mubr.f32.gmra.mxu0 %v10957_v29  ;;  %8578 = vmatprep.subr.mxu0 %v6745_v13  ;;  %v6743_v29 = vld [vmem:[%s12117_s3 + $0x3d8] sm:$0xff] }
 0x25d   : > { %8452 = vmatprep.mubr.f32.mxu0 %v10966_v25  ;;  %8579 = vmatpush3.msra.mxu0 %v6745_v13  ;;  %v11213_v25 = vld [vmem:[#allocation2 + $0x81] sm:$0xff] }
 0x25e   : > { %8376 = vmatmul.mubr.f32.gmra.mxu1 %v11199_v30  ;;  %8580 = vmatprep.subr.mxu0 %v6744_v63  ;;  %v6716_v13 = vld [vmem:[%s12117_s3 + $0x300] sm:$0xff] }
 0x25f   : > { %8501 = vmatpush3.msra.mxu1 %v6728_v36  ;;  %8378 = vmatprep.mubr.f32.mxu1 %v11205_v14  ;;  %v11331_v36 = vld [vmem:[#allocation2 + $0x151] sm:$0xff] }
 0x260   : > { %8453 = vmatmul.mubr.f32.gmra.mxu0 %v10977_v62  ;;  %8502 = vmatprep.subr.mxu1 %v6727_v10  ;;  %v6742_v62 = vld [vmem:[%s12117_s3 + $0x3d0] sm:$0xff] }
 0x261   : > { %8455 = vmatprep.mubr.f32.mxu0 %v10983_v61  ;;  %8581 = vmatpush3.msra.mxu0 %v6744_v63  ;;  %v11227_v61 = vld [vmem:[#allocation2 + $0x99] sm:$0xff]  ;;  %v11382_v63 = vld [vmem:[#allocation2 + $0x18a] sm:$0xff] }
 0x262   : > { %8379 = vmatmul.mubr.f32.gmra.mxu1 %v11213_v25  ;;  %8582 = vmatprep.subr.mxu0 %v6743_v29 }
 0x263   : > { %8503 = vmatpush3.msra.mxu1 %v6727_v10  ;;  %8381 = vmatprep.mubr.f32.mxu1 %v11219_v1 }
 0x264   : > { %8456 = vmatmul.mubr.f32.gmra.mxu0 %v10991_v60  ;;  %8504 = vmatprep.subr.mxu1 %v6726_v17  ;;  %v6741_v60 = vld [vmem:[%s12117_s3 + $0x3c8] sm:$0xff] }
 0x265   : > { %8458 = vmatprep.mubr.f32.mxu0 %v10997_v46  ;;  %8583 = vmatpush3.msra.mxu0 %v6743_v29  ;;  %v11241_v46 = vld [vmem:[#allocation2 + $0xb1] sm:$0xff] }
 0x266   : > { %8382 = vmatmul.mubr.f32.gmra.mxu1 %v11227_v61  ;;  %8584 = vmatprep.subr.mxu0 %v6742_v62  ;;  %v5013_v29 = vld [vmem:[#allocation2 + $0x50] sm:$0xff] }
 0x267   : > { %8505 = vmatpush3.msra.mxu1 %v6726_v17  ;;  %8384 = vmatprep.mubr.f32.mxu1 %v11233_v31  ;;  %v6760_v17 = vld [vmem:[%s12117_s3 + $0x460] sm:$0xff] }
 0x268   : > { %8459 = vmatmul.mubr.f32.gmra.mxu0 %v11005_v55  ;;  %8506 = vmatprep.subr.mxu1 %v6725_v8  ;;  %v6740_v55 = vld [vmem:[%s12117_s3 + $0x3c0] sm:$0xff] }
 0x269   : > { %8461 = vmatprep.mubr.f32.mxu0 %v11011_v34  ;;  %8585 = vmatpush3.msra.mxu0 %v6742_v62  ;;  %v11255_v34 = vld [vmem:[#allocation2 + $0xc9] sm:$0xff]  ;;  %v5014_v62 = vld [vmem:[#allocation2 + $0x60] sm:$0xff] }
 0x26a   : > { %8385 = vmatmul.mubr.f32.gmra.mxu1 %v11241_v46  ;;  %8586 = vmatprep.subr.mxu0 %v6741_v60 }
 0x26b   : > { %8507 = vmatpush3.msra.mxu1 %v6725_v8  ;;  %8387 = vmatprep.mubr.f32.mxu1 %v11247_v44 }
 0x26c   : > { %8462 = vmatmul.mubr.f32.gmra.mxu0 %v11019_v16  ;;  %8508 = vmatprep.subr.mxu1 %v6724_v58  ;;  %v6739_v16 = vld [vmem:[%s12117_s3 + $0x3b8] sm:$0xff] }
 0x26d   : > { %8464 = vmatprep.mubr.f32.mxu0 %v11025_v12  ;;  %8587 = vmatpush3.msra.mxu0 %v6741_v60  ;;  %v11269_v12 = vld [vmem:[#allocation2 + $0xe1] sm:$0xff] }
 0x26e   : > { %8388 = vmatmul.mubr.f32.gmra.mxu1 %v11255_v34  ;;  %8588 = vmatprep.subr.mxu0 %v6740_v55 }
 0x26f   : > { %8509 = vmatpush3.msra.mxu1 %v6724_v58  ;;  %8390 = vmatprep.mubr.f32.mxu1 %v11261_v35  ;;  %v6759_v58 = vld [vmem:[%s12117_s3 + $0x458] sm:$0xff] }
 0x270   : > { %8465 = vmatmul.mubr.f32.gmra.mxu0 %v11033_v40  ;;  %8510 = vmatprep.subr.mxu1 %v6723_v5  ;;  %v6738_v40 = vld [vmem:[%s12117_s3 + $0x3b0] sm:$0xff] }
 0x271   : > { %8467 = vmatprep.mubr.f32.mxu0 %v11039_v43  ;;  %8589 = vmatpush3.msra.mxu0 %v6740_v55  ;;  %v11283_v43 = vld [vmem:[#allocation2 + $0xf9] sm:$0xff]  ;;  %v11398_v55 = vpop.f32.mrf.mxu0 }
 0x272   : > { %8391 = vmatmul.mubr.f32.gmra.mxu1 %v11269_v12  ;;  %8590 = vmatprep.subr.mxu0 %v6739_v16 }
 0x273   : > { %8511 = vmatpush3.msra.mxu1 %v6723_v5  ;;  %8393 = vmatprep.mubr.f32.mxu1 %v11275_v6  ;;  %v5016_v5 = vld [vmem:[#allocation2 + $0x78] sm:$0xff] }
 0x274   : > { %8468 = vmatmul.mubr.f32.gmra.mxu0 %v11047_v54  ;;  %8512 = vmatprep.subr.mxu1 %v6722_v9  ;;  %v6737_v54 = vld [vmem:[%s12117_s3 + $0x3a8] sm:$0xff] }
 0x275   : > { %8470 = vmatprep.mubr.f32.mxu0 %v11053_v52  ;;  %8591 = vmatpush3.msra.mxu0 %v6739_v16  ;;  %v11297_v52 = vld [vmem:[#allocation2 + $0x111] sm:$0xff] }
 0x276   : > { %8394 = vmatmul.mubr.f32.gmra.mxu1 %v11283_v43  ;;  %8592 = vmatprep.subr.mxu0 %v6738_v40 }
 0x277   : > { %8513 = vmatpush3.msra.mxu1 %v6722_v9  ;;  %8396 = vmatprep.mubr.f32.mxu1 %v11289_v41 }
 0x278   : > { %8471 = vmatmul.mubr.f32.gmra.mxu0 %v11061_v53  ;;  %8514 = vmatprep.subr.mxu1 %v6721_v51  ;;  %v6736_v53 = vld [vmem:[%s12117_s3 + $0x3a0] sm:$0xff] }
 0x279   : > { %8473 = vmatprep.mubr.f32.mxu0 %v11067_v39  ;;  %8593 = vmatpush3.msra.mxu0 %v6738_v40  ;;  %v11311_v39 = vld [vmem:[#allocation2 + $0x129] sm:$0xff] }
 0x27a   : > { %8397 = vmatmul.mubr.f32.gmra.mxu1 %v11297_v52  ;;  %8594 = vmatprep.subr.mxu0 %v6737_v54 }
 0x27b   : > { %8515 = vmatpush3.msra.mxu1 %v6721_v51  ;;  %8399 = vmatprep.mubr.f32.mxu1 %v11303_v37  ;;  %v5017_v51 = vld [vmem:[#allocation2 + $0x80] sm:$0xff] }
 0x27c   : > { %8474 = vmatmul.mubr.f32.gmra.mxu0 %v11075_v11  ;;  %8516 = vmatprep.subr.mxu1 %v6720_v15  ;;  %v6735_v11 = vld [vmem:[%s12117_s3 + $0x398] sm:$0xff] }
 0x27d   : > { %8476 = vmatprep.mubr.f32.mxu0 %v11081_v28  ;;  %8595 = vmatpush3.msra.mxu0 %v6737_v54  ;;  %v11325_v28 = vld [vmem:[#allocation2 + $0x141] sm:$0xff] }
 0x27e   : > { %8400 = vmatmul.mubr.f32.gmra.mxu1 %v11311_v39  ;;  %8596 = vmatprep.subr.mxu0 %v6736_v53  ;;  %v6757_v54 = vld [vmem:[%s12117_s3 + $0x448] sm:$0xff] }
 0x27f   : > { %8517 = vmatpush3.msra.mxu1 %v6720_v15  ;;  %8402 = vmatprep.mubr.f32.mxu1 %v11317_v2 }
 0x280   : > { %8477 = vmatmul.mubr.f32.gmra.mxu0 %v11089_v23  ;;  %8518 = vmatprep.subr.mxu1 %v6719_v22  ;;  %v6734_v23 = vld [vmem:[%s12117_s3 + $0x390] sm:$0xff] }
 0x281   : > { %8479 = vmatprep.mubr.f32.mxu0 %v11095_v19  ;;  %8597 = vmatpush3.msra.mxu0 %v6736_v53  ;;  %v11339_v19 = vld [vmem:[#allocation2 + $0x159] sm:$0xff]  ;;  %v5018_v53 = vld [vmem:[#allocation2 + $0x90] sm:$0xff] }
 0x282   : > { %8403 = vmatmul.mubr.f32.gmra.mxu1 %v11325_v28  ;;  %8598 = vmatprep.subr.mxu0 %v6735_v11 }
 0x283   : > { %8519 = vmatpush3.msra.mxu1 %v6719_v22  ;;  %8405 = vmatprep.mubr.f32.mxu1 %v11331_v36 }
 0x284   : > { %8480 = vmatmul.mubr.f32.gmra.mxu0 %v11103_v33  ;;  %8520 = vmatprep.subr.mxu1 %v6718_v27  ;;  %v6733_v33 = vld [vmem:[%s12117_s3 + $0x388] sm:$0xff] }
 0x285   : > { %8482 = vmatprep.mubr.f32.mxu0 %v11109_v45  ;;  %8599 = vmatpush3.msra.mxu0 %v6735_v11  ;;  %v11351_v45 = vld [vmem:[#allocation2 + $0x171] sm:$0xff] }
 0x286   : > { %8406 = vmatmul.mubr.f32.gmra.mxu1 %v11339_v19  ;;  %8600 = vmatprep.subr.mxu0 %v6734_v23 }
 0x287   : > { %8521 = vmatpush3.msra.mxu1 %v6718_v27  ;;  %8408 = vmatprep.mubr.f32.mxu1 %v10901_v18  ;;  %v6732_v18 = vld [vmem:[%s12117_s3 + $0x380] sm:$0xff] }
 0x288   : > { %8483 = vmatmul.mubr.f32.gmra.mxu0 %v11117_v56  ;;  %8522 = vmatprep.subr.mxu1 %v6717_v0  ;;  %v6763_v56 = vld [vmem:[%s12117_s3 + $0x478] sm:$0xff] }
 0x289   : > { %8485 = vmatprep.mubr.f32.mxu0 %v11123_v57  ;;  %8601 = vmatpush3.msra.mxu0 %v6734_v23  ;;  %v5010_v57 = vld [vmem:[#allocation2 + $0x30] sm:$0xff] }
 0x28a   : > { %8409 = vmatmul.mubr.f32.gmra.mxu1 %v11351_v45  ;;  %8602 = vmatprep.subr.mxu0 %v6733_v33 }
 0x28b   : > { %8523 = vmatpush3.msra.mxu1 %v6717_v0  ;;  %8411 = vmatprep.mubr.f32.mxu1 %v3149_v4  ;;  %v11373_v4 = vld [vmem:[#allocation2 + $0x182] sm:$0xff]  ;;  %v5019_v0 = vld [vmem:[#allocation2 + $0x98] sm:$0xff] }
 0x28c   : > { %8486 = vmatmul.mubr.f32.gmra.mxu0 %v11131_v32  ;;  %8524 = vmatprep.subr.mxu1 %v6716_v13  ;;  %v11375_v32 = vpop.f32.mrf.mxu1 }
 0x28d   : > { %8488 = vmatprep.mubr.f32.mxu0 %v11137_v49  ;;  %8603 = vmatpush3.msra.mxu0 %v6733_v33  ;;  %v5012_v49 = vld [vmem:[#allocation2 + $0x48] sm:$0xff]  ;;  %v6755_v33 = vld [vmem:[%s12117_s3 + $0x438] sm:$0xff] }
 0x28e   : > { %8412 = vmatmul.mubr.f32.gmra.mxu1 %v3150_v24  ;;  %8604 = vmatprep.subr.mxu0 %v6732_v18  ;;  %v6762_v24 = vld [vmem:[%s12117_s3 + $0x470] sm:$0xff] }
 0x28f   : > { %8525 = vmatpush3.msra.mxu1 %v6716_v13  ;;  %8526 = vmatprep.mubr.f32.mxu1 %v5010_v57 }
 0x290   : > { %8489 = vmatmul.mubr.f32.gmra.mxu0 %v11145_v50  ;;  %8654 = vmatprep.subr.mxu1 %v6763_v56  ;;  %v6761_v50 = vld [vmem:[%s12117_s3 + $0x468] sm:$0xff] }
 0x291   : > { %8491 = vmatprep.mubr.f32.mxu0 %v11373_v4  ;;  %8605 = vmatpush3.msra.mxu0 %v6732_v18  ;;  %v5020_v18 = vld [vmem:[#allocation2 + $0xa8] sm:$0xff] }
 0x292   : > { %8527 = vmatmul.mubr.f32.vlgmr.msra.gmra.mxu1 %v5011_v7  ;;  %8734 = vmatprep.subr.msk.mxu0 %vm530_vm0, %v5967_v20 }
 0x293   : > { %8655 = vmatpush3.msra.mxu1 %v6763_v56  ;;  %8529 = vmatprep.mubr.f32.mxu1 %v5012_v49  ;;  %v6753_v49 = vld [vmem:[%s12117_s3 + $0x428] sm:$0xff] }
 0x294   : > { %8492 = vmatmul.mubr.f32.gmra.mxu0 %v11382_v63  ;;  %8656 = vmatprep.subr.mxu1 %v6762_v24  ;;  %v8051_v10 = vpop.f32.mrf.mxu1 }
 0x295   : > { %8606 = vmatprep.mubr.f32.mxu0 %v11161_v26  ;;  %8657 = vmatpush3.msra.mxu1 %v6762_v24  ;;  %v5015_v26 = vld [vmem:[#allocation2 + $0x68] sm:$0xff]  ;;  %v5021_v24 = vld [vmem:[#allocation2 + $0xb0] sm:$0xff] }
 0x296   : > { %8530 = vmatmul.mubr.f32.gmra.mxu1 %v5013_v29  ;;  %v3411_v8 = vpop.f32.mrf.mxu1  ;;  %8658 = vmatprep.subr.mxu1 %v6761_v50 }
 0x297   : > { %8532 = vmatprep.mubr.f32.mxu1 %v5014_v62  ;;  %8659 = vmatpush3.msra.mxu1 %v6761_v50 }
 0x298   : > { %8607 = vmatmul.mubr.f32.vlgmr.msra.gmra.mxu0 %v11171_v42  ;;  %v8054_v60 = vpop.f32.mrf.mxu1  ;;  %8660 = vmatprep.subr.mxu1 %v6760_v17  ;;  %v6758_v42 = vld [vmem:[%s12117_s3 + $0x450] sm:$0xff] }
 0x299   : > { %8609 = vmatprep.mubr.f32.mxu0 %v11177_v3  ;;  %8735 = vmatpush3.msk.msra.mxu0 %vm530_vm0, %v5967_v20 }
 0x29a   : > { %8533 = vmatmul.mubr.f32.gmra.mxu1 %v5015_v26  ;;  %v3421_v16 = vpop.f32.mrf.mxu1  ;;  %v6751_v26 = vld [vmem:[%s12117_s3 + $0x418] sm:$0xff] }
 0x29b   : > { %8535 = vmatprep.mubr.f32.mxu1 %v5016_v5  ;;  %8661 = vmatpush3.msra.mxu1 %v6760_v17  ;;  %v5024_v5 = vld [vmem:[#allocation2 + $0xd8] sm:$0xff] }
 0x29c   : > { %v8131_v9 = vpop.f32.mrf.mxu0  ;;  %8610 = vmatmul.mubr.f32.gmra.mxu0 %v11185_v59  ;;  %v8057_v3 = vpop.f32.mrf.mxu1  ;;  %8662 = vmatprep.subr.mxu1 %v6759_v58  ;;  %v6756_v59 = vld [vmem:[%s12117_s3 + $0x440] sm:$0xff] }
 0x29d   : > { %v11404_v40 = vadd.f32 %v8131_v9, %v8051_v10  ;;  %8612 = vmatprep.mubr.f32.mxu0 %v11191_v38  ;;  %8663 = vmatpush3.msra.mxu1 %v6759_v58  ;;  %v5022_v10 = vld [vmem:[#allocation2 + $0xc0] sm:$0xff] }
 0x29e   : > { %v3636_v15 = vpop.f32.mrf.mxu0  ;;  %8536 = vmatmul.mubr.f32.gmra.mxu1 %v5017_v51  ;;  %v3431_v22 = vpop.f32.mrf.mxu1  ;;  %8664 = vmatprep.subr.mxu1 %v6758_v42  ;;  %v5025_v51 = vld [vmem:[#allocation2 + $0xe0] sm:$0xff] }
 0x29f   : > { %v11410_v11 = vadd.f32 %v3636_v15, %v3411_v8  ;;  %8538 = vmatprep.mubr.f32.mxu1 %v5018_v53  ;;  %8665 = vmatpush3.msra.mxu1 %v6758_v42  ;;  %v5026_v53 = vld [vmem:[#allocation2 + $0xf0] sm:$0xff] }
 0x2a0   : > { %v8134_v38 = vpop.f32.mrf.mxu0  ;;  %8613 = vmatmul.mubr.f32.gmra.mxu0 %v11199_v30  ;;  %v8060_v27 = vpop.f32.mrf.mxu1  ;;  %8666 = vmatprep.subr.mxu1 %v6757_v54  ;;  %v6754_v30 = vld [vmem:[%s12117_s3 + $0x430] sm:$0xff] }
 0x2a1   : > { %v11416_v23 = vadd.f32 %v8134_v38, %v8054_v60  ;;  %8615 = vmatprep.mubr.f32.mxu0 %v11205_v14  ;;  %8667 = vmatpush3.msra.mxu1 %v6757_v54  ;;  %v5023_v60 = vld [vmem:[#allocation2 + $0xc8] sm:$0xff] }
 0x2a2   : > { %v3646_v13 = vpop.f32.mrf.mxu0  ;;  %8539 = vmatmul.mubr.f32.gmra.mxu1 %v5019_v0  ;;  %v3441_v56 = vpop.f32.mrf.mxu1  ;;  %8668 = vmatprep.subr.mxu1 %v6756_v59  ;;  %v6749_v54 = vld [vmem:[%s12117_s3 + $0x408] sm:$0xff]  ;;  %v5027_v0 = vld [vmem:[#allocation2 + $0xf8] sm:$0xff] }
 0x2a3   : > { %v11422_v57 = vadd.f32 %v3646_v13, %v3421_v16  ;;  %8541 = vmatprep.mubr.f32.mxu1 %v5020_v18  ;;  %8669 = vmatpush3.msra.mxu1 %v6756_v59  ;;  %v5028_v13 = vld [vmem:[#allocation2 + $0x108] sm:$0xff] }
 0x2a4   : > { %v8137_v14 = vpop.f32.mrf.mxu0  ;;  %8616 = vmatmul.mubr.f32.gmra.mxu0 %v11213_v25  ;;  %v8063_v20 = vpop.f32.mrf.mxu1  ;;  %8670 = vmatprep.subr.mxu1 %v6755_v33  ;;  %v6752_v25 = vld [vmem:[%s12117_s3 + $0x420] sm:$0xff] }
 0x2a5   : > { %v11428_v7 = vadd.f32 %v8137_v14, %v8057_v3  ;;  %8618 = vmatprep.mubr.f32.mxu0 %v11219_v1  ;;  %8671 = vmatpush3.msra.mxu1 %v6755_v33 }
 0x2a6   : > { %v3656_v50 = vpop.f32.mrf.mxu0  ;;  %8542 = vmatmul.mubr.f32.gmra.mxu1 %v5021_v24  ;;  %v3451_v29 = vpop.f32.mrf.mxu1  ;;  %8672 = vmatprep.subr.mxu1 %v6754_v30  ;;  %v5030_v24 = vld [vmem:[#allocation2 + $0x120] sm:$0xff] }
 0x2a7   : > { %v11434_v17 = vadd.f32 %v3656_v50, %v3431_v22  ;;  %8544 = vmatprep.mubr.f32.mxu1 %v5022_v10  ;;  %8673 = vmatpush3.msra.mxu1 %v6754_v30 }
 0x2a8   : > { %v8140_v1 = vpop.f32.mrf.mxu0  ;;  %8619 = vmatmul.mubr.f32.gmra.mxu0 %v11227_v61  ;;  %v8066_v62 = vpop.f32.mrf.mxu1  ;;  %8674 = vmatprep.subr.mxu1 %v6753_v49  ;;  %v6750_v61 = vld [vmem:[%s12117_s3 + $0x410] sm:$0xff] }
 0x2a9   : > { %v11440_v8 = vadd.f32 %v8140_v1, %v8060_v27  ;;  %8621 = vmatprep.mubr.f32.mxu0 %v11233_v31  ;;  %8675 = vmatpush3.msra.mxu1 %v6753_v49 }
 0x2aa   : > { %v3666_v58 = vpop.f32.mrf.mxu0  ;;  %8545 = vmatmul.mubr.f32.gmra.mxu1 %v5023_v60  ;;  %v3461_v16 = vpop.f32.mrf.mxu1  ;;  %8676 = vmatprep.subr.mxu1 %v6752_v25 }
 0x2ab   : > { %v11446_v42 = vadd.f32 %v3666_v58, %v3441_v56  ;;  %8547 = vmatprep.mubr.f32.mxu1 %v5024_v5  ;;  %8677 = vmatpush3.msra.mxu1 %v6752_v25 }
 0x2ac   : > { %v8143_v31 = vpop.f32.mrf.mxu0  ;;  %8622 = vmatmul.mubr.f32.gmra.mxu0 %v11241_v46  ;;  %v8069_v9 = vpop.f32.mrf.mxu1  ;;  %8678 = vmatprep.subr.mxu1 %v6751_v26  ;;  %v6748_v46 = vld [vmem:[%s12117_s3 + $0x400] sm:$0xff] }
 0x2ad   : > { %v11452_v3 = vadd.f32 %v8143_v31, %v8063_v20  ;;  %8624 = vmatprep.mubr.f32.mxu0 %v11247_v44  ;;  %8679 = vmatpush3.msra.mxu1 %v6751_v26 }
 0x2ae   : > { %v3676_v15 = vpop.f32.mrf.mxu0  ;;  %8548 = vmatmul.mubr.f32.gmra.mxu1 %v5025_v51  ;;  %v3471_v22 = vpop.f32.mrf.mxu1  ;;  %8680 = vmatprep.subr.mxu1 %v6750_v61 }
 0x2af   : > { %v11458_v59 = vadd.f32 %v3676_v15, %v3451_v29  ;;  %8550 = vmatprep.mubr.f32.mxu1 %v5026_v53  ;;  %8681 = vmatpush3.msra.mxu1 %v6750_v61 }
 0x2b0   : > { %v8146_v44 = vpop.f32.mrf.mxu0  ;;  %8625 = vmatmul.mubr.f32.gmra.mxu0 %v11255_v34  ;;  %v8072_v38 = vpop.f32.mrf.mxu1  ;;  %8682 = vmatprep.subr.mxu1 %v6749_v54 }
 0x2b1   : > { %v11464_v27 = vadd.f32 %v8146_v44, %v8066_v62  ;;  %8627 = vmatprep.mubr.f32.mxu0 %v11261_v35  ;;  %8683 = vmatpush3.msra.mxu1 %v6749_v54  ;;  %v5029_v35 = vld [vmem:[#allocation2 + $0x110] sm:$0xff] }
 0x2b2   : > { %v3686_v33 = vpop.f32.mrf.mxu0  ;;  %8551 = vmatmul.mubr.f32.gmra.mxu1 %v5027_v0  ;;  %v3481_v18 = vpop.f32.mrf.mxu1  ;;  %8684 = vmatprep.subr.mxu1 %v6748_v46 }
 0x2b3   : > { %v11467_v56 = vadd.f32 %v3686_v33, %v3461_v16  ;;  %8553 = vmatprep.mubr.f32.mxu1 %v5028_v13  ;;  %8685 = vmatpush3.msra.mxu1 %v6748_v46 }
 0x2b4   : > { %v8149_v30 = vpop.f32.mrf.mxu0  ;;  %8628 = vmatmul.mubr.f32.gmra.mxu0 %v11269_v12  ;;  %v8075_v34 = vpop.f32.mrf.mxu1  ;;  %v5031_v12 = vld [vmem:[#allocation2 + $0x128] sm:$0xff] }
 0x2b5   : > { %v11470_v14 = vadd.f32 %v8149_v30, %v8069_v9  ;;  %8630 = vmatprep.mubr.f32.mxu0 %v11275_v6  ;;  %v5032_v6 = vld [vmem:[#allocation2 + $0x138] sm:$0xff] }
 0x2b6   : > { %v3696_v20 = vpop.f32.mrf.mxu0  ;;  %8554 = vmatmul.mubr.f32.gmra.mxu1 %v5029_v35  ;;  %v3491_v49 = vpop.f32.mrf.mxu1 }
 0x2b7   : > { %v11473_v50 = vadd.f32 %v3696_v20, %v3471_v22  ;;  %8556 = vmatprep.mubr.f32.mxu1 %v5030_v24  ;;  %v8796_v20 = vld [vmem:[#allocation2] sm:$0xff] }
 0x2b8   : > { %v8152_v10 = vpop.f32.mrf.mxu0  ;;  %8631 = vmatmul.mubr.f32.gmra.mxu0 %v11283_v43  ;;  %v8078_v29 = vpop.f32.mrf.mxu1  ;;  %v5033_v43 = vld [vmem:[#allocation2 + $0x140] sm:$0xff] }
 0x2b9   : > { %v11476_v25 = vadd.f32 %v8152_v10, %v8072_v38  ;;  %8633 = vmatprep.mubr.f32.mxu0 %v11289_v41  ;;  %v5034_v41 = vld [vmem:[#allocation2 + $0x150] sm:$0xff] }
 0x2ba   : > { %v3706_v1 = vpop.f32.mrf.mxu0  ;;  %8557 = vmatmul.mubr.f32.gmra.mxu1 %v5031_v12  ;;  %v3501_v62 = vpop.f32.mrf.mxu1  ;;  %v5622_v12 = vld [vmem:[#allocation2 + $0x32] sm:$0xff] }
 0x2bb   : > { %v11479_v60 = vadd.f32 %v3706_v1, %v3481_v18  ;;  %8559 = vmatprep.mubr.f32.mxu1 %v5032_v6  ;;  %v5342_v18 = vld [vmem:[#allocation2 + $0x169] sm:$0xff] }
 0x2bc   : > { %v8155_v26 = vpop.f32.mrf.mxu0  ;;  %8634 = vmatmul.mubr.f32.gmra.mxu0 %v11297_v52  ;;  %v8081_v58 = vpop.f32.mrf.mxu1  ;;  %v5035_v52 = vld [vmem:[#allocation2 + $0x158] sm:$0xff] }
 0x2bd   : > { %v11482_v5 = vadd.f32 %v8155_v26, %v8075_v34  ;;  %8636 = vmatprep.mubr.f32.mxu0 %v11303_v37  ;;  %v5036_v37 = vld [vmem:[#allocation2 + $0x168] sm:$0xff] }
 0x2be   : > { %v3716_v16 = vpop.f32.mrf.mxu0  ;;  %8560 = vmatmul.mubr.f32.gmra.mxu1 %v5033_v43  ;;  %v3511_v61 = vpop.f32.mrf.mxu1 }
 0x2bf   : > { %v11485_v31 = vadd.f32 %v3716_v16, %v3491_v49  ;;  %8562 = vmatprep.mubr.f32.mxu1 %v5034_v41  ;;  %v5623_v16 = vld [vmem:[#allocation2 + $0x3a] sm:$0xff] }
 0x2c0   : > { %v8158_v9 = vpop.f32.mrf.mxu0  ;;  %8637 = vmatmul.mubr.f32.gmra.mxu0 %v11311_v39  ;;  %v8084_v51 = vpop.f32.mrf.mxu1  ;;  %v5037_v39 = vld [vmem:[#allocation2 + $0x170] sm:$0xff] }
 0x2c1   : > { %v11488_v54 = vadd.f32 %v8158_v9, %v8078_v29  ;;  %8639 = vmatprep.mubr.f32.mxu0 %v11317_v2  ;;  %v5346_v29 = vld [vmem:[#allocation2 + $0x199] sm:$0xff] }
 0x2c2   : > { %v3726_v15 = vpop.f32.mrf.mxu0  ;;  %8563 = vmatmul.mubr.f32.gmra.mxu1 %v5035_v52  ;;  %v3521_v53 = vpop.f32.mrf.mxu1 }
 0x2c3   : > { %v11491_v22 = vadd.f32 %v3726_v15, %v3501_v62  ;;  %8565 = vmatprep.mubr.f32.mxu1 %v5036_v37 }
 0x2c4   : > { %v8161_v46 = vpop.f32.mrf.mxu0  ;;  %8640 = vmatmul.mubr.f32.gmra.mxu0 %v11325_v28  ;;  %v8087_v44 = vpop.f32.mrf.mxu1 }
 0x2c5   : > { %v11494_v38 = vadd.f32 %v8161_v46, %v8081_v58  ;;  %8642 = vmatprep.mubr.f32.mxu0 %v11331_v36 }
 0x2c6   : > { %v3736_v0 = vpop.f32.mrf.mxu0  ;;  %8566 = vmatmul.mubr.f32.gmra.mxu1 %v5037_v39  ;;  %v3531_v2 = vpop.f32.mrf.mxu1  ;;  %v5626_v39 = vld [vmem:[#allocation2 + $0x62] sm:$0xff] }
 0x2c7   : > { %v11497_v33 = vadd.f32 %v3736_v0, %v3511_v61  ;;  %8568 = vmatprep.mubr.f32.mxu1 %v11155_v48  ;;  %v5344_v48 = vld [vmem:[#allocation2 + $0x181] sm:$0xff]  ;;  %v5624_v61 = vld [vmem:[#allocation2 + $0x4a] sm:$0xff] }
 0x2c8   : > { %v8164_v13 = vpop.f32.mrf.mxu0  ;;  %8643 = vmatmul.mubr.f32.gmra.mxu0 %v11339_v19  ;;  %v8090_v30 = vpop.f32.mrf.mxu1 }
 0x2c9   : > { %v11501_v34 = vadd.f32 %v8164_v13, %v8084_v51  ;;  %8645 = vmatprep.mubr.f32.mxu0 %v5342_v18 }
 0x2ca   : > { %v3746_v28 = vpop.f32.mrf.mxu0  ;;  %8569 = vmatmul.mubr.f32.gmra.mxu1 %v11163_v47  ;;  %v3541_v36 = vpop.f32.mrf.mxu1  ;;  %v5345_v47 = vld [vmem:[#allocation2 + $0x189] sm:$0xff] }
 0x2cb   : > { %v11504_v35 = vadd.f32 %v3746_v28, %v3521_v53  ;;  %8571 = vmatprep.mubr.f32.mxu1 %v8796_v20  ;;  %v12509_v53 = vld [vmem:[#allocation5_spill] sm:$0xff]  ;;  %v12510_v28 = vld [vmem:[#allocation7_spill] sm:$0xff] }
 0x2cc   : > { %v8167_v24 = vpop.f32.mrf.mxu0  ;;  %8646 = vmatmul.mubr.f32.gmra.mxu0 %v11351_v45  ;;  %v8093_v49 = vpop.f32.mrf.mxu1  ;;  %v5347_v45 = vld [vmem:[#allocation2 + $0x1a1] sm:$0xff] }
 0x2cd   : > { %v11507_v10 = vadd.f32 %v8167_v24, %v8087_v44  ;;  %8648 = vmatprep.mubr.f32.mxu0 %v5344_v48  ;;  %v5625_v44 = vld [vmem:[#allocation2 + $0x52] sm:$0xff]  ;;  %v12511_v24 = vld [vmem:[#allocation9_spill] sm:$0xff] }
 0x2ce   : > { %v3756_v19 = vpop.f32.mrf.mxu0  ;;  %8572 = vmatmul.mubr.f32.gmra.mxu1 %v8796_v20  ;;  %v3551_v1 = vpop.f32.mrf.mxu1 }
 0x2cf   : > { %v11509_v6 = vadd.f32 %v3756_v19, %v3531_v2  ;;  %8686 = vmatprep.mubr.f32.mxu1 %v5622_v12  ;;  %v3627_v2 = vadd.f32 %v11398_v55, %v11375_v32  ;;  %v5628_v55 = vld [vmem:[#allocation2 + $0x7a] sm:$0xff] }
 0x2d0   : > { %v8170_v62 = vpop.f32.mrf.mxu0  ;;  %8649 = vmatmul.mubr.f32.gmra.mxu0 %v5345_v47  ;;  %v8208_v26 = vpop.f32.mrf.mxu1 }
 0x2d1   : > { %v11511_v58 = vadd.f32 %v8170_v62, %v8090_v30  ;;  %8651 = vmatprep.mubr.f32.mxu0 %v5346_v29  ;;  %v4060_v43 = vadd.f32 %v8208_v26, %v10952_v21  ;;  %v12513_v62 = vld [vmem:[#allocation13_spill] sm:$0xff] }
 0x2d2   : > { %v3766_v41 = vpop.f32.mrf.mxu0  ;;  %8687 = vmatmul.mubr.f32.vlgmr.msra.gmra.mxu1 %v5623_v16  ;;  %v3900_v9 = vpop.f32.mrf.mxu1 }
 0x2d3   : > { %v11514_v51 = vadd.f32 %v3766_v41, %v3541_v36  ;;  %8689 = vmatprep.mubr.f32.mxu1 %v5624_v61  ;;  %v12514_v61 = vld [vmem:[#allocation15_spill] sm:$0xff] }
 0x2d4   : > { %v8173_v52 = vpop.f32.mrf.mxu0  ;;  %8652 = vmatmul.mubr.f32.gmra.mxu0 %v5347_v45  ;;  %v8211_v15 = vpop.f32.mrf.mxu1 }
 0x2d5   : > { %v11516_v37 = vadd.f32 %v8173_v52, %v8093_v49  ;;  %8736 = vmatprep.mubr.msk.f32.mxu0 %vm465_vm2, %v12509_v53  ;;  %v4062_v46 = vadd.f32 %v8211_v15, %v11404_v40  ;;  %v4059_v40 = vadd.f32 %v3900_v9, %v3627_v2  ;;  %v5627_v49 = vld [vmem:[#allocation2 + $0x6a] sm:$0xff]  ;;  %v12515_v15 = vld [vmem:[#allocation17_spill] sm:$0xff] }
 0x2d6   : > { %v3776_v21 = vpop.f32.mrf.mxu0  ;;  %8690 = vmatmul.mubr.f32.gmra.mxu1 %v5625_v44  ;;  %v3910_v0 = vpop.f32.mrf.mxu1 }
 0x2d7   : > { %v11523_v13 = vadd.f32 %v3776_v21, %v3551_v1  ;;  %8692 = vmatprep.mubr.f32.mxu1 %v5626_v39  ;;  %v4061_v18 = vadd.f32 %v3910_v0, %v11410_v11  ;;  %v12512_v1 = vld [vmem:[#allocation11_spill] sm:$0xff] }
 0x2d8   : > { %v8288_v30 = vpop.f32.mrf.mxu0  ;;  %8737 = vmatmul.mubr.msk.f32.vlgmr.msra.gmra.mxu0 %vm465_vm2, %v12510_v28  ;;  %v8214_v36 = vpop.f32.mrf.mxu1  ;;  %v5632_v39 = vld [vmem:[#allocation2 + $0xaa] sm:$0xff] }
 0x2d9   : > { %v11528_v20 = vadd.f32 %v8288_v30, %v4060_v43  ;;  %8739 = vmatprep.mubr.msk.f32.mxu0 %vm465_vm2, %v12511_v24  ;;  %v4064_v48 = vadd.f32 %v8214_v36, %v11416_v23  ;;  %v5629_v23 = vld [vmem:[#allocation2 + $0x82] sm:$0xff]  ;;  %v5630_v43 = vld [vmem:[#allocation2 + $0x92] sm:$0xff] }
 0x2da   : > { %v4206_v32 = vpop.f32.mrf.mxu0  ;;  %8693 = vmatmul.mubr.f32.gmra.mxu1 %v5627_v49  ;;  %v3920_v19 = vpop.f32.mrf.mxu1  ;;  %v12517_v36 = vld [vmem:[#allocation22_spill] sm:$0xff] }
 0x2db   : > { %v11533_v29 = vadd.f32 %v4206_v32, %v4059_v40  ;;  %8695 = vmatprep.mubr.f32.mxu1 %v5628_v55  ;;  %v4063_v11 = vadd.f32 %v3920_v19, %v11422_v57  ;;  %v5633_v40 = vld [vmem:[#allocation2 + $0xb2] sm:$0xff]  ;;  %v5634_v49 = vld [vmem:[#allocation2 + $0xc2] sm:$0xff] }
 0x2dc   : > { %v8291_v12 = vpop.f32.mrf.mxu0  ;;  %8740 = vmatmul.mubr.msk.f32.gmra.mxu0 %vm465_vm2, %v12512_v1  ;;  %v12518_v19 = vld [vmem:[#allocation25_spill] sm:$0xff]  ;;  %v12519_v1 = vld [vmem:[#allocation27_spill] sm:$0xff] }
 0x2dd   : > { %v11538_v47 = vadd.f32 %v8291_v12, %v4062_v46  ;;  %8742 = vmatprep.mubr.msk.f32.mxu0 %vm465_vm2, %v12513_v62  ;;  %v5631_v46 = vld [vmem:[#allocation2 + $0x9a] sm:$0xff]  ;;  %v5635_v62 = vld [vmem:[#allocation2 + $0xca] sm:$0xff] }
 0x2de   : > { %v4216_v26 = vpop.f32.mrf.mxu0  ;;  %v8217_v45 = vpop.f32.mrf.mxu1  ;;  %8696 = vmatmul.mubr.f32.gmra.mxu1 %v5629_v23 }
 0x2df   : > { %v11542_v16 = vadd.f32 %v4216_v26, %v4061_v18  ;;  %v4066_v41 = vadd.f32 %v8217_v45, %v11428_v7  ;;  %8698 = vmatprep.mubr.f32.mxu1 %v5630_v43  ;;  %v12516_v18 = vld [vmem:[#allocation20_spill] sm:$0xff] }
 0x2e0   : > { %v8294_v57 = vpop.f32.mrf.mxu0  ;;  %8743 = vmatmul.mubr.msk.f32.gmra.mxu0 %vm465_vm2, %v12514_v61  ;;  %v3930_v9 = vpop.f32.mrf.mxu1  ;;  %v5636_v45 = vld [vmem:[#allocation2 + $0xda] sm:$0xff] }
 0x2e1   : > { %v11547_v52 = vadd.f32 %v8294_v57, %v4064_v48  ;;  %8745 = vmatprep.mubr.msk.f32.mxu0 %vm465_vm2, %v12515_v15  ;;  %v4065_v53 = vadd.f32 %v3930_v9, %v11434_v17  ;;  %v12520_v57 = vld [vmem:[#allocation29_spill] sm:$0xff]  ;;  %v12521_v15 = vld [vmem:[#allocation31_spill] sm:$0xff] }
 0x2e2   : > { %v4226_v44 = vpop.f32.mrf.mxu0  ;;  %v8220_v21 = vpop.f32.mrf.mxu1  ;;  %8699 = vmatmul.mubr.f32.gmra.mxu1 %v5631_v46 }
 0x2e3   : > { %v11552_v0 = vadd.f32 %v4226_v44, %v4063_v11  ;;  %v4068_v7 = vadd.f32 %v8220_v21, %v11440_v8  ;;  %8701 = vmatprep.mubr.f32.mxu1 %v5632_v39  ;;  %v5638_v21 = vld [vmem:[#allocation2 + $0xf2] sm:$0xff] }
 0x2e4   : > { %v8297_v2 = vpop.f32.mrf.mxu0  ;;  %8746 = vmatmul.mubr.msk.f32.gmra.mxu0 %vm465_vm2, %v12516_v18  ;;  %v3940_v30 = vpop.f32.mrf.mxu1 }
 0x2e5   : > { %v11557_v28 = vadd.f32 %v8297_v2, %v4066_v41  ;;  %8748 = vmatprep.mubr.msk.f32.mxu0 %vm465_vm2, %v12517_v36  ;;  %v4067_v17 = vadd.f32 %v3940_v30, %v11446_v42  ;;  %v12522_v2 = vld [vmem:[#allocation33_spill] sm:$0xff]  ;;  %v12523_v36 = vld [vmem:[#allocation3_spill] sm:$0xff] }
 0x2e6   : > { %v4236_v24 = vpop.f32.mrf.mxu0  ;;  %v8223_v48 = vpop.f32.mrf.mxu1  ;;  %8702 = vmatmul.mubr.f32.gmra.mxu1 %v5633_v40 }
 0x2e7   : > { %v11562_v32 = vadd.f32 %v4236_v24, %v4065_v53  ;;  %v4070_v8 = vadd.f32 %v8223_v48, %v11452_v3  ;;  %8704 = vmatprep.mubr.f32.mxu1 %v5634_v49  ;;  %v5637_v53 = vld [vmem:[#allocation2 + $0xe2] sm:$0xff]  ;;  %v5640_v48 = vld [vmem:[#allocation2 + $0x10a] sm:$0xff] }
 0x2e8   : > { %v8300_v55 = vpop.f32.mrf.mxu0  ;;  %8749 = vmatmul.mubr.msk.f32.gmra.mxu0 %vm465_vm2, %v12518_v19  ;;  %v3950_v11 = vpop.f32.mrf.mxu1 }
 0x2e9   : > { %v11567_v12 = vadd.f32 %v8300_v55, %v4068_v7  ;;  %8751 = vmatprep.mubr.msk.f32.mxu0 %vm465_vm2, %v12519_v1  ;;  %v4069_v42 = vadd.f32 %v3950_v11, %v11458_v59  ;;  %v12524_v55 = vld [vmem:[#allocation4_spill] sm:$0xff]  ;;  %v12525_v1 = vld [vmem:[#allocation6_spill] sm:$0xff] }
 0x2ea   : > { %v4246_v23 = vpop.f32.mrf.mxu0  ;;  %v8226_v26 = vpop.f32.mrf.mxu1  ;;  %8705 = vmatmul.mubr.f32.gmra.mxu1 %v5635_v62 }
 0x2eb   : > { %v11572_v43 = vadd.f32 %v4246_v23, %v4067_v17  ;;  %v4072_v3 = vadd.f32 %v8226_v26, %v11464_v27  ;;  %8707 = vmatprep.mubr.f32.mxu1 %v5636_v45  ;;  %v5639_v17 = vld [vmem:[#allocation2 + $0xfa] sm:$0xff]  ;;  %v5642_v26 = vld [vmem:[#allocation2 + $0x122] sm:$0xff] }
 0x2ec   : > { %v8303_v41 = vpop.f32.mrf.mxu0  ;;  %8752 = vmatmul.mubr.msk.f32.gmra.mxu0 %vm465_vm2, %v12520_v57  ;;  %v3960_v61 = vpop.f32.mrf.mxu1 }
 0x2ed   : > { %v11577_v9 = vadd.f32 %v8303_v41, %v4070_v8  ;;  %8754 = vmatprep.mubr.msk.f32.mxu0 %vm465_vm2, %v12521_v15  ;;  %v4071_v59 = vadd.f32 %v3960_v61, %v11467_v56  ;;  %v12526_v41 = vld [vmem:[#allocation8_spill] sm:$0xff]  ;;  %v12527_v15 = vld [vmem:[#allocation10_spill] sm:$0xff] }
 0x2ee   : > { %v4256_v46 = vpop.f32.mrf.mxu0  ;;  %v8229_v44 = vpop.f32.mrf.mxu1  ;;  %8708 = vmatmul.mubr.f32.gmra.mxu1 %v5637_v53 }
 0x2ef   : > { %v11582_v39 = vadd.f32 %v4256_v46, %v4069_v42  ;;  %v4074_v27 = vadd.f32 %v8229_v44, %v11470_v14  ;;  %8710 = vmatprep.mubr.f32.mxu1 %v5638_v21  ;;  %v5641_v42 = vld [vmem:[#allocation2 + $0x112] sm:$0xff]  ;;  %v5644_v44 = vld [vmem:[#allocation2 + $0x13a] sm:$0xff] }
 0x2f0   : > { %v8306_v7 = vpop.f32.mrf.mxu0  ;;  %8755 = vmatmul.mubr.msk.f32.gmra.mxu0 %vm465_vm2, %v12522_v2  ;;  %v3970_v18 = vpop.f32.mrf.mxu1 }
 0x2f1   : > { %v11587_v30 = vadd.f32 %v8306_v7, %v4072_v3  ;;  %8757 = vmatprep.mubr.msk.f32.mxu0 %vm465_vm2, %v12523_v36  ;;  %v4073_v56 = vadd.f32 %v3970_v18, %v11473_v50  ;;  %v12528_v7 = vld [vmem:[#allocation12_spill] sm:$0xff]  ;;  %v12529_v36 = vld [vmem:[#allocation14_spill] sm:$0xff] }
 0x2f2   : > { %v4266_v40 = vpop.f32.mrf.mxu0  ;;  %v8232_v24 = vpop.f32.mrf.mxu1  ;;  %8711 = vmatmul.mubr.f32.gmra.mxu1 %v5639_v17 }
 0x2f3   : > { %v11592_v49 = vadd.f32 %v4266_v40, %v4071_v59  ;;  %v4076_v14 = vadd.f32 %v8232_v24, %v11476_v25  ;;  %8713 = vmatprep.mubr.f32.mxu1 %v5640_v48  ;;  %v5643_v59 = vld [vmem:[#allocation2 + $0x12a] sm:$0xff]  ;;  %v5646_v24 = vld [vmem:[#allocation2 + $0x152] sm:$0xff] }
 0x2f4   : > { %v8309_v8 = vpop.f32.mrf.mxu0  ;;  %8758 = vmatmul.mubr.msk.f32.gmra.mxu0 %vm465_vm2, %v12524_v55  ;;  %v3980_v19 = vpop.f32.mrf.mxu1 }
 0x2f5   : > { %v11597_v11 = vadd.f32 %v8309_v8, %v4074_v27  ;;  %8760 = vmatprep.mubr.msk.f32.mxu0 %vm465_vm2, %v12525_v1  ;;  %v4075_v50 = vadd.f32 %v3980_v19, %v11479_v60  ;;  %v12530_v8 = vld [vmem:[#allocation16_spill] sm:$0xff]  ;;  %v12531_v1 = vld [vmem:[#allocation18_spill] sm:$0xff] }
 0x2f6   : > { %v4276_v62 = vpop.f32.mrf.mxu0  ;;  %v8235_v23 = vpop.f32.mrf.mxu1  ;;  %8714 = vmatmul.mubr.f32.gmra.mxu1 %v5641_v42 }
 0x2f7   : > { %v11602_v45 = vadd.f32 %v4276_v62, %v4073_v56  ;;  %v4078_v25 = vadd.f32 %v8235_v23, %v11482_v5  ;;  %8716 = vmatprep.mubr.f32.mxu1 %v5642_v26  ;;  %v5645_v56 = vld [vmem:[#allocation2 + $0x142] sm:$0xff]  ;;  %v5648_v23 = vld [vmem:[#allocation2 + $0x16a] sm:$0xff] }
 0x2f8   : > { %v8312_v3 = vpop.f32.mrf.mxu0  ;;  %8761 = vmatmul.mubr.msk.f32.gmra.mxu0 %vm465_vm2, %v12526_v41  ;;  %v3990_v57 = vpop.f32.mrf.mxu1 }
 0x2f9   : > { %v11607_v61 = vadd.f32 %v8312_v3, %v4076_v14  ;;  %8763 = vmatprep.mubr.msk.f32.mxu0 %vm465_vm2, %v12527_v15  ;;  %v4077_v60 = vadd.f32 %v3990_v57, %v11485_v31  ;;  %v12532_v3 = vld [vmem:[#allocation21_spill] sm:$0xff]  ;;  %v12533_v15 = vld [vmem:[#allocation23_spill] sm:$0xff] }
 0x2fa   : > { %v4286_v53 = vpop.f32.mrf.mxu0  ;;  %v8238_v46 = vpop.f32.mrf.mxu1  ;;  %8717 = vmatmul.mubr.f32.gmra.mxu1 %v5643_v59 }
 0x2fb   : > { %v11612_v21 = vadd.f32 %v4286_v53, %v4075_v50  ;;  %v4080_v5 = vadd.f32 %v8238_v46, %v11488_v54  ;;  %8719 = vmatprep.mubr.f32.mxu1 %v5644_v44  ;;  %v5647_v50 = vld [vmem:[#allocation2 + $0x15a] sm:$0xff] }
 0x2fc   : > { %v8315_v27 = vpop.f32.mrf.mxu0  ;;  %8764 = vmatmul.mubr.msk.f32.gmra.mxu0 %vm465_vm2, %v12528_v7  ;;  %v4000_v2 = vpop.f32.mrf.mxu1  ;;  %v5652_v7 = vld [vmem:[#allocation2 + $0x19a] sm:$0xff] }
 0x2fd   : > { %v11617_v18 = vadd.f32 %v8315_v27, %v4078_v25  ;;  %8766 = vmatprep.mubr.msk.f32.mxu0 %vm465_vm2, %v12529_v36  ;;  %v4079_v31 = vadd.f32 %v4000_v2, %v11491_v22  ;;  %v12535_v36 = vld [vmem:[#allocation28_spill] sm:$0xff] }
 0x2fe   : > { %v4296_v17 = vpop.f32.mrf.mxu0  ;;  %v8241_v40 = vpop.f32.mrf.mxu1  ;;  %8720 = vmatmul.mubr.f32.gmra.mxu1 %v5645_v56 }
 0x2ff   : > { %v11622_v48 = vadd.f32 %v4296_v17, %v4077_v60  ;;  %v4082_v54 = vadd.f32 %v8241_v40, %v11494_v38  ;;  %8722 = vmatprep.mubr.f32.mxu1 %v5646_v24  ;;  %v5649_v60 = vld [vmem:[#allocation2 + $0x172] sm:$0xff]  ;;  %v5653_v17 = vld [vmem:[#allocation2 + $0x1a2] sm:$0xff] }
 0x300   : > { %v8318_v14 = vpop.f32.mrf.mxu0  ;;  %8767 = vmatmul.mubr.msk.f32.gmra.mxu0 %vm465_vm2, %v12530_v8  ;;  %v4010_v55 = vpop.f32.mrf.mxu1  ;;  %v12536_v24 = vld [vmem:[#allocation30_spill] sm:$0xff]  ;;  %v12537_v8 = vld [vmem:[#allocation32_spill] sm:$0xff] }
 0x301   : > { %v11627_v19 = vadd.f32 %v8318_v14, %v4080_v5  ;;  %8769 = vmatprep.mubr.msk.f32.mxu0 %vm465_vm2, %v12531_v1  ;;  %v4081_v22 = vadd.f32 %v4010_v55, %v11497_v33  ;;  %v12534_v5 = vld [vmem:[#allocation26_spill] sm:$0xff] }
 0x302   : > { %v4306_v42 = vpop.f32.mrf.mxu0  ;;  %v8244_v62 = vpop.f32.mrf.mxu1  ;;  %8723 = vmatmul.mubr.f32.gmra.mxu1 %v5647_v50  ;;  %v12538_v50 = vld [vmem:[#allocation34_spill] sm:$0xff] }
 0x303   : > { %v11632_v26 = vadd.f32 %v4306_v42, %v4079_v31  ;;  %v4084_v38 = vadd.f32 %v8244_v62, %v11501_v34  ;;  %8725 = vmatprep.mubr.f32.mxu1 %v5648_v23  ;;  %v12539_v23 = vld [vmem:[#allocation19_spill] sm:$0xff] }
 0x304   : > { %v8321_v25 = vpop.f32.mrf.mxu0  ;;  %8770 = vmatmul.mubr.msk.f32.gmra.mxu0 %vm465_vm2, %v12532_v3  ;;  %v4020_v41 = vpop.f32.mrf.mxu1 }
 0x305   : > { %v11637_v57 = vadd.f32 %v8321_v25, %v4082_v54  ;;  %8772 = vmatprep.mubr.msk.f32.mxu0 %vm465_vm2, %v12533_v15  ;;  %v4083_v33 = vadd.f32 %v4020_v41, %v11504_v35 }
 0x306   : > { %v4316_v59 = vpop.f32.mrf.mxu0  ;;  %v8247_v53 = vpop.f32.mrf.mxu1  ;;  %8726 = vmatmul.mubr.f32.gmra.mxu1 %v5649_v60 }
 0x307   : > { %v11642_v46 = vadd.f32 %v4316_v59, %v4081_v22  ;;  %v4086_v34 = vadd.f32 %v8247_v53, %v11507_v10  ;;  %8728 = vmatprep.mubr.f32.mxu1 %v11373_v4 }
 0x308   : > { %v8324_v44 = vpop.f32.mrf.mxu0  ;;  %8773 = vmatmul.mubr.msk.f32.gmra.mxu0 %vm465_vm2, %v12534_v5  ;;  %v4030_v27 = vpop.f32.mrf.mxu1 }
 0x309   : > { %v11648_v2 = vadd.f32 %v8324_v44, %v4084_v38  ;;  %8775 = vmatprep.mubr.msk.f32.mxu0 %vm465_vm2, %v12535_v36  ;;  %v4085_v35 = vadd.f32 %v4030_v27, %v11509_v6 }
 0x30a   : > { %v4326_v31 = vpop.f32.mrf.mxu0  ;;  %v8250_v56 = vpop.f32.mrf.mxu1  ;;  %8729 = vmatmul.mubr.f32.gmra.mxu1 %v11382_v63 }
 0x30b   : > { %v11654_v10 = vadd.f32 %v4326_v31, %v4083_v33  ;;  %v4088_v4 = vadd.f32 %v8250_v56, %v11511_v58  ;;  %8731 = vmatprep.mubr.f32.mxu1 %v5652_v7 }
 0x30c   : > { %v8327_v40 = vpop.f32.mrf.mxu0  ;;  %8776 = vmatmul.mubr.msk.f32.gmra.mxu0 %vm465_vm2, %v12536_v24  ;;  %v4040_v54 = vpop.f32.mrf.mxu1 }
 0x30d   : > { %v11659_v14 = vadd.f32 %v8327_v40, %v4086_v34  ;;  %8778 = vmatprep.mubr.msk.f32.mxu0 %vm465_vm2, %v12537_v8  ;;  %v4087_v6 = vadd.f32 %v4040_v54, %v11514_v51 }
 0x30e   : > { %v4336_v55 = vpop.f32.mrf.mxu0  ;;  %v8253_v63 = vpop.f32.mrf.mxu1  ;;  %8732 = vmatmul.mubr.f32.gmra.mxu1 %v5653_v17 }
 0x30f   : > { %v11664_v1 = vadd.f32 %v4336_v55, %v4085_v35  ;;  %v4090_v58 = vadd.f32 %v8253_v63, %v11516_v37  ;;  %v12540_v37 = vld [vmem:[#allocation24_spill] sm:$0xff] }
 0x310   : > { %v8330_v22 = vpop.f32.mrf.mxu0  ;;  %8779 = vmatmul.mubr.msk.f32.gmra.mxu0 %vm465_vm2, %v12538_v50  ;;  %v4050_v42 = vpop.f32.mrf.mxu1 }
 0x311   : > { %v11669_v62 = vadd.f32 %v8330_v22, %v4088_v4  ;;  %8781 = vmatprep.mubr.msk.f32.mxu0 %vm465_vm2, %v12539_v23  ;;  %v4089_v38 = vadd.f32 %v4050_v42, %v11523_v13 }
 0x312   : > { %v4346_v51 = vpop.f32.mrf.mxu0  ;;  %v8368_v25 = vpop.f32.mrf.mxu1 }
 0x313   : > { %v11674_v3 = vadd.f32 %v4346_v51, %v4087_v6  ;;  %v4672_v41 = vadd.f32 %v8368_v25, %v11528_v20 }
 0x314   : > { %v8333_v15 = vpop.f32.mrf.mxu0  ;;  %8782 = vmatmul.mubr.msk.f32.gmra.mxu0 %vm465_vm2, %v12540_v37  ;;  %v4512_v33 = vpop.f32.mrf.mxu1 }
 0x315   : > { %v11679_v60 = vadd.f32 %v8333_v15, %v4090_v58  ;;  %v4671_v59 = vadd.f32 %v4512_v33, %v11533_v29 }
 0x316   : > { %v4356_v53 = vpop.f32.mrf.mxu0  ;;  %v8371_v34 = vpop.f32.mrf.mxu1 }
 0x317   : > { %v11682_v44 = vadd.f32 %v4356_v53, %v4089_v38  ;;  %v4674_v13 = vadd.f32 %v8371_v34, %v11538_v47 }
 0x318   : > { %v8448_v5 = vpop.f32.mrf.mxu0  ;;  %v4522_v27 = vpop.f32.mrf.mxu1 }
 0x319   : > { %v11685_v7 = vadd.f32 %v8448_v5, %v4672_v41  ;;  %v4673_v20 = vadd.f32 %v4522_v27, %v11542_v16 }
 0x31a   : > { %v4818_v36 = vpop.f32.mrf.mxu0  ;;  %v8374_v35 = vpop.f32.mrf.mxu1 }
 0x31b   : > { %v11688_v31 = vadd.f32 %v4818_v36, %v4671_v59  ;;  %v4676_v56 = vadd.f32 %v8374_v35, %v11547_v52 }
 0x31c   : > { %v8451_v4 = vpop.f32.mrf.mxu0  ;;  %v4532_v29 = vpop.f32.mrf.mxu1 }
 0x31d   : > { %v11691_v17 = vadd.f32 %v8451_v4, %v4674_v13  ;;  %v4675_v40 = vadd.f32 %v4532_v29, %v11552_v0 }
 0x31e   : > { %v4828_v24 = vpop.f32.mrf.mxu0  ;;  %v8377_v47 = vpop.f32.mrf.mxu1 }
 0x31f   : > { %v11694_v54 = vadd.f32 %v4828_v24, %v4673_v20  ;;  %v4678_v8 = vadd.f32 %v8377_v47, %v11557_v28 }
 0x320   : > { %v8454_v6 = vpop.f32.mrf.mxu0  ;;  %v4542_v16 = vpop.f32.mrf.mxu1 }
 0x321   : > { %v11697_v55 = vadd.f32 %v8454_v6, %v4676_v56  ;;  %v4677_v63 = vadd.f32 %v4542_v16, %v11562_v32 }
 0x322   : > { %v4838_v58 = vpop.f32.mrf.mxu0  ;;  %v8380_v52 = vpop.f32.mrf.mxu1 }
 0x323   : > { %v11700_v22 = vadd.f32 %v4838_v58, %v4675_v40  ;;  %v4680_v50 = vadd.f32 %v8380_v52, %v11567_v12 }
 0x324   : > { %v8457_v42 = vpop.f32.mrf.mxu0  ;;  %v4552_v0 = vpop.f32.mrf.mxu1 }
 0x325   : > { %v11703_v23 = vadd.f32 %v8457_v42, %v4678_v8  ;;  %v4679_v38 = vadd.f32 %v4552_v0, %v11572_v43 }
 0x326   : > { %v4848_v51 = vpop.f32.mrf.mxu0  ;;  %v8383_v28 = vpop.f32.mrf.mxu1 }
 0x327   : > { %v11706_v25 = vadd.f32 %v4848_v51, %v4677_v63  ;;  %v4682_v41 = vadd.f32 %v8383_v28, %v11577_v9 }
 0x328   : > { %v8460_v15 = vpop.f32.mrf.mxu0  ;;  %v4562_v32 = vpop.f32.mrf.mxu1 }
 0x329   : > { %v11709_v37 = vadd.f32 %v8460_v15, %v4680_v50  ;;  %v4681_v33 = vadd.f32 %v4562_v32, %v11582_v39 }
 0x32a   : > { %v4858_v59 = vpop.f32.mrf.mxu0  ;;  %v8386_v12 = vpop.f32.mrf.mxu1 }
 0x32b   : > { %v11712_v53 = vadd.f32 %v4858_v59, %v4679_v38  ;;  %v4684_v34 = vadd.f32 %v8386_v12, %v11587_v30 }
 0x32c   : > { %v8463_v13 = vpop.f32.mrf.mxu0  ;;  %v4572_v43 = vpop.f32.mrf.mxu1 }
 0x32d   : > { %v11715_v5 = vadd.f32 %v8463_v13, %v4682_v41  ;;  %v4683_v27 = vadd.f32 %v4572_v43, %v11592_v49 }
 0x32e   : > { %v4868_v20 = vpop.f32.mrf.mxu0  ;;  %v8389_v9 = vpop.f32.mrf.mxu1 }
 0x32f   : > { %v11718_v36 = vadd.f32 %v4868_v20, %v4681_v33  ;;  %v4686_v35 = vadd.f32 %v8389_v9, %v11597_v11 }
 0x330   : > { %v8466_v56 = vpop.f32.mrf.mxu0  ;;  %v4582_v39 = vpop.f32.mrf.mxu1 }
 0x331   : > { %v11721_v4 = vadd.f32 %v8466_v56, %v4684_v34  ;;  %v4685_v29 = vadd.f32 %v4582_v39, %v11602_v45 }
 0x332   : > { %v4878_v40 = vpop.f32.mrf.mxu0  ;;  %v8392_v30 = vpop.f32.mrf.mxu1 }
 0x333   : > { %v11724_v24 = vadd.f32 %v4878_v40, %v4683_v27  ;;  %v4688_v47 = vadd.f32 %v8392_v30, %v11607_v61 }
 0x334   : > { %v8469_v8 = vpop.f32.mrf.mxu0  ;;  %v4592_v49 = vpop.f32.mrf.mxu1 }
 0x335   : > { %v11727_v6 = vadd.f32 %v8469_v8, %v4686_v35  ;;  %v4687_v16 = vadd.f32 %v4592_v49, %v11612_v21 }
 0x336   : > { %v4888_v63 = vpop.f32.mrf.mxu0  ;;  %v8395_v11 = vpop.f32.mrf.mxu1 }
 0x337   : > { %v11730_v58 = vadd.f32 %v4888_v63, %v4685_v29  ;;  %v4690_v52 = vadd.f32 %v8395_v11, %v11617_v18 }
 0x338   : > { %v8472_v50 = vpop.f32.mrf.mxu0  ;;  %v4602_v45 = vpop.f32.mrf.mxu1 }
 0x339   : > { %v11733_v42 = vadd.f32 %v8472_v50, %v4688_v47  ;;  %v4689_v0 = vadd.f32 %v4602_v45, %v11622_v48 }
 0x33a   : > { %v4898_v38 = vpop.f32.mrf.mxu0  ;;  %v8398_v61 = vpop.f32.mrf.mxu1 }
 0x33b   : > { %v11736_v51 = vadd.f32 %v4898_v38, %v4687_v16  ;;  %v4692_v28 = vadd.f32 %v8398_v61, %v11627_v19 }
 0x33c   : > { %v8475_v41 = vpop.f32.mrf.mxu0  ;;  %v4612_v21 = vpop.f32.mrf.mxu1 }
 0x33d   : > { %v11739_v15 = vadd.f32 %v8475_v41, %v4690_v52  ;;  %v4691_v32 = vadd.f32 %v4612_v21, %v11632_v26 }
 0x33e   : > { %v4908_v33 = vpop.f32.mrf.mxu0  ;;  %v8401_v18 = vpop.f32.mrf.mxu1 }
 0x33f   : > { %12541 = vst [vmem:[#allocation35_spill] sm:$0xff] %v11739_v15  ;;  %v11742_v59 = vadd.f32 %v4908_v33, %v4689_v0  ;;  %v4694_v12 = vadd.f32 %v8401_v18, %v11637_v57 }
 0x340   : > { %v8478_v34 = vpop.f32.mrf.mxu0  ;;  %v4622_v48 = vpop.f32.mrf.mxu1 }
 0x341   : > { %12542 = vst [vmem:[#allocation36_spill] sm:$0xff] %v11742_v59  ;;  %v11745_v13 = vadd.f32 %v8478_v34, %v4692_v28  ;;  %v4693_v43 = vadd.f32 %v4622_v48, %v11642_v46 }
 0x342   : > { %v4918_v27 = vpop.f32.mrf.mxu0  ;;  %v8404_v19 = vpop.f32.mrf.mxu1 }
 0x343   : > { %12543 = vst [vmem:[#allocation37_spill] sm:$0xff] %v11745_v13  ;;  %v11748_v20 = vadd.f32 %v4918_v27, %v4691_v32  ;;  %v4696_v9 = vadd.f32 %v8404_v19, %v11648_v2 }
 0x344   : > { %v8481_v35 = vpop.f32.mrf.mxu0  ;;  %v4632_v26 = vpop.f32.mrf.mxu1 }
 0x345   : > { %12544 = vst [vmem:[#allocation85_spill] sm:$0xff] %v11748_v20  ;;  %v11751_v56 = vadd.f32 %v8481_v35, %v4694_v12  ;;  %v4695_v39 = vadd.f32 %v4632_v26, %v11654_v10 }
 0x346   : > { %v4928_v29 = vpop.f32.mrf.mxu0  ;;  %v8407_v57 = vpop.f32.mrf.mxu1 }
 0x347   : > { %12545 = vst [vmem:[#allocation52_spill] sm:$0xff] %v11751_v56  ;;  %v11754_v40 = vadd.f32 %v4928_v29, %v4693_v43  ;;  %v4698_v30 = vadd.f32 %v8407_v57, %v11659_v14 }
 0x348   : > { %v8484_v47 = vpop.f32.mrf.mxu0  ;;  %v4642_v46 = vpop.f32.mrf.mxu1 }
 0x349   : > { %12546 = vst [vmem:[#allocation47_spill] sm:$0xff] %v11754_v40  ;;  %v11757_v8 = vadd.f32 %v8484_v47, %v4696_v9  ;;  %v4697_v49 = vadd.f32 %v4642_v46, %v11664_v1 }
 0x34a   : > { %v4938_v16 = vpop.f32.mrf.mxu0  ;;  %v8410_v2 = vpop.f32.mrf.mxu1 }
 0x34b   : > { %12547 = vst [vmem:[#allocation55_spill] sm:$0xff] %v11757_v8  ;;  %v11760_v63 = vadd.f32 %v4938_v16, %v4695_v39  ;;  %v4700_v11 = vadd.f32 %v8410_v2, %v11669_v62 }
 0x34c   : > { %v8487_v52 = vpop.f32.mrf.mxu0  ;;  %v4652_v10 = vpop.f32.mrf.mxu1 }
 0x34d   : > { %12548 = vst [vmem:[#allocation83_spill] sm:$0xff] %v11760_v63  ;;  %v11763_v50 = vadd.f32 %v8487_v52, %v4698_v30  ;;  %v4699_v45 = vadd.f32 %v4652_v10, %v11674_v3 }
 0x34e   : > { %v4948_v0 = vpop.f32.mrf.mxu0  ;;  %v8413_v14 = vpop.f32.mrf.mxu1 }
 0x34f   : > { %12549 = vst [vmem:[#allocation53_spill] sm:$0xff] %v11763_v50  ;;  %v11766_v38 = vadd.f32 %v4948_v0, %v4697_v49  ;;  %v4702_v61 = vadd.f32 %v8413_v14, %v11679_v60 }
 0x350   : > { %v8490_v28 = vpop.f32.mrf.mxu0  ;;  %v4662_v1 = vpop.f32.mrf.mxu1 }
 0x351   : > { %12550 = vst [vmem:[#allocation87_spill] sm:$0xff] %v11766_v38  ;;  %v11769_v41 = vadd.f32 %v8490_v28, %v4700_v11  ;;  %v4701_v21 = vadd.f32 %v4662_v1, %v11682_v44 }
 0x352   : > { %v4958_v32 = vpop.f32.mrf.mxu0  ;;  %v11772_v62 = vpop.f32.mrf.mxu1 }
 0x353   : > { %12551 = vst [vmem:[#allocation38_spill] sm:$0xff] %v11769_v41  ;;  %v11774_v33 = vadd.f32 %v4958_v32, %v4699_v45 }
 0x354   : > { %v8493_v18 = vpop.f32.mrf.mxu0  ;;  %v11776_v12 = vpop.f32.mrf.mxu1 }
 0x355   : > { %12552 = vst [vmem:[#allocation50_spill] sm:$0xff] %v11774_v33  ;;  %v11778_v3 = vadd.f32 %v8493_v18, %v4702_v61 }
 0x356   : > { %v4968_v34 = vpop.f32.mrf.mxu0  ;;  %v11780_v48 = vpop.f32.mrf.mxu1 }
 0x357   : > { %12553 = vst [vmem:[#allocation84_spill] sm:$0xff] %v11778_v3  ;;  %v11782_v60 = vadd.f32 %v4968_v34, %v4701_v21 }
 0x358   : > { %v8608_v43 = vpop.f32.mrf.mxu0  ;;  %v11784_v27 = vpop.f32.mrf.mxu1 }
 0x359   : > { %12554 = vst [vmem:[#allocation89_spill] sm:$0xff] %v11782_v60 }
 0x35a   : > { %v11786_v19 = vpop.f32.mrf.mxu0  ;;  %v11788_v44 = vpop.f32.mrf.mxu1 }
 0x35c   : > { %v11790_v9 = vpop.f32.mrf.mxu0  ;;  %v11792_v35 = vpop.f32.mrf.mxu1 }
 0x35e   : > { %v11794_v26 = vpop.f32.mrf.mxu0  ;;  %v11796_v39 = vpop.f32.mrf.mxu1 }
 0x360   : > { %v11798_v29 = vpop.f32.mrf.mxu0  ;;  %v11800_v57 = vpop.f32.mrf.mxu1 }
 0x362   : > { %v11802_v30 = vpop.f32.mrf.mxu0  ;;  %v11804_v47 = vpop.f32.mrf.mxu1 }
 0x364   : > { %v11806_v46 = vpop.f32.mrf.mxu0  ;;  %v11808_v49 = vpop.f32.mrf.mxu1 }
 0x366   : > { %v11810_v16 = vpop.f32.mrf.mxu0  ;;  %v11812_v2 = vpop.f32.mrf.mxu1 }
 0x368   : > { %v11814_v11 = vpop.f32.mrf.mxu0  ;;  %v11816_v52 = vpop.f32.mrf.mxu1 }
 0x36a   : > { %v11818_v10 = vpop.f32.mrf.mxu0  ;;  %v11820_v45 = vpop.f32.mrf.mxu1 }
 0x36c   : > { %v11822_v0 = vpop.f32.mrf.mxu0  ;;  %v11824_v14 = vpop.f32.mrf.mxu1 }
 0x36e   : > { %v11826_v61 = vpop.f32.mrf.mxu0  ;;  %v11828_v28 = vpop.f32.mrf.mxu1 }
 0x370   : > { %v11830_v1 = vpop.f32.mrf.mxu0  ;;  %v11832_v21 = vpop.f32.mrf.mxu1 }
 0x372   : > { %v11834_v32 = vpop.f32.mrf.mxu0  ;;  %v11836_v18 = vpop.f32.mrf.mxu1 }
 0x374   : > { %v11838_v34 = vpop.f32.mrf.mxu0  ;;  %v11840_v60 = vpop.f32.mrf.mxu1 }
 0x376   : > { %v11842_v3 = vpop.f32.mrf.mxu0  ;;  %v11844_v33 = vpop.f32.mrf.mxu1 }
 0x377   : > { %12555 = vst [vmem:[#allocation54_spill] sm:$0xff] %v11844_v33 }
 0x378   : > { %v11846_v41 = vpop.f32.mrf.mxu0  ;;  %v11848_v38 = vpop.f32.mrf.mxu1 }
 0x379   : > { %12556 = vst [vmem:[#allocation48_spill] sm:$0xff] %v11848_v38 }
 0x37a   : > { %v11850_v50 = vpop.f32.mrf.mxu0  ;;  %v11852_v63 = vpop.f32.mrf.mxu1 }
 0x37b   : > { %12557 = vst [vmem:[#allocation58_spill] sm:$0xff] %v11850_v50  ;;  %12558 = vst [vmem:[#allocation86_spill] sm:$0xff] %v11852_v63 }
 0x37c   : > { %v11854_v8 = vpop.f32.mrf.mxu0  ;;  %v11856_v40 = vpop.f32.mrf.mxu1 }
 0x37d   : > { %12559 = vst [vmem:[#allocation56_spill] sm:$0xff] %v11854_v8  ;;  %12560 = vst [vmem:[#allocation91_spill] sm:$0xff] %v11856_v40 }
 0x37e   : > { %v11858_v56 = vpop.f32.mrf.mxu0  ;;  %v11860_v20 = vpop.f32.mrf.mxu1 }
 0x37f   : > { %12561 = vst [vmem:[#allocation49_spill] sm:$0xff] %v11858_v56  ;;  %12562 = vst [vmem:[#allocation88_spill] sm:$0xff] %v11860_v20 }
 0x380   : > { %v11862_v13 = vpop.f32.mrf.mxu0  ;;  %v11864_v59 = vpop.f32.mrf.mxu1 }
 0x381   : > { %12563 = vst [vmem:[#allocation93_spill] sm:$0xff] %v11862_v13  ;;  %12564 = vst [vmem:[#allocation57_spill] sm:$0xff] %v11864_v59 }
 0x382   : > { %v11866_v33 = vpop.f32.mrf.mxu0  ;;  %v11868_v15 = vpop.f32.mrf.mxu1 }
 0x383   : > { %12565 = vst [vmem:[#allocation61_spill] sm:$0xff] %v11866_v33  ;;  %12566 = vst [vmem:[#allocation90_spill] sm:$0xff] %v11868_v15 }
 0x384   : > { %v11870_v38 = vpop.f32.mrf.mxu0  ;;  %v11872_v50 = vpop.f32.mrf.mxu1 }
 0x385   : > { %12567 = vst [vmem:[#allocation59_spill] sm:$0xff] %v11870_v38  ;;  %12568 = vst [vmem:[#allocation95_spill] sm:$0xff] %v11872_v50 }
 0x386   : > { %v11874_v63 = vpop.f32.mrf.mxu0  ;;  %v11876_v8 = vpop.f32.mrf.mxu1 }
 0x387   : > { %12569 = vst [vmem:[#allocation40_spill] sm:$0xff] %v11874_v63  ;;  %12570 = vst [vmem:[#allocation39_spill] sm:$0xff] %v11876_v8  ;;  %v5285_v8 = vadd.f32 %v11772_v62, %v11685_v7  ;;  %v11914_v7 = vld [vmem:[%s12118_s4] ss:$0 sm:$0xff] }
 0x388   : > { %v11878_v40 = vpop.f32.mrf.mxu0  ;;  %v11880_v56 = vpop.f32.mrf.mxu1 }
 0x389   : > { %12571 = vst [vmem:[#allocation92_spill] sm:$0xff] %v11878_v40  ;;  %12572 = vst [vmem:[#allocation97_spill] sm:$0xff] %v11880_v56 }
 0x38a   : > { %v11882_v20 = vpop.f32.mrf.mxu0  ;;  %v11884_v13 = vpop.f32.mrf.mxu1 }
 0x38b   : > { %12573 = vst [vmem:[#allocation60_spill] sm:$0xff] %v11882_v20  ;;  %12574 = vst [vmem:[#allocation64_spill] sm:$0xff] %v11884_v13  ;;  %v5591_v13 = vadd.f32 %v8608_v43, %v5285_v8 }
 0x38c   : > { %v11886_v59 = vpop.f32.mrf.mxu0  ;;  %v11888_v33 = vpop.f32.mrf.mxu1 }
 0x38d   : > { %12575 = vst [vmem:[#allocation94_spill] sm:$0xff] %v11886_v59  ;;  %12576 = vst [vmem:[#allocation62_spill] sm:$0xff] %v11888_v33  ;;  %v5284_v59 = vadd.f32 %v11776_v12, %v11688_v31  ;;  %v11919_v31 = vld [vmem:[%s12120_s6] ss:$0 sm:$0xff] }
 0x38e   : > { %v11890_v15 = vpop.f32.mrf.mxu0  ;;  %v11892_v38 = vpop.f32.mrf.mxu1 }
 0x38f   : > { %12577 = vst [vmem:[#allocation99_spill] sm:$0xff] %v11890_v15  ;;  %12578 = vst [vmem:[#allocation41_spill] sm:$0xff] %v11892_v38  ;;  %v5590_v38 = vadd.f32 %v11786_v19, %v5284_v59  ;;  %v5286_v59 = vadd.f32 %v11784_v27, %v11694_v54 }
 0x390   : > { %v11894_v50 = vpop.f32.mrf.mxu0  ;;  %v11896_v63 = vpop.f32.mrf.mxu1 }
 0x391   : > { %12579 = vst [vmem:[#allocation96_spill] sm:$0xff] %v11894_v50  ;;  %12580 = vst [vmem:[#allocation101_spill] sm:$0xff] %v11896_v63  ;;  %v5287_v50 = vadd.f32 %v11780_v48, %v11691_v17  ;;  %v5592_v48 = vadd.f32 %v11794_v26, %v5286_v59 }
 0x392   : > { %v11900_v56 = vpop.f32.mrf.mxu0  ;;  %v8688_v20 = vpop.f32.mrf.mxu1 }
 0x393   : > { %v5897_v63 = vadd.f32 %v8688_v20, %v5591_v13  ;;  %v5593_v62 = vadd.f32 %v11790_v9, %v5287_v50  ;;  %v5289_v13 = vadd.f32 %v11788_v44, %v11697_v55  ;;  %v5288_v50 = vadd.f32 %v11792_v35, %v11700_v22 }
 0x394   : > { %v11904_v33 = vpop.f32.mrf.mxu0  ;;  %v5737_v15 = vpop.f32.mrf.mxu1  ;;  %v5291_v22 = vadd.f32 %v11796_v39, %v11703_v23 }
 0x395   : > { %12581 = vst [vmem:[#allocation63_spill] sm:$0xff] %v11904_v33  ;;  %v5896_v17 = vadd.f32 %v5737_v15, %v5590_v38  ;;  %v5936_v43 = vadd.f32 %v11914_v7, %v5897_v63  ;;  %v5595_v33 = vadd.f32 %v11798_v29, %v5289_v13  ;;  %v5594_v44 = vadd.f32 %v11802_v30, %v5288_v50 }
 0x396   : > { %v11909_v40 = vpop.f32.mrf.mxu0  ;;  %v8691_v8 = vpop.f32.mrf.mxu1  ;;  %v5597_v59 = vadd.f32 %v11806_v46, %v5291_v22 }
 0x397   : > { %12582 = vst [vmem:[#allocation67_spill] sm:$0xff] %v11909_v40  ;;  %v5899_v40 = vadd.f32 %v8691_v8, %v5593_v62  ;;  %v5935_v38 = vadd.f32 %v11914_v7, %v5896_v17  ;;  %v5290_v17 = vadd.f32 %v11800_v57, %v11706_v25 }
 0x398   : > { %v8738_v20 = vpop.f32.mrf.mxu0  ;;  %v5747_v12 = vpop.f32.mrf.mxu1 }
 0x399   : > { %v6050_v19 = vadd.f32 %v8738_v20, %v11919_v31  ;;  %v5898_v27 = vadd.f32 %v5747_v12, %v5592_v48  ;;  %v5938_v29 = vadd.f32 %v11914_v7, %v5899_v40  ;;  %v5596_v40 = vadd.f32 %v11810_v16, %v5290_v17 }
 0x39a   : > { %v6044_v54 = vpop.f32.mrf.mxu0  ;;  %v8694_v55 = vpop.f32.mrf.mxu1  ;;  %v5297_v17 = vadd.f32 %v11820_v45, %v11721_v4 }
 0x39b   : > { %v6204_v15 = vadd.f32 %v6050_v19, %v5936_v43  ;;  %v6045_v63 = vadd.f32 %v11919_v31, %v6044_v54  ;;  %v5901_v62 = vadd.f32 %v8694_v55, %v5595_v33  ;;  %v5937_v23 = vadd.f32 %v11914_v7, %v5898_v27 }
 0x39c   : > { %v8741_v9 = vpop.f32.mrf.mxu0  ;;  %v5757_v35 = vpop.f32.mrf.mxu1  ;;  %v5293_v33 = vadd.f32 %v11804_v47, %v11709_v37  ;;  %v5292_v54 = vadd.f32 %v11808_v49, %v11712_v53  ;;  %v5295_v27 = vadd.f32 %v11812_v2, %v11715_v5 }
 0x39d   : > { %6236 = vst [vmem:[%s11936_s9 + $0x8] sm:$0xff] %v6204_v15  ;;  %v6203_v26 = vadd.f32 %v6045_v63, %v5935_v38  ;;  %v6060_v8 = vadd.f32 %v8741_v9, %v11919_v31  ;;  %v5900_v12 = vadd.f32 %v5757_v35, %v5594_v44  ;;  %v5940_v25 = vadd.f32 %v11914_v7, %v5901_v62 }
 0x39e   : > { %v6054_v13 = vpop.f32.mrf.mxu0  ;;  %v8697_v30 = vpop.f32.mrf.mxu1  ;;  %v5599_v50 = vadd.f32 %v11814_v11, %v5293_v33  ;;  %v5598_v63 = vadd.f32 %v11818_v10, %v5292_v54  ;;  %v5601_v35 = vadd.f32 %v11822_v0, %v5295_v27 }
 0x39f   : > { %6235 = vst [vmem:[%s11936_s9] sm:$0xff] %v6203_v26  ;;  %v6206_v20 = vadd.f32 %v6060_v8, %v5938_v29  ;;  %v6055_v39 = vadd.f32 %v11919_v31, %v6054_v13  ;;  %v5903_v19 = vadd.f32 %v8697_v30, %v5597_v59  ;;  %v5939_v37 = vadd.f32 %v11914_v7, %v5900_v12 }
 0x3a0   : > { %v8744_v48 = vpop.f32.mrf.mxu0  ;;  %v5767_v46 = vpop.f32.mrf.mxu1  ;;  %v5294_v26 = vadd.f32 %v11816_v52, %v11718_v36 }
 0x3a1   : > { %6238 = vst [vmem:[%s11936_s9 + $0x18] sm:$0xff] %v6206_v20  ;;  %v6205_v43 = vadd.f32 %v6055_v39, %v5937_v23  ;;  %v6070_v57 = vadd.f32 %v8744_v48, %v11919_v31  ;;  %v5902_v38 = vadd.f32 %v5767_v46, %v5596_v40  ;;  %v5942_v53 = vadd.f32 %v11914_v7, %v5903_v19 }
 0x3a2   : > { %v6064_v55 = vpop.f32.mrf.mxu0  ;;  %v8700_v16 = vpop.f32.mrf.mxu1  ;;  %v5600_v59 = vadd.f32 %v11826_v61, %v5294_v26  ;;  %v5603_v23 = vadd.f32 %v11830_v1, %v5297_v17  ;;  %v5296_v39 = vadd.f32 %v11824_v14, %v11724_v24  ;;  %v5299_v46 = vadd.f32 %v11828_v28, %v11727_v6  ;;  %v12585_v26 = vld [vmem:[#allocation54_spill] sm:$0xff]  ;;  %v12588_v17 = vld [vmem:[#allocation48_spill] sm:$0xff] }
 0x3a3   : > { %6237 = vst [vmem:[%s11936_s9 + $0x10] sm:$0xff] %v6205_v43  ;;  %v6208_v15 = vadd.f32 %v6070_v57, %v5940_v25  ;;  %v6065_v47 = vadd.f32 %v11919_v31, %v6064_v55  ;;  %v5905_v9 = vadd.f32 %v8700_v16, %v5599_v50  ;;  %v5941_v5 = vadd.f32 %v11914_v7, %v5902_v38 }
 0x3a4   : > { %v8747_v44 = vpop.f32.mrf.mxu0  ;;  %v5777_v11 = vpop.f32.mrf.mxu1  ;;  %v5602_v48 = vadd.f32 %v11834_v32, %v5296_v39  ;;  %v5605_v19 = vadd.f32 %v11838_v34, %v5299_v46  ;;  %v5298_v50 = vadd.f32 %v11832_v21, %v11730_v58  ;;  %v12589_v39 = vld [vmem:[#allocation49_spill] sm:$0xff] }
 0x3a5   : > { %6240 = vst [vmem:[%s11936_s9 + $0x28] sm:$0xff] %v6208_v15  ;;  %v6207_v22 = vadd.f32 %v6065_v47, %v5939_v37  ;;  %v6080_v49 = vadd.f32 %v8747_v44, %v11919_v31  ;;  %v5904_v62 = vadd.f32 %v5777_v11, %v5598_v63  ;;  %v5944_v36 = vadd.f32 %v11914_v7, %v5905_v9 }
 0x3a6   : > { %v6074_v29 = vpop.f32.mrf.mxu0  ;;  %v8703_v10 = vpop.f32.mrf.mxu1  ;;  %v5604_v15 = vadd.f32 %v11842_v3, %v5298_v50  ;;  %v5301_v37 = vadd.f32 %v11836_v18, %v11733_v42  ;;  %v5300_v44 = vadd.f32 %v11840_v60, %v11736_v51 }
 0x3a7   : > { %6239 = vst [vmem:[%s11936_s9 + $0x20] sm:$0xff] %v6207_v22  ;;  %v6210_v8 = vadd.f32 %v6080_v49, %v5942_v53  ;;  %v6075_v2 = vadd.f32 %v11919_v31, %v6074_v29  ;;  %v5907_v20 = vadd.f32 %v8703_v10, %v5601_v35  ;;  %v5943_v4 = vadd.f32 %v11914_v7, %v5904_v62  ;;  %v12583_v49 = vld [vmem:[#allocation58_spill] sm:$0xff]  ;;  %v12584_v35 = vld [vmem:[#allocation35_spill] sm:$0xff] }
 0x3a8   : > { %v8750_v13 = vpop.f32.mrf.mxu0  ;;  %v5787_v0 = vpop.f32.mrf.mxu1  ;;  %v5607_v27 = vadd.f32 %v11846_v41, %v5301_v37  ;;  %v5606_v9 = vadd.f32 %v12583_v49, %v5300_v44  ;;  %v5303_v29 = vadd.f32 %v12585_v26, %v12584_v35  ;;  %v12596_v37 = vld [vmem:[#allocation52_spill] sm:$0xff] }
 0x3a9   : > { %6242 = vst [vmem:[%s11936_s9 + $0x38] sm:$0xff] %v6210_v8  ;;  %v6209_v30 = vadd.f32 %v6075_v2, %v5941_v5  ;;  %v6090_v52 = vadd.f32 %v8750_v13, %v11919_v31  ;;  %v5906_v33 = vadd.f32 %v5787_v0, %v5600_v59  ;;  %v5946_v24 = vadd.f32 %v11914_v7, %v5907_v20  ;;  %v12586_v2 = vld [vmem:[#allocation56_spill] sm:$0xff] }
 0x3aa   : > { %v6084_v12 = vpop.f32.mrf.mxu0  ;;  %v8706_v61 = vpop.f32.mrf.mxu1  ;;  %v5609_v62 = vadd.f32 %v12586_v2, %v5303_v29  ;;  %v12587_v59 = vld [vmem:[#allocation36_spill] sm:$0xff] }
 0x3ab   : > { %6241 = vst [vmem:[%s11936_s9 + $0x30] sm:$0xff] %v6209_v30  ;;  %v6212_v40 = vadd.f32 %v6090_v52, %v5944_v36  ;;  %v6085_v45 = vadd.f32 %v11919_v31, %v6084_v12  ;;  %v5909_v57 = vadd.f32 %v8706_v61, %v5603_v23  ;;  %v5945_v6 = vadd.f32 %v11914_v7, %v5906_v33  ;;  %v12590_v61 = vld [vmem:[#allocation37_spill] sm:$0xff] }
 0x3ac   : > { %v8753_v43 = vpop.f32.mrf.mxu0  ;;  %v5797_v1 = vpop.f32.mrf.mxu1  ;;  %v5302_v13 = vadd.f32 %v12588_v17, %v12587_v59 }
 0x3ad   : > { %6244 = vst [vmem:[%s11936_s9 + $0x48] sm:$0xff] %v6212_v40  ;;  %v6211_v25 = vadd.f32 %v6085_v45, %v5943_v4  ;;  %v6100_v14 = vadd.f32 %v8753_v43, %v11919_v31  ;;  %v5908_v16 = vadd.f32 %v5797_v1, %v5602_v48  ;;  %v5948_v58 = vadd.f32 %v11914_v7, %v5909_v57  ;;  %v12591_v40 = vld [vmem:[#allocation86_spill] sm:$0xff]  ;;  %v12594_v57 = vld [vmem:[#allocation91_spill] sm:$0xff] }
 0x3ae   : > { %v6094_v54 = vpop.f32.mrf.mxu0  ;;  %v8709_v32 = vpop.f32.mrf.mxu1  ;;  %v5608_v12 = vadd.f32 %v12589_v39, %v5302_v13  ;;  %v5305_v4 = vadd.f32 %v12591_v40, %v12590_v61 }
 0x3af   : > { %6243 = vst [vmem:[%s11936_s9 + $0x40] sm:$0xff] %v6211_v25  ;;  %v6214_v55 = vadd.f32 %v6100_v14, %v5946_v24  ;;  %v6095_v28 = vadd.f32 %v11919_v31, %v6094_v54  ;;  %v5911_v63 = vadd.f32 %v8709_v32, %v5605_v19  ;;  %v5947_v42 = vadd.f32 %v11914_v7, %v5908_v16  ;;  %v12592_v25 = vld [vmem:[#allocation93_spill] sm:$0xff] }
 0x3b0   : > { %v8756_v47 = vpop.f32.mrf.mxu0  ;;  %v5807_v34 = vpop.f32.mrf.mxu1  ;;  %v5611_v24 = vadd.f32 %v12592_v25, %v5305_v4  ;;  %v12593_v14 = vld [vmem:[#allocation85_spill] sm:$0xff] }
 0x3b1   : > { %6246 = vst [vmem:[%s11936_s9 + $0x58] sm:$0xff] %v6214_v55  ;;  %v6213_v38 = vadd.f32 %v6095_v28, %v5945_v6  ;;  %v6110_v21 = vadd.f32 %v8756_v47, %v11919_v31  ;;  %v5910_v53 = vadd.f32 %v5807_v34, %v5604_v15  ;;  %v5950_v51 = vadd.f32 %v11914_v7, %v5911_v63  ;;  %v12595_v16 = vld [vmem:[#allocation61_spill] sm:$0xff]  ;;  %v12597_v47 = vld [vmem:[#allocation88_spill] sm:$0xff] }
 0x3b2   : > { %v6104_v11 = vpop.f32.mrf.mxu0  ;;  %v8712_v3 = vpop.f32.mrf.mxu1  ;;  %v5304_v19 = vadd.f32 %v12594_v57, %v12593_v14  ;;  %v5307_v34 = vadd.f32 %v12597_v47, %v12596_v37 }
 0x3b3   : > { %6245 = vst [vmem:[%s11936_s9 + $0x50] sm:$0xff] %v6213_v38  ;;  %v6216_v22 = vadd.f32 %v6110_v21, %v5948_v58  ;;  %v6105_v18 = vadd.f32 %v11919_v31, %v6104_v11  ;;  %v5913_v5 = vadd.f32 %v8712_v3, %v5607_v27  ;;  %v5949_v52 = vadd.f32 %v11914_v7, %v5910_v53  ;;  %v12598_v11 = vld [vmem:[#allocation59_spill] sm:$0xff] }
 0x3b4   : > { %v8759_v10 = vpop.f32.mrf.mxu0  ;;  %v5817_v41 = vpop.f32.mrf.mxu1  ;;  %v5610_v15 = vadd.f32 %v12595_v16, %v5304_v19  ;;  %v5613_v3 = vadd.f32 %v12598_v11, %v5307_v34 }
 0x3b5   : > { %6248 = vst [vmem:[%s11936_s9 + $0x68] sm:$0xff] %v6216_v22  ;;  %v6215_v8 = vadd.f32 %v6105_v18, %v5947_v42  ;;  %v6120_v60 = vadd.f32 %v8759_v10, %v11919_v31  ;;  %v5912_v23 = vadd.f32 %v5817_v41, %v5606_v9  ;;  %v5952_v46 = vadd.f32 %v11914_v7, %v5913_v5  ;;  %v12599_v22 = vld [vmem:[#allocation47_spill] sm:$0xff]  ;;  %v12600_v42 = vld [vmem:[#allocation57_spill] sm:$0xff]  ;;  %v12601_v10 = vld [vmem:[#allocation40_spill] sm:$0xff] }
 0x3b6   : > { %v6114_v0 = vpop.f32.mrf.mxu0  ;;  %v8715_v30 = vpop.f32.mrf.mxu1  ;;  %v5306_v18 = vadd.f32 %v12600_v42, %v12599_v22 }
 0x3b7   : > { %6247 = vst [vmem:[%s11936_s9 + $0x60] sm:$0xff] %v6215_v8  ;;  %v6218_v36 = vadd.f32 %v6120_v60, %v5950_v51  ;;  %v6115_v20 = vadd.f32 %v11919_v31, %v6114_v0  ;;  %v5915_v1 = vadd.f32 %v8715_v30, %v5609_v62  ;;  %v5951_v55 = vadd.f32 %v11914_v7, %v5912_v23  ;;  %v12602_v8 = vld [vmem:[#allocation55_spill] sm:$0xff]  ;;  %v12603_v51 = vld [vmem:[#allocation90_spill] sm:$0xff]  ;;  %v12604_v0 = vld [vmem:[#allocation92_spill] sm:$0xff] }
 0x3b8   : > { %v8762_v45 = vpop.f32.mrf.mxu0  ;;  %v5827_v33 = vpop.f32.mrf.mxu1  ;;  %v5612_v41 = vadd.f32 %v12601_v10, %v5306_v18  ;;  %v5309_v60 = vadd.f32 %v12603_v51, %v12602_v8 }
 0x3b9   : > { %6250 = vst [vmem:[%s11936_s9 + $0x78] sm:$0xff] %v6218_v36  ;;  %v6217_v48 = vadd.f32 %v6115_v20, %v5949_v52  ;;  %v6130_v43 = vadd.f32 %v8762_v45, %v11919_v31  ;;  %v5914_v28 = vadd.f32 %v5827_v33, %v5608_v12  ;;  %v5954_v63 = vadd.f32 %v11914_v7, %v5915_v1  ;;  %v12605_v36 = vld [vmem:[#allocation83_spill] sm:$0xff]  ;;  %v12607_v45 = vld [vmem:[#allocation60_spill] sm:$0xff] }
 0x3ba   : > { %v6124_v50 = vpop.f32.mrf.mxu0  ;;  %v8718_v54 = vpop.f32.mrf.mxu1  ;;  %v5615_v30 = vadd.f32 %v12604_v0, %v5309_v60  ;;  %v12606_v52 = vld [vmem:[#allocation95_spill] sm:$0xff] }
 0x3bb   : > { %6249 = vst [vmem:[%s11936_s9 + $0x70] sm:$0xff] %v6217_v48  ;;  %v6220_v32 = vadd.f32 %v6130_v43, %v5952_v46  ;;  %v6125_v6 = vadd.f32 %v11919_v31, %v6124_v50  ;;  %v5917_v44 = vadd.f32 %v8718_v54, %v5611_v24  ;;  %v5953_v35 = vadd.f32 %v11914_v7, %v5914_v28  ;;  %v12608_v48 = vld [vmem:[#allocation53_spill] sm:$0xff]  ;;  %v12609_v46 = vld [vmem:[#allocation39_spill] sm:$0xff]  ;;  %v12610_v50 = vld [vmem:[#allocation94_spill] sm:$0xff] }
 0x3bc   : > { %v8765_v38 = vpop.f32.mrf.mxu0  ;;  %v5837_v58 = vpop.f32.mrf.mxu1  ;;  %v5308_v20 = vadd.f32 %v12606_v52, %v12605_v36  ;;  %v5311_v43 = vadd.f32 %v12609_v46, %v12608_v48  ;;  %v12624_v46 = vld [vmem:[#allocation67_spill] sm:$0xff] }
 0x3bd   : > { %6252 = vst [vmem:[%s11936_s9 + $0x88] sm:$0xff] %v6220_v32  ;;  %v6219_v21 = vadd.f32 %v6125_v6, %v5951_v55  ;;  %v6140_v27 = vadd.f32 %v8765_v38, %v11919_v31  ;;  %v5916_v29 = vadd.f32 %v5837_v58, %v5610_v15  ;;  %v5956_v59 = vadd.f32 %v11914_v7, %v5917_v44  ;;  %v12611_v32 = vld [vmem:[#allocation87_spill] sm:$0xff]  ;;  %v12612_v55 = vld [vmem:[#allocation97_spill] sm:$0xff] }
 0x3be   : > { %v6134_v53 = vpop.f32.mrf.mxu0  ;;  %v8721_v49 = vpop.f32.mrf.mxu1  ;;  %v5614_v33 = vadd.f32 %v12607_v45, %v5308_v20  ;;  %v5617_v54 = vadd.f32 %v12610_v50, %v5311_v43  ;;  %v5310_v6 = vadd.f32 %v12612_v55, %v12611_v32  ;;  %v12613_v38 = vld [vmem:[#allocation99_spill] sm:$0xff] }
 0x3bf   : > { %6251 = vst [vmem:[%s11936_s9 + $0x80] sm:$0xff] %v6219_v21  ;;  %v6222_v9 = vadd.f32 %v6140_v27, %v5954_v63  ;;  %v6135_v26 = vadd.f32 %v11919_v31, %v6134_v53  ;;  %v5919_v13 = vadd.f32 %v8721_v49, %v5613_v3  ;;  %v5955_v61 = vadd.f32 %v11914_v7, %v5916_v29  ;;  %v12614_v21 = vld [vmem:[#allocation38_spill] sm:$0xff]  ;;  %v12615_v63 = vld [vmem:[#allocation64_spill] sm:$0xff]  ;;  %v12621_v20 = vld [vmem:[#allocation63_spill] sm:$0xff] }
 0x3c0   : > { %v8768_v5 = vpop.f32.mrf.mxu0  ;;  %v5847_v2 = vpop.f32.mrf.mxu1  ;;  %v5616_v58 = vadd.f32 %v12613_v38, %v5310_v6  ;;  %v5313_v27 = vadd.f32 %v12615_v63, %v12614_v21  ;;  %v12616_v53 = vld [vmem:[#allocation96_spill] sm:$0xff] }
 0x3c1   : > { %6254 = vst [vmem:[%s11936_s9 + $0x98] sm:$0xff] %v6222_v9  ;;  %v6221_v62 = vadd.f32 %v6135_v26, %v5953_v35  ;;  %v6150_v17 = vadd.f32 %v8768_v5, %v11919_v31  ;;  %v5918_v4 = vadd.f32 %v5847_v2, %v5612_v41  ;;  %v5958_v14 = vadd.f32 %v11914_v7, %v5919_v13  ;;  %v12617_v9 = vld [vmem:[#allocation50_spill] sm:$0xff]  ;;  %v12619_v2 = vld [vmem:[#allocation84_spill] sm:$0xff] }
 0x3c2   : > { %v6144_v23 = vpop.f32.mrf.mxu0  ;;  %v8724_v39 = vpop.f32.mrf.mxu1  ;;  %v5619_v49 = vadd.f32 %v12616_v53, %v5313_v27  ;;  %v12618_v35 = vld [vmem:[#allocation62_spill] sm:$0xff] }
 0x3c3   : > { %6253 = vst [vmem:[%s11936_s9 + $0x90] sm:$0xff] %v6221_v62  ;;  %v6224_v12 = vadd.f32 %v6150_v17, %v5956_v59  ;;  %v6145_v40 = vadd.f32 %v11919_v31, %v6144_v23  ;;  %v5921_v19 = vadd.f32 %v8724_v39, %v5615_v30  ;;  %v5957_v37 = vadd.f32 %v11914_v7, %v5918_v4  ;;  %v12620_v62 = vld [vmem:[#allocation41_spill] sm:$0xff] }
 0x3c4   : > { %v8771_v1 = vpop.f32.mrf.mxu0  ;;  %v5857_v25 = vpop.f32.mrf.mxu1  ;;  %v5312_v26 = vadd.f32 %v12618_v35, %v12617_v9  ;;  %v5315_v59 = vadd.f32 %v12620_v62, %v12619_v2  ;;  %v12622_v39 = vld [vmem:[#allocation89_spill] sm:$0xff] }
 0x3c5   : > { %6256 = vst [vmem:[%s11936_s9 + $0xa8] sm:$0xff] %v6224_v12  ;;  %v6223_v24 = vadd.f32 %v6145_v40, %v5955_v61  ;;  %v6160_v57 = vadd.f32 %v8771_v1, %v11919_v31  ;;  %v5920_v34 = vadd.f32 %v5857_v25, %v5614_v33  ;;  %v5960_v22 = vadd.f32 %v11914_v7, %v5921_v19  ;;  %v12623_v12 = vld [vmem:[#allocation101_spill] sm:$0xff] }
 0x3c6   : > { %v6154_v28 = vpop.f32.mrf.mxu0  ;;  %v8727_v16 = vpop.f32.mrf.mxu1  ;;  %v5618_v5 = vadd.f32 %v11900_v56, %v5312_v26  ;;  %v5621_v23 = vadd.f32 %v12621_v20, %v5315_v59  ;;  %v5314_v61 = vadd.f32 %v12623_v12, %v12622_v39 }
 0x3c7   : > { %6255 = vst [vmem:[%s11936_s9 + $0xa0] sm:$0xff] %v6223_v24  ;;  %v6226_v15 = vadd.f32 %v6160_v57, %v5958_v14  ;;  %v6155_v47 = vadd.f32 %v11919_v31, %v6154_v28  ;;  %v5923_v18 = vadd.f32 %v8727_v16, %v5617_v54  ;;  %v5959_v8 = vadd.f32 %v11914_v7, %v5920_v34 }
 0x3c8   : > { %v8774_v44 = vpop.f32.mrf.mxu0  ;;  %v5867_v11 = vpop.f32.mrf.mxu1  ;;  %v5620_v43 = vadd.f32 %v12624_v46, %v5314_v61 }
 0x3c9   : > { %6258 = vst [vmem:[%s11936_s9 + $0xb8] sm:$0xff] %v6226_v15  ;;  %v6225_v3 = vadd.f32 %v6155_v47, %v5957_v37  ;;  %v6170_v42 = vadd.f32 %v8774_v44, %v11919_v31  ;;  %v5922_v60 = vadd.f32 %v5867_v11, %v5616_v58  ;;  %v5962_v30 = vadd.f32 %v11914_v7, %v5923_v18 }
 0x3ca   : > { %v6164_v29 = vpop.f32.mrf.mxu0  ;;  %v8730_v10 = vpop.f32.mrf.mxu1 }
 0x3cb   : > { %6257 = vst [vmem:[%s11936_s9 + $0xb0] sm:$0xff] %v6225_v3  ;;  %v6228_v41 = vadd.f32 %v6170_v42, %v5960_v22  ;;  %v6165_v51 = vadd.f32 %v11919_v31, %v6164_v29  ;;  %v5925_v52 = vadd.f32 %v8730_v10, %v5619_v49  ;;  %v5961_v45 = vadd.f32 %v11914_v7, %v5922_v60 }
 0x3cc   : > { %v8777_v17 = vpop.f32.mrf.mxu0  ;;  %v5877_v13 = vpop.f32.mrf.mxu1 }
 0x3cd   : > { %6260 = vst [vmem:[%s11936_s9 + $0xc8] sm:$0xff] %v6228_v41  ;;  %v6227_v0 = vadd.f32 %v6165_v51, %v5959_v8  ;;  %v6180_v36 = vadd.f32 %v8777_v17, %v11919_v31  ;;  %v5924_v48 = vadd.f32 %v5877_v13, %v5618_v5  ;;  %v5964_v14 = vadd.f32 %v11914_v7, %v5925_v52 }
 0x3ce   : > { %v6174_v40 = vpop.f32.mrf.mxu0  ;;  %v8733_v56 = vpop.f32.mrf.mxu1 }
 0x3cf   : > { %6259 = vst [vmem:[%s11936_s9 + $0xc0] sm:$0xff] %v6227_v0  ;;  %v6230_v4 = vadd.f32 %v6180_v36, %v5962_v30  ;;  %v6175_v33 = vadd.f32 %v11919_v31, %v6174_v40  ;;  %v5927_v19 = vadd.f32 %v8733_v56, %v5621_v23  ;;  %v5963_v32 = vadd.f32 %v11914_v7, %v5924_v48 }
 0x3d0   : > { %v8780_v1 = vpop.f32.mrf.mxu0  ;;  %v5887_v25 = vpop.f32.mrf.mxu1 }
 0x3d1   : > { %6262 = vst [vmem:[%s11936_s9 + $0xd8] sm:$0xff] %v6230_v4  ;;  %v6229_v24 = vadd.f32 %v6175_v33, %v5961_v45  ;;  %v6190_v57 = vadd.f32 %v8780_v1, %v11919_v31  ;;  %v5926_v6 = vadd.f32 %v5887_v25, %v5620_v43  ;;  %v5966_v15 = vadd.f32 %v11914_v7, %v5927_v19 }
 0x3d2   : > { %v6184_v50 = vpop.f32.mrf.mxu0 }
 0x3d3   : > { %6261 = vst [vmem:[%s11936_s9 + $0xd0] sm:$0xff] %v6229_v24  ;;  %v6232_v54 = vadd.f32 %v6190_v57, %v5964_v14  ;;  %v6185_v55 = vadd.f32 %v11919_v31, %v6184_v50  ;;  %v5965_v38 = vadd.f32 %v11914_v7, %v5926_v6 }
 0x3d4   : > { %v8783_v28 = vpop.f32.mrf.mxu0 }
 0x3d5   : > { %6264 = vst [vmem:[%s11936_s9 + $0xe8] sm:$0xff] %v6232_v54  ;;  %v6231_v16 = vadd.f32 %v6185_v55, %v5963_v32  ;;  %v6200_v37 = vadd.f32 %v8783_v28, %v11919_v31 }
 0x3d6   : > { %v6194_v47 = vpop.f32.mrf.mxu0 }
 0x3d7   : > { %6263 = vst [vmem:[%s11936_s9 + $0xe0] sm:$0xff] %v6231_v16  ;;  %v6234_v34 = vadd.f32 %v6200_v37, %v5966_v15  ;;  %v6195_v58 = vadd.f32 %v11919_v31, %v6194_v47 }
 0x3d9   : > { %6266 = vst [vmem:[%s11936_s9 + $0xf8] sm:$0xff] %v6234_v34  ;;  %v6233_v21 = vadd.f32 %v6195_v58, %v5965_v38 }
 0x3db   : > { %6265 = vst [vmem:[%s11936_s9 + $0xf0] sm:$0xff] %v6233_v21 }
 0x3dc PF: > { %s17_s24 = sadd.s32 1, %s8803_s24  }
 0x3dd   : > { %p14_p4 = scmp.ge.s32.totalorder %s17_s24, 4  }
 0x3df   :  { %16 = sbr.rel (!%p14_p4) target bundleno = 1 (0x1), region = 96 }

</bundles_post_ra>
